<compile_context>
chip_gen: v5e
topology: v5e:2x2
jax: 0.10.0
libtpu: 0.0.40
codegen_flags: <defaults>
</compile_context>

<pallas_src>
import functools

import jax
import jax.numpy as jnp
from jax import lax
from jax.experimental import pallas as pl
from jax.experimental.pallas import tpu as pltpu


_EPS = 1e-5
_LANE = 128
# Fused single-block BN kernel is used while the estimated resident footprint
# (A + W + out + f32 temps) stays under this budget; otherwise the two-pass
# M-tiled scheme keeps VMEM batch-independent.
_FUSED_VMEM_BUDGET = 16 * 1024 * 1024


# ---------------------------------------------------------------------------
# In-kernel helpers (traced inside the Pallas kernels)
# ---------------------------------------------------------------------------
def _group_channel_sums(acc, groups, c_out):
    """acc: (groups*c_out, M) f32 -> per-channel (sum, sum_sq), each (c_out, 1)."""
    row_sum = jnp.sum(acc, axis=1, keepdims=True)
    row_sq = jnp.sum(acc * acc, axis=1, keepdims=True)
    ch_sum = row_sum[0:c_out]
    ch_sq = row_sq[0:c_out]
    for g in range(1, groups):                       # static python loop
        ch_sum = ch_sum + row_sum[g * c_out:(g + 1) * c_out]
        ch_sq = ch_sq + row_sq[g * c_out:(g + 1) * c_out]
    return ch_sum, ch_sq


def _bn_scale_shift(ch_sum, ch_sq, gamma, beta, count, eps):
    inv = 1.0 / count
    mean = ch_sum * inv
    # clamp: single-pass E[x^2] - mean^2 can cancel to a tiny negative value
    var = jnp.maximum(ch_sq * inv - mean * mean, 0.0)
    scale = gamma * lax.rsqrt(var + eps)
    shift = beta - mean * scale
    return scale, shift


def _tile_groups(v, groups):
    if groups == 1:
        return v
    return jnp.concatenate([v] * groups, axis=0)     # (c,1) -> (groups*c,1)


# ---------------------------------------------------------------------------
# Pallas kernels
# ---------------------------------------------------------------------------
def _convt_bn_relu_fused_kernel(a_ref, w_ref, gamma_ref, beta_ref, o_ref, *,
                                groups, c_out, count, eps):
    # (groups*c_out, K) @ (K, M) -> f32 acc on the MXU; training-mode BN over
    # the full M axis + all phase row-groups, then ReLU, stored as bf16.
    acc = jnp.dot(w_ref[...], a_ref[...], preferred_element_type=jnp.float32)
    ch_sum, ch_sq = _group_channel_sums(acc, groups, c_out)
    scale, shift = _bn_scale_shift(ch_sum, ch_sq, gamma_ref[...], beta_ref[...],
                                   count, eps)
    scale = _tile_groups(scale, groups)
    shift = _tile_groups(shift, groups)
    o_ref[...] = jnp.maximum(acc * scale + shift, 0.0).astype(o_ref.dtype)


def _convt_stats_kernel(a_ref, w_ref, y_ref, sum_ref, sq_ref, *, groups, c_out):
    # Pass 1 of the tiled BN scheme: per-M-tile matmul, raw conv output stored
    # as bf16, per-channel sum / sum-of-squares accumulated across the
    # "arbitrary" M grid axis (constant-index output blocks stay resident).
    acc = jnp.dot(w_ref[...], a_ref[...], preferred_element_type=jnp.float32)
    ch_sum, ch_sq = _group_channel_sums(acc, groups, c_out)

    @pl.when(pl.program_id(0) == 0)
    def _init():
        sum_ref[...] = jnp.zeros_like(sum_ref)
        sq_ref[...] = jnp.zeros_like(sq_ref)

    sum_ref[...] += ch_sum
    sq_ref[...] += ch_sq
    y_ref[...] = acc.astype(y_ref.dtype)


def _bn_relu_apply_kernel(y_ref, sum_ref, sq_ref, gamma_ref, beta_ref, o_ref, *,
                          groups, c_out, count, eps):
    # Pass 2: normalize + ReLU per M tile ("parallel" grid -> v7x megacore).
    scale, shift = _bn_scale_shift(sum_ref[...], sq_ref[...], gamma_ref[...],
                                   beta_ref[...], count, eps)
    scale = _tile_groups(scale, groups)
    shift = _tile_groups(shift, groups)
    y = y_ref[...].astype(jnp.float32)
    o_ref[...] = jnp.maximum(y * scale + shift, 0.0).astype(o_ref.dtype)


def _convt_tanh_kernel(a_ref, w_ref, o_ref):
    acc = jnp.dot(w_ref[...], a_ref[...], preferred_element_type=jnp.float32)
    o_ref[...] = jnp.tanh(acc)


# ---------------------------------------------------------------------------
# pallas_call wrappers
# ---------------------------------------------------------------------------
def _pick_tile(m_pad):
    """Largest tile in {1024,512,256,128} dividing m_pad with grid >= 2."""
    for t in (1024, 512, 256, 128):
        if m_pad % t == 0 and m_pad // t >= 2:
            return t
    return m_pad                                     # tiny M: single block


def _conv_bn_relu(a, m_true, w, gamma, beta, *, groups, c_out,
                  fused_vmem_budget, eps=_EPS):
    """a: (K, M_pad) bf16, w: (groups*c_out, K) bf16 -> (groups*c_out, M_pad) bf16."""
    k_dim, m_pad = a.shape
    rows = groups * c_out
    count = groups * m_true                          # elements per channel
    gamma = gamma.reshape(c_out, 1).astype(jnp.float32)
    beta = beta.reshape(c_out, 1).astype(jnp.float32)

    # resident-footprint estimate of the fused path: A + W + out + ~3 f32 temps
    est = (k_dim * m_pad * 2 + rows * k_dim * 2 + rows * m_pad * 2
           + 3 * rows * m_pad * 4)
    if est <= fused_vmem_budget:
        return pl.pallas_call(
            functools.partial(_convt_bn_relu_fused_kernel, groups=groups,
                              c_out=c_out, count=count, eps=eps),
            out_shape=jax.ShapeDtypeStruct((rows, m_pad), jnp.bfloat16),
            grid=(1,),
            in_specs=[
                pl.BlockSpec((k_dim, m_pad), lambda i: (0, 0)),
                pl.BlockSpec((rows, k_dim), lambda i: (0, 0)),
                pl.BlockSpec((c_out, 1), lambda i: (0, 0)),
                pl.BlockSpec((c_out, 1), lambda i: (0, 0)),
            ],
            out_specs=pl.BlockSpec((rows, m_pad), lambda i: (0, 0)),
            compiler_params=pltpu.CompilerParams(
                dimension_semantics=("arbitrary",),
                vmem_limit_bytes=48 * 1024 * 1024),
        )(a, w, gamma, beta)

    # --- two-pass M-tiled scheme (batch-independent VMEM, pipelined DMA) ---
    tm = _pick_tile(m_pad)
    grid = (m_pad // tm,)
    y_raw, s_sum, s_sq = pl.pallas_call(
        functools.partial(_convt_stats_kernel, groups=groups, c_out=c_out),
        out_shape=(jax.ShapeDtypeStruct((rows, m_pad), jnp.bfloat16),
                   jax.ShapeDtypeStruct((c_out, 1), jnp.float32),
                   jax.ShapeDtypeStruct((c_out, 1), jnp.float32)),
        grid=grid,
        in_specs=[
            pl.BlockSpec((k_dim, tm), lambda i: (0, i)),
            pl.BlockSpec((rows, k_dim), lambda i: (0, 0)),
        ],
        out_specs=(pl.BlockSpec((rows, tm), lambda i: (0, i)),
                   pl.BlockSpec((c_out, 1), lambda i: (0, 0)),
                   pl.BlockSpec((c_out, 1), lambda i: (0, 0))),
        compiler_params=pltpu.CompilerParams(
            dimension_semantics=("arbitrary",),      # stats accumulate over M
            vmem_limit_bytes=32 * 1024 * 1024),
    )(a, w)

    return pl.pallas_call(
        functools.partial(_bn_relu_apply_kernel, groups=groups, c_out=c_out,
                          count=count, eps=eps),
        out_shape=jax.ShapeDtypeStruct((rows, m_pad), jnp.bfloat16),
        grid=grid,
        in_specs=[
            pl.BlockSpec((rows, tm), lambda i: (0, i)),
            pl.BlockSpec((c_out, 1), lambda i: (0, 0)),
            pl.BlockSpec((c_out, 1), lambda i: (0, 0)),
            pl.BlockSpec((c_out, 1), lambda i: (0, 0)),
            pl.BlockSpec((c_out, 1), lambda i: (0, 0)),
        ],
        out_specs=pl.BlockSpec((rows, tm), lambda i: (0, i)),
        compiler_params=pltpu.CompilerParams(
            dimension_semantics=("parallel",),       # both v7x TensorCores
            vmem_limit_bytes=32 * 1024 * 1024),
    )(y_raw, s_sum, s_sq, gamma, beta)


def _conv_tanh(a, w):
    """a: (K, M_pad) bf16, w: (rows, K) bf16 -> (rows, M_pad) f32, tanh fused."""
    k_dim, m_pad = a.shape
    rows = w.shape[0]
    tm = _pick_tile(m_pad)
    return pl.pallas_call(
        _convt_tanh_kernel,
        out_shape=jax.ShapeDtypeStruct((rows, m_pad), jnp.float32),
        grid=(m_pad // tm,),
        in_specs=[
            pl.BlockSpec((k_dim, tm), lambda i: (0, i)),
            pl.BlockSpec((rows, k_dim), lambda i: (0, 0)),
        ],
        out_specs=pl.BlockSpec((rows, tm), lambda i: (0, i)),
        compiler_params=pltpu.CompilerParams(
            dimension_semantics=("parallel",),
            vmem_limit_bytes=32 * 1024 * 1024),
    )(a, w)


# ---------------------------------------------------------------------------
# ConvTranspose2d lowering glue (channel-major layout, static slices only)
# ---------------------------------------------------------------------------
def _pad_lanes(a):
    """Zero-pad the M (lane) axis of A up to a multiple of 128.  Zero columns
    give zero acc columns, so BN stats stay exact with the true count."""
    m = a.shape[1]
    m_pad = -(-m // _LANE) * _LANE
    if m_pad != m:
        a = jnp.pad(a, ((0, 0), (0, m_pad - m)))
    return a, m


def _im2col(xp, taps_h, taps_w, h_out, w_out):
    """xp: (C, N, Hp, Wp) -> A (C*taps, N*h_out*w_out), K ordered (c, dy, dx)."""
    c, n = xp.shape[0], xp.shape[1]
    m = n * h_out * w_out
    slabs = []
    for dy in range(taps_h):
        for dx in range(taps_w):
            slabs.append(xp[:, :, dy:dy + h_out, dx:dx + w_out].reshape(c, 1, m))
    return jnp.concatenate(slabs, axis=1).reshape(c * taps_h * taps_w, m)


def _flip_weight(w_pt):
    """ConvTranspose2d weight (C_in, C_out, k, k) -> (C_out, C_in*k*k) of the
    equivalent stride-1 correlation (spatially flipped), K ordered (c, dy, dx)."""
    c_in, c_out, k, _ = w_pt.shape
    w_conv = jnp.transpose(w_pt, (1, 0, 2, 3))[:, :, ::-1, ::-1]
    return w_conv.reshape(c_out, c_in * k * k)


# stride-2 / pad-1 / k=4 phase decomposition: out[2m+py, 2n+px] touches only a
# 2x2 subset of the 4x4 taps.  The four phase sub-kernels are embedded in a
# shared 3x3-tap K axis so one im2col feeds one packed (4*C_out, C_in*9)
# matmul (no structural zeros streamed, 4x more occupied MXU output rows).
_PHASE_TAPS = {0: ((0, 3), (1, 1)),      # even output index: (dy, ky) pairs
               1: ((1, 2), (2, 0))}      # odd  output index: (dy, ky) pairs


def _pack_phase_weight(w_pt):
    """(C_in, C_out, 4, 4) -> (4*C_out, C_in*9); rows ordered (py*2+px, c_out),
    cols ordered (c_in, dy, dx) matching the shared 3x3-tap im2col."""
    c_in, c_out = w_pt.shape[0], w_pt.shape[1]
    wp = jnp.zeros((4, c_out, c_in, 3, 3), w_pt.dtype)
    for py in (0, 1):
        for px in (0, 1):
            p = py * 2 + px
            for dy, ky in _PHASE_TAPS[py]:
                for dx, kx in _PHASE_TAPS[px]:
                    wp = wp.at[p, :, :, dy, dx].set(w_pt[:, :, ky, kx].T)
    return wp.reshape(4 * c_out, c_in * 9)


def _deinterleave_phases(y, c_out, n, h, w):
    """y: (4*c_out, >= n*h*w) phase-packed conv output -> (c_out, n, 2h, 2w)."""
    y = y[:, :n * h * w].reshape(2, 2, c_out, n, h, w)
    return jnp.transpose(y, (2, 3, 4, 0, 5, 1)).reshape(c_out, n, 2 * h, 2 * w)


# ---------------------------------------------------------------------------
# Layers (channel-major (C, N, H, W) carry)
# ---------------------------------------------------------------------------
def _layer_first(x_cnhw, params, fused_vmem_budget):
    """LayerT(latent, 64, stride=1, padding=0): 1x1 -> 4x4 (tiny tensors)."""
    c, n, h, w = x_cnhw.shape
    pad = 3                                          # k - 1 - padding
    h_out, w_out = h + 3, w + 3
    xp = jnp.pad(x_cnhw, ((0, 0), (0, 0), (pad, pad), (pad, pad)))
    xp = xp.astype(jnp.bfloat16)
    a, m_true = _pad_lanes(_im2col(xp, 4, 4, h_out, w_out))
    w_mat = _flip_weight(params["w"]).astype(jnp.bfloat16)
    c_out = params["w"].shape[1]
    y = _conv_bn_relu(a, m_true, w_mat, params["gamma"], params["beta"],
                      groups=1, c_out=c_out, fused_vmem_budget=fused_vmem_budget)
    return y[:, :m_true].reshape(c_out, n, h_out, w_out)


def _layer_stride2(x_cnhw, params, fused_vmem_budget):
    """LayerT(C_in, C_out, stride=2, padding=1): phase-decomposed deconv + BN
    (training-mode batch stats) + ReLU.  (C,N,H,W) -> (C_out,N,2H,2W)."""
    c, n, h, w = x_cnhw.shape
    xp = jnp.pad(x_cnhw, ((0, 0), (0, 0), (1, 1), (1, 1))).astype(jnp.bfloat16)
    a, m_true = _pad_lanes(_im2col(xp, 3, 3, h, w))  # shared 3x3-tap patches
    wp = _pack_phase_weight(params["w"]).astype(jnp.bfloat16)
    c_out = params["w"].shape[1]
    y = _conv_bn_relu(a, m_true, wp, params["gamma"], params["beta"],
                      groups=4, c_out=c_out, fused_vmem_budget=fused_vmem_budget)
    return _deinterleave_phases(y, c_out, n, h, w)


def _finisher(x_cnhw, w_pt):
    """ConvTranspose2d(32, 3, 4, 2, 1, bias=False) -> Tanh (phase packed)."""
    c, n, h, w = x_cnhw.shape
    xp = jnp.pad(x_cnhw, ((0, 0), (0, 0), (1, 1), (1, 1))).astype(jnp.bfloat16)
    a, m_true = _pad_lanes(_im2col(xp, 3, 3, h, w))
    wp = _pack_phase_weight(w_pt).astype(jnp.bfloat16)
    y = _conv_tanh(a, wp)                            # (12, M_pad) f32
    return _deinterleave_phases(y, w_pt.shape[1], n, h, w)


# ---------------------------------------------------------------------------
# Parameters (arrays only — strides/paddings are static per layer index)
# ---------------------------------------------------------------------------
def _make_layer_params(key, c_in, c_out, k=4, scale=0.05):
    w = scale * jax.random.normal(key, (c_in, c_out, k, k), jnp.float32)
    return {
        "w": w,
        "gamma": jnp.ones((c_out,), jnp.float32),    # BatchNorm2d default init
        "beta": jnp.zeros((c_out,), jnp.float32),
    }


def make_gskip_params(latent, key):
    keys = jax.random.split(key, 16)
    return {
        "32": {
            "layers": [
                _make_layer_params(keys[0], latent, 64),
                _make_layer_params(keys[1], 64, 64),
                _make_layer_params(keys[2], 64, 32),
            ],
            "fin_w": 0.05 * jax.random.normal(keys[3], (32, 3, 4, 4), jnp.float32),
        },
        "64": {
            "layers": [
                _make_layer_params(keys[4], latent, 64),
                _make_layer_params(keys[5], 64, 64),
                _make_layer_params(keys[6], 64, 64),
                _make_layer_params(keys[7], 64, 32),
            ],
            "fin_w": 0.05 * jax.random.normal(keys[8], (32, 3, 4, 4), jnp.float32),
        },
    }


# ---------------------------------------------------------------------------
# Forward (mirrors GSkip.forward).  skipped are returned in bf16 (documented
# precision choice: all matmuls are bf16-in / f32-accumulate).
# ---------------------------------------------------------------------------
def gskip_forward(x, params, res, fused_vmem_budget=_FUSED_VMEM_BUDGET):
    """x: (N, latent, 1, 1) NCHW.  Returns (out NCHW f32, skipped NCHW list,
    last layer first)."""
    branch = params[str(res)]
    h = jnp.transpose(x, (1, 0, 2, 3))               # carry (C, N, H, W)
    skipped = []
    for idx, layer_params in enumerate(branch["layers"]):
        if idx == 0:                                 # LayerT(latent, 64, 1, 0)
            h = _layer_first(h, layer_params, fused_vmem_budget)
        else:                                        # LayerT(_, _, 2, 1)
            h = _layer_stride2(h, layer_params, fused_vmem_budget)
        skipped.append(jnp.transpose(h, (1, 0, 2, 3)))   # NCHW (PyTorch parity)

    out = _finisher(h, branch["fin_w"])              # (3, N, 2H, 2W) f32
    out = jnp.transpose(out, (1, 0, 2, 3))
    skipped.reverse()
    return out, skipped


# ---------------------------------------------------------------------------
# Pure-JAX f32 reference (for numerical validation)
# ---------------------------------------------------------------------------
def _ref_conv_transpose(x, w_pt, stride, padding):
    w_flip = jnp.transpose(w_pt, (1, 0, 2, 3))[:, :, ::-1, ::-1]
    k = w_pt.shape[2]
    p = k - 1 - padding
    return lax.conv_general_dilated(
        x, w_flip, window_strides=(1, 1), padding=[(p, p), (p, p)],
        lhs_dilation=(stride, stride),
        dimension_numbers=("NCHW", "OIHW", "NCHW"),
        precision=lax.Precision.HIGHEST)


def _ref_forward(x, params, res):
    cfg = {"32": ((1, 0), (2, 1), (2, 1)),
           "64": ((1, 0), (2, 1), (2, 1), (2, 1))}[str(res)]
    branch = params[str(res)]
    h = x
    for lp, (s, p) in zip(branch["layers"], cfg):
        h = _ref_conv_transpose(h, lp["w"], s, p)
        mean = jnp.mean(h, axis=(0, 2, 3), keepdims=True)
        var = jnp.mean((h - mean) ** 2, axis=(0, 2, 3), keepdims=True)
        g = lp["gamma"].reshape(1, -1, 1, 1)
        b = lp["beta"].reshape(1, -1, 1, 1)
        h = jnp.maximum((h - mean) * lax.rsqrt(var + _EPS) * g + b, 0.0)
    h = _ref_conv_transpose(h, branch["fin_w"], 2, 1)
    return jnp.tanh(h)


# ---------------------------------------------------------------------------
if __name__ == "__main__":
    latent, res, batch = 8, 32, 2

    key = jax.random.PRNGKey(0)
    pkey, xkey = jax.random.split(key)
    params = make_gskip_params(latent, pkey)
    x = jax.random.normal(xkey, (batch, latent, 1, 1), jnp.float32)

    fwd = jax.jit(gskip_forward, static_argnums=(2, 3))
    out, skipped = fwd(x, params, res, _FUSED_VMEM_BUDGET)
    out = jax.block_until_ready(out)

    assert out.shape == (batch, 3, 32, 32), out.shape
    assert len(skipped) == 3
    assert skipped[0].shape == (batch, 32, 16, 16), skipped[0].shape
    assert bool(jnp.all(jnp.isfinite(out)))

    # numerical parity against the f32 reference (bf16 matmuls -> loose tol)
    ref = jax.jit(_ref_forward, static_argnums=(2,))(x, params, res)
    assert float(jnp.max(jnp.abs(out - jax.block_until_ready(ref)))) < 0.15

    # exercise the two-pass M-tiled BN path (chosen automatically at larger
    # batch / tighter VMEM budgets) by forcing the fused-path budget to zero.
    out_tiled, _ = fwd(x, params, res, 0)
    out_tiled = jax.block_until_ready(out_tiled)
    assert float(jnp.max(jnp.abs(out_tiled - out))) < 0.05

    print("KERNEL_OK")
</pallas_src>

<mosaic_0001>
module attributes {stable_mosaic.version = 11 : i64} {
  func.func @_convt_bn_relu_fused_kernel(%arg0: i32, %arg1: memref<128x128xbf16, #tpu.memory_space<vmem>>, %arg2: memref<64x128xbf16, #tpu.memory_space<vmem>>, %arg3: memref<64x1xf32, #tpu.memory_space<vmem>>, %arg4: memref<64x1xf32, #tpu.memory_space<vmem>>, %arg5: memref<64x128xbf16, #tpu.memory_space<vmem>>) attributes {dimension_semantics = [#tpu.dimension_semantics<arbitrary>], iteration_bounds = array<i64: 1>, scalar_prefetch = 0 : i64, scratch_operands = 0 : i64, tpu.core_type = #tpu.core_type<tc>, window_params = [{pipeline_mode = #tpu.pipeline_mode<synchronous>, transform_indices = @transform_0, window_bounds = array<i64: 128, 128>}, {pipeline_mode = #tpu.pipeline_mode<synchronous>, transform_indices = @transform_1, window_bounds = array<i64: 64, 128>}, {pipeline_mode = #tpu.pipeline_mode<synchronous>, transform_indices = @transform_2, window_bounds = array<i64: 64, 1>}, {pipeline_mode = #tpu.pipeline_mode<synchronous>, transform_indices = @transform_3, window_bounds = array<i64: 64, 1>}, {pipeline_mode = #tpu.pipeline_mode<synchronous>, transform_indices = @transform_4, window_bounds = array<i64: 64, 128>}]} {
    %c0 = arith.constant 0 : index
    %c0_0 = arith.constant 0 : index
    %0 = vector.load %arg2[%c0, %c0_0] : memref<64x128xbf16, #tpu.memory_space<vmem>>, vector<64x128xbf16>
    %c0_1 = arith.constant 0 : index
    %c0_2 = arith.constant 0 : index
    %1 = vector.load %arg1[%c0_1, %c0_2] : memref<128x128xbf16, #tpu.memory_space<vmem>>, vector<128x128xbf16>
    %cst = arith.constant dense<0.000000e+00> : vector<64x128xf32>
    %2 = tpu.matmul %0, %1, %cst {dimension_numbers = #tpu.dot_dimension_numbers<[1], [0], [0], [1], [0, 0, 1, 1], [], []>} : vector<64x128xbf16>, vector<128x128xbf16>, vector<64x128xf32> -> vector<64x128xf32>
    %cst_3 = arith.constant dense<0.000000e+00> : vector<64xf32>
    %3 = vector.multi_reduction <add>, %2, %cst_3 [1] : vector<64x128xf32> to vector<64xf32>
    %4 = vector.shape_cast %3 : vector<64xf32> to vector<64x1xf32>
    %5 = arith.mulf %2, %2 : vector<64x128xf32>
    %cst_4 = arith.constant dense<0.000000e+00> : vector<64xf32>
    %6 = vector.multi_reduction <add>, %5, %cst_4 [1] : vector<64x128xf32> to vector<64xf32>
    %7 = vector.shape_cast %6 : vector<64xf32> to vector<64x1xf32>
    %c0_5 = arith.constant 0 : index
    %c0_6 = arith.constant 0 : index
    %8 = vector.load %arg3[%c0_5, %c0_6] : memref<64x1xf32, #tpu.memory_space<vmem>>, vector<64x1xf32>
    %c0_7 = arith.constant 0 : index
    %c0_8 = arith.constant 0 : index
    %9 = vector.load %arg4[%c0_7, %c0_8] : memref<64x1xf32, #tpu.memory_space<vmem>>, vector<64x1xf32>
    %cst_9 = arith.constant 3.125000e-02 : f32
    %10 = vector.broadcast %cst_9 : f32 to vector<64x1xf32>
    %11 = arith.mulf %4, %10 : vector<64x1xf32>
    %cst_10 = arith.constant 3.125000e-02 : f32
    %12 = vector.broadcast %cst_10 : f32 to vector<64x1xf32>
    %13 = arith.mulf %7, %12 : vector<64x1xf32>
    %14 = arith.mulf %11, %11 : vector<64x1xf32>
    %15 = arith.subf %13, %14 : vector<64x1xf32>
    %cst_11 = arith.constant 0.000000e+00 : f32
    %16 = vector.broadcast %cst_11 : f32 to vector<64x1xf32>
    %17 = arith.maximumf %15, %16 : vector<64x1xf32>
    %cst_12 = arith.constant 9.99999974E-6 : f32
    %18 = vector.broadcast %cst_12 : f32 to vector<64x1xf32>
    %19 = arith.addf %17, %18 : vector<64x1xf32>
    %20 = math.rsqrt %19 : vector<64x1xf32>
    %21 = arith.mulf %8, %20 : vector<64x1xf32>
    %22 = arith.mulf %11, %21 : vector<64x1xf32>
    %23 = arith.subf %9, %22 : vector<64x1xf32>
    %24 = vector.broadcast %21 : vector<64x1xf32> to vector<64x128xf32>
    %25 = arith.mulf %2, %24 : vector<64x128xf32>
    %26 = vector.broadcast %23 : vector<64x1xf32> to vector<64x128xf32>
    %27 = arith.addf %25, %26 : vector<64x128xf32>
    %cst_13 = arith.constant 0.000000e+00 : f32
    %28 = vector.broadcast %cst_13 : f32 to vector<64x128xf32>
    %29 = arith.maximumf %27, %28 : vector<64x128xf32>
    %30 = arith.truncf %29 : vector<64x128xf32> to vector<64x128xbf16>
    %c0_14 = arith.constant 0 : index
    %c0_15 = arith.constant 0 : index
    %31 = vector.load %arg5[%c0_14, %c0_15] : memref<64x128xbf16, #tpu.memory_space<vmem>>, vector<64x128xbf16>
    tpu.vector_store %arg5[%c0_14, %c0_15], %30 {strides = array<i32>} : memref<64x128xbf16, #tpu.memory_space<vmem>>, vector<64x128xbf16>,
    return
  }
  func.func @transform_0(%arg0: i32) -> (i32, i32) {
    %c0_i32 = arith.constant 0 : i32
    %c0_i32_0 = arith.constant 0 : i32
    %c0_i32_1 = arith.constant 0 : i32
    return %c0_i32, %c0_i32_0 : i32, i32
  }
  func.func @transform_1(%arg0: i32) -> (i32, i32) {
    %c0_i32 = arith.constant 0 : i32
    %c0_i32_0 = arith.constant 0 : i32
    %c0_i32_1 = arith.constant 0 : i32
    return %c0_i32, %c0_i32_0 : i32, i32
  }
  func.func @transform_2(%arg0: i32) -> (i32, i32) {
    %c0_i32 = arith.constant 0 : i32
    %c0_i32_0 = arith.constant 0 : i32
    %c0_i32_1 = arith.constant 0 : i32
    return %c0_i32, %c0_i32_0 : i32, i32
  }
  func.func @transform_3(%arg0: i32) -> (i32, i32) {
    %c0_i32 = arith.constant 0 : i32
    %c0_i32_0 = arith.constant 0 : i32
    %c0_i32_1 = arith.constant 0 : i32
    return %c0_i32, %c0_i32_0 : i32, i32
  }
  func.func @transform_4(%arg0: i32) -> (i32, i32) {
    %c0_i32 = arith.constant 0 : i32
    %c0_i32_0 = arith.constant 0 : i32
    %c0_i32_1 = arith.constant 0 : i32
    return %c0_i32, %c0_i32_0 : i32, i32
  }
}

module attributes {stable_mosaic.version = 11 : i64} {
  func.func @_convt_bn_relu_fused_kernel(%arg0: i32, %arg1: memref<576x128xbf16, #tpu.memory_space<vmem>>, %arg2: memref<256x576xbf16, #tpu.memory_space<vmem>>, %arg3: memref<64x1xf32, #tpu.memory_space<vmem>>, %arg4: memref<64x1xf32, #tpu.memory_space<vmem>>, %arg5: memref<256x128xbf16, #tpu.memory_space<vmem>>) attributes {dimension_semantics = [#tpu.dimension_semantics<arbitrary>], iteration_bounds = array<i64: 1>, scalar_prefetch = 0 : i64, scratch_operands = 0 : i64, tpu.core_type = #tpu.core_type<tc>, window_params = [{pipeline_mode = #tpu.pipeline_mode<synchronous>, transform_indices = @transform_0, window_bounds = array<i64: 576, 128>}, {pipeline_mode = #tpu.pipeline_mode<synchronous>, transform_indices = @transform_1, window_bounds = array<i64: 256, 576>}, {pipeline_mode = #tpu.pipeline_mode<synchronous>, transform_indices = @transform_2, window_bounds = array<i64: 64, 1>}, {pipeline_mode = #tpu.pipeline_mode<synchronous>, transform_indices = @transform_3, window_bounds = array<i64: 64, 1>}, {pipeline_mode = #tpu.pipeline_mode<synchronous>, transform_indices = @transform_4, window_bounds = array<i64: 256, 128>}]} {
    %c0 = arith.constant 0 : index
    %c0_0 = arith.constant 0 : index
    %0 = vector.load %arg2[%c0, %c0_0] : memref<256x576xbf16, #tpu.memory_space<vmem>>, vector<256x576xbf16>
    %c0_1 = arith.constant 0 : index
    %c0_2 = arith.constant 0 : index
    %1 = vector.load %arg1[%c0_1, %c0_2] : memref<576x128xbf16, #tpu.memory_space<vmem>>, vector<576x128xbf16>
    %cst = arith.constant dense<0.000000e+00> : vector<256x128xf32>
    %2 = tpu.matmul %0, %1, %cst {dimension_numbers = #tpu.dot_dimension_numbers<[1], [0], [0], [1], [0, 0, 1, 1], [], []>} : vector<256x576xbf16>, vector<576x128xbf16>, vector<256x128xf32> -> vector<256x128xf32>
    %cst_3 = arith.constant dense<0.000000e+00> : vector<256xf32>
    %3 = vector.multi_reduction <add>, %2, %cst_3 [1] : vector<256x128xf32> to vector<256xf32>
    %4 = vector.shape_cast %3 : vector<256xf32> to vector<256x1xf32>
    %5 = arith.mulf %2, %2 : vector<256x128xf32>
    %cst_4 = arith.constant dense<0.000000e+00> : vector<256xf32>
    %6 = vector.multi_reduction <add>, %5, %cst_4 [1] : vector<256x128xf32> to vector<256xf32>
    %7 = vector.shape_cast %6 : vector<256xf32> to vector<256x1xf32>
    %8 = vector.extract_strided_slice %4 {offsets = [0, 0], sizes = [64, 1], strides = [1, 1]} : vector<256x1xf32> to vector<64x1xf32>
    %9 = vector.extract_strided_slice %7 {offsets = [0, 0], sizes = [64, 1], strides = [1, 1]} : vector<256x1xf32> to vector<64x1xf32>
    %10 = vector.extract_strided_slice %4 {offsets = [64, 0], sizes = [64, 1], strides = [1, 1]} : vector<256x1xf32> to vector<64x1xf32>
    %11 = arith.addf %8, %10 : vector<64x1xf32>
    %12 = vector.extract_strided_slice %7 {offsets = [64, 0], sizes = [64, 1], strides = [1, 1]} : vector<256x1xf32> to vector<64x1xf32>
    %13 = arith.addf %9, %12 : vector<64x1xf32>
    %14 = vector.extract_strided_slice %4 {offsets = [128, 0], sizes = [64, 1], strides = [1, 1]} : vector<256x1xf32> to vector<64x1xf32>
    %15 = arith.addf %11, %14 : vector<64x1xf32>
    %16 = vector.extract_strided_slice %7 {offsets = [128, 0], sizes = [64, 1], strides = [1, 1]} : vector<256x1xf32> to vector<64x1xf32>
    %17 = arith.addf %13, %16 : vector<64x1xf32>
    %18 = vector.extract_strided_slice %4 {offsets = [192, 0], sizes = [64, 1], strides = [1, 1]} : vector<256x1xf32> to vector<64x1xf32>
    %19 = arith.addf %15, %18 : vector<64x1xf32>
    %20 = vector.extract_strided_slice %7 {offsets = [192, 0], sizes = [64, 1], strides = [1, 1]} : vector<256x1xf32> to vector<64x1xf32>
    %21 = arith.addf %17, %20 : vector<64x1xf32>
    %c0_5 = arith.constant 0 : index
    %c0_6 = arith.constant 0 : index
    %22 = vector.load %arg3[%c0_5, %c0_6] : memref<64x1xf32, #tpu.memory_space<vmem>>, vector<64x1xf32>
    %c0_7 = arith.constant 0 : index
    %c0_8 = arith.constant 0 : index
    %23 = vector.load %arg4[%c0_7, %c0_8] : memref<64x1xf32, #tpu.memory_space<vmem>>, vector<64x1xf32>
    %cst_9 = arith.constant 7.812500e-03 : f32
    %24 = vector.broadcast %cst_9 : f32 to vector<64x1xf32>
    %25 = arith.mulf %19, %24 : vector<64x1xf32>
    %cst_10 = arith.constant 7.812500e-03 : f32
    %26 = vector.broadcast %cst_10 : f32 to vector<64x1xf32>
    %27 = arith.mulf %21, %26 : vector<64x1xf32>
    %28 = arith.mulf %25, %25 : vector<64x1xf32>
    %29 = arith.subf %27, %28 : vector<64x1xf32>
    %cst_11 = arith.constant 0.000000e+00 : f32
    %30 = vector.broadcast %cst_11 : f32 to vector<64x1xf32>
    %31 = arith.maximumf %29, %30 : vector<64x1xf32>
    %cst_12 = arith.constant 9.99999974E-6 : f32
    %32 = vector.broadcast %cst_12 : f32 to vector<64x1xf32>
    %33 = arith.addf %31, %32 : vector<64x1xf32>
    %34 = math.rsqrt %33 : vector<64x1xf32>
    %35 = arith.mulf %22, %34 : vector<64x1xf32>
    %36 = arith.mulf %25, %35 : vector<64x1xf32>
    %37 = arith.subf %23, %36 : vector<64x1xf32>
    %38 = tpu.concatenate %35, %35, %35, %35 in 0 : vector<64x1xf32>, vector<64x1xf32>, vector<64x1xf32>, vector<64x1xf32> -> vector<256x1xf32>
    %39 = tpu.concatenate %37, %37, %37, %37 in 0 : vector<64x1xf32>, vector<64x1xf32>, vector<64x1xf32>, vector<64x1xf32> -> vector<256x1xf32>
    %40 = vector.broadcast %38 : vector<256x1xf32> to vector<256x128xf32>
    %41 = arith.mulf %2, %40 : vector<256x128xf32>
    %42 = vector.broadcast %39 : vector<256x1xf32> to vector<256x128xf32>
    %43 = arith.addf %41, %42 : vector<256x128xf32>
    %cst_13 = arith.constant 0.000000e+00 : f32
    %44 = vector.broadcast %cst_13 : f32 to vector<256x128xf32>
    %45 = arith.maximumf %43, %44 : vector<256x128xf32>
    %46 = arith.truncf %45 : vector<256x128xf32> to vector<256x128xbf16>
    %c0_14 = arith.constant 0 : index
    %c0_15 = arith.constant 0 : index
    %47 = vector.load %arg5[%c0_14, %c0_15] : memref<256x128xbf16, #tpu.memory_space<vmem>>, vector<256x128xbf16>
    tpu.vector_store %arg5[%c0_14, %c0_15], %46 {strides = array<i32>} : memref<256x128xbf16, #tpu.memory_space<vmem>>, vector<256x128xbf16>,
    return
  }
  func.func @transform_0(%arg0: i32) -> (i32, i32) {
    %c0_i32 = arith.constant 0 : i32
    %c0_i32_0 = arith.constant 0 : i32
    %c0_i32_1 = arith.constant 0 : i32
    return %c0_i32, %c0_i32_0 : i32, i32
  }
  func.func @transform_1(%arg0: i32) -> (i32, i32) {
    %c0_i32 = arith.constant 0 : i32
    %c0_i32_0 = arith.constant 0 : i32
    %c0_i32_1 = arith.constant 0 : i32
    return %c0_i32, %c0_i32_0 : i32, i32
  }
  func.func @transform_2(%arg0: i32) -> (i32, i32) {
    %c0_i32 = arith.constant 0 : i32
    %c0_i32_0 = arith.constant 0 : i32
    %c0_i32_1 = arith.constant 0 : i32
    return %c0_i32, %c0_i32_0 : i32, i32
  }
  func.func @transform_3(%arg0: i32) -> (i32, i32) {
    %c0_i32 = arith.constant 0 : i32
    %c0_i32_0 = arith.constant 0 : i32
    %c0_i32_1 = arith.constant 0 : i32
    return %c0_i32, %c0_i32_0 : i32, i32
  }
  func.func @transform_4(%arg0: i32) -> (i32, i32) {
    %c0_i32 = arith.constant 0 : i32
    %c0_i32_0 = arith.constant 0 : i32
    %c0_i32_1 = arith.constant 0 : i32
    return %c0_i32, %c0_i32_0 : i32, i32
  }
}

module attributes {stable_mosaic.version = 11 : i64} {
  func.func @_convt_bn_relu_fused_kernel(%arg0: i32, %arg1: memref<576x128xbf16, #tpu.memory_space<vmem>>, %arg2: memref<128x576xbf16, #tpu.memory_space<vmem>>, %arg3: memref<32x1xf32, #tpu.memory_space<vmem>>, %arg4: memref<32x1xf32, #tpu.memory_space<vmem>>, %arg5: memref<128x128xbf16, #tpu.memory_space<vmem>>) attributes {dimension_semantics = [#tpu.dimension_semantics<arbitrary>], iteration_bounds = array<i64: 1>, scalar_prefetch = 0 : i64, scratch_operands = 0 : i64, tpu.core_type = #tpu.core_type<tc>, window_params = [{pipeline_mode = #tpu.pipeline_mode<synchronous>, transform_indices = @transform_0, window_bounds = array<i64: 576, 128>}, {pipeline_mode = #tpu.pipeline_mode<synchronous>, transform_indices = @transform_1, window_bounds = array<i64: 128, 576>}, {pipeline_mode = #tpu.pipeline_mode<synchronous>, transform_indices = @transform_2, window_bounds = array<i64: 32, 1>}, {pipeline_mode = #tpu.pipeline_mode<synchronous>, transform_indices = @transform_3, window_bounds = array<i64: 32, 1>}, {pipeline_mode = #tpu.pipeline_mode<synchronous>, transform_indices = @transform_4, window_bounds = array<i64: 128, 128>}]} {
    %c0 = arith.constant 0 : index
    %c0_0 = arith.constant 0 : index
    %0 = vector.load %arg2[%c0, %c0_0] : memref<128x576xbf16, #tpu.memory_space<vmem>>, vector<128x576xbf16>
    %c0_1 = arith.constant 0 : index
    %c0_2 = arith.constant 0 : index
    %1 = vector.load %arg1[%c0_1, %c0_2] : memref<576x128xbf16, #tpu.memory_space<vmem>>, vector<576x128xbf16>
    %cst = arith.constant dense<0.000000e+00> : vector<128x128xf32>
    %2 = tpu.matmul %0, %1, %cst {dimension_numbers = #tpu.dot_dimension_numbers<[1], [0], [0], [1], [0, 0, 1, 1], [], []>} : vector<128x576xbf16>, vector<576x128xbf16>, vector<128x128xf32> -> vector<128x128xf32>
    %cst_3 = arith.constant dense<0.000000e+00> : vector<128xf32>
    %3 = vector.multi_reduction <add>, %2, %cst_3 [1] : vector<128x128xf32> to vector<128xf32>
    %4 = vector.shape_cast %3 : vector<128xf32> to vector<128x1xf32>
    %5 = arith.mulf %2, %2 : vector<128x128xf32>
    %cst_4 = arith.constant dense<0.000000e+00> : vector<128xf32>
    %6 = vector.multi_reduction <add>, %5, %cst_4 [1] : vector<128x128xf32> to vector<128xf32>
    %7 = vector.shape_cast %6 : vector<128xf32> to vector<128x1xf32>
    %8 = vector.extract_strided_slice %4 {offsets = [0, 0], sizes = [32, 1], strides = [1, 1]} : vector<128x1xf32> to vector<32x1xf32>
    %9 = vector.extract_strided_slice %7 {offsets = [0, 0], sizes = [32, 1], strides = [1, 1]} : vector<128x1xf32> to vector<32x1xf32>
    %10 = vector.extract_strided_slice %4 {offsets = [32, 0], sizes = [32, 1], strides = [1, 1]} : vector<128x1xf32> to vector<32x1xf32>
    %11 = arith.addf %8, %10 : vector<32x1xf32>
    %12 = vector.extract_strided_slice %7 {offsets = [32, 0], sizes = [32, 1], strides = [1, 1]} : vector<128x1xf32> to vector<32x1xf32>
    %13 = arith.addf %9, %12 : vector<32x1xf32>
    %14 = vector.extract_strided_slice %4 {offsets = [64, 0], sizes = [32, 1], strides = [1, 1]} : vector<128x1xf32> to vector<32x1xf32>
    %15 = arith.addf %11, %14 : vector<32x1xf32>
    %16 = vector.extract_strided_slice %7 {offsets = [64, 0], sizes = [32, 1], strides = [1, 1]} : vector<128x1xf32> to vector<32x1xf32>
    %17 = arith.addf %13, %16 : vector<32x1xf32>
    %18 = vector.extract_strided_slice %4 {offsets = [96, 0], sizes = [32, 1], strides = [1, 1]} : vector<128x1xf32> to vector<32x1xf32>
    %19 = arith.addf %15, %18 : vector<32x1xf32>
    %20 = vector.extract_strided_slice %7 {offsets = [96, 0], sizes = [32, 1], strides = [1, 1]} : vector<128x1xf32> to vector<32x1xf32>
    %21 = arith.addf %17, %20 : vector<32x1xf32>
    %c0_5 = arith.constant 0 : index
    %c0_6 = arith.constant 0 : index
    %22 = vector.load %arg3[%c0_5, %c0_6] : memref<32x1xf32, #tpu.memory_space<vmem>>, vector<32x1xf32>
    %c0_7 = arith.constant 0 : index
    %c0_8 = arith.constant 0 : index
    %23 = vector.load %arg4[%c0_7, %c0_8] : memref<32x1xf32, #tpu.memory_space<vmem>>, vector<32x1xf32>
    %cst_9 = arith.constant 0.001953125 : f32
    %24 = vector.broadcast %cst_9 : f32 to vector<32x1xf32>
    %25 = arith.mulf %19, %24 : vector<32x1xf32>
    %cst_10 = arith.constant 0.001953125 : f32
    %26 = vector.broadcast %cst_10 : f32 to vector<32x1xf32>
    %27 = arith.mulf %21, %26 : vector<32x1xf32>
    %28 = arith.mulf %25, %25 : vector<32x1xf32>
    %29 = arith.subf %27, %28 : vector<32x1xf32>
    %cst_11 = arith.constant 0.000000e+00 : f32
    %30 = vector.broadcast %cst_11 : f32 to vector<32x1xf32>
    %31 = arith.maximumf %29, %30 : vector<32x1xf32>
    %cst_12 = arith.constant 9.99999974E-6 : f32
    %32 = vector.broadcast %cst_12 : f32 to vector<32x1xf32>
    %33 = arith.addf %31, %32 : vector<32x1xf32>
    %34 = math.rsqrt %33 : vector<32x1xf32>
    %35 = arith.mulf %22, %34 : vector<32x1xf32>
    %36 = arith.mulf %25, %35 : vector<32x1xf32>
    %37 = arith.subf %23, %36 : vector<32x1xf32>
    %38 = tpu.concatenate %35, %35, %35, %35 in 0 : vector<32x1xf32>, vector<32x1xf32>, vector<32x1xf32>, vector<32x1xf32> -> vector<128x1xf32>
    %39 = tpu.concatenate %37, %37, %37, %37 in 0 : vector<32x1xf32>, vector<32x1xf32>, vector<32x1xf32>, vector<32x1xf32> -> vector<128x1xf32>
    %40 = vector.broadcast %38 : vector<128x1xf32> to vector<128x128xf32>
    %41 = arith.mulf %2, %40 : vector<128x128xf32>
    %42 = vector.broadcast %39 : vector<128x1xf32> to vector<128x128xf32>
    %43 = arith.addf %41, %42 : vector<128x128xf32>
    %cst_13 = arith.constant 0.000000e+00 : f32
    %44 = vector.broadcast %cst_13 : f32 to vector<128x128xf32>
    %45 = arith.maximumf %43, %44 : vector<128x128xf32>
    %46 = arith.truncf %45 : vector<128x128xf32> to vector<128x128xbf16>
    %c0_14 = arith.constant 0 : index
    %c0_15 = arith.constant 0 : index
    %47 = vector.load %arg5[%c0_14, %c0_15] : memref<128x128xbf16, #tpu.memory_space<vmem>>, vector<128x128xbf16>
    tpu.vector_store %arg5[%c0_14, %c0_15], %46 {strides = array<i32>} : memref<128x128xbf16, #tpu.memory_space<vmem>>, vector<128x128xbf16>,
    return
  }
  func.func @transform_0(%arg0: i32) -> (i32, i32) {
    %c0_i32 = arith.constant 0 : i32
    %c0_i32_0 = arith.constant 0 : i32
    %c0_i32_1 = arith.constant 0 : i32
    return %c0_i32, %c0_i32_0 : i32, i32
  }
  func.func @transform_1(%arg0: i32) -> (i32, i32) {
    %c0_i32 = arith.constant 0 : i32
    %c0_i32_0 = arith.constant 0 : i32
    %c0_i32_1 = arith.constant 0 : i32
    return %c0_i32, %c0_i32_0 : i32, i32
  }
  func.func @transform_2(%arg0: i32) -> (i32, i32) {
    %c0_i32 = arith.constant 0 : i32
    %c0_i32_0 = arith.constant 0 : i32
    %c0_i32_1 = arith.constant 0 : i32
    return %c0_i32, %c0_i32_0 : i32, i32
  }
  func.func @transform_3(%arg0: i32) -> (i32, i32) {
    %c0_i32 = arith.constant 0 : i32
    %c0_i32_0 = arith.constant 0 : i32
    %c0_i32_1 = arith.constant 0 : i32
    return %c0_i32, %c0_i32_0 : i32, i32
  }
  func.func @transform_4(%arg0: i32) -> (i32, i32) {
    %c0_i32 = arith.constant 0 : i32
    %c0_i32_0 = arith.constant 0 : i32
    %c0_i32_1 = arith.constant 0 : i32
    return %c0_i32, %c0_i32_0 : i32, i32
  }
}

module attributes {stable_mosaic.version = 11 : i64} {
  func.func @_convt_tanh_kernel(%arg0: i32, %arg1: memref<288x256xbf16, #tpu.memory_space<vmem>>, %arg2: memref<12x288xbf16, #tpu.memory_space<vmem>>, %arg3: memref<12x256xf32, #tpu.memory_space<vmem>>) attributes {dimension_semantics = [#tpu.dimension_semantics<parallel>], iteration_bounds = array<i64: 2>, scalar_prefetch = 0 : i64, scratch_operands = 0 : i64, tpu.core_type = #tpu.core_type<tc>, window_params = [{transform_indices = @transform_0, window_bounds = array<i64: 288, 256>}, {pipeline_mode = #tpu.pipeline_mode<synchronous>, transform_indices = @transform_1, window_bounds = array<i64: 12, 288>}, {transform_indices = @transform_2, window_bounds = array<i64: 12, 256>}]} {
    %c0 = arith.constant 0 : index
    %c0_0 = arith.constant 0 : index
    %0 = vector.load %arg2[%c0, %c0_0] : memref<12x288xbf16, #tpu.memory_space<vmem>>, vector<12x288xbf16>
    %c0_1 = arith.constant 0 : index
    %c0_2 = arith.constant 0 : index
    %1 = vector.load %arg1[%c0_1, %c0_2] : memref<288x256xbf16, #tpu.memory_space<vmem>>, vector<288x256xbf16>
    %cst = arith.constant dense<0.000000e+00> : vector<12x256xf32>
    %2 = tpu.matmul %0, %1, %cst {dimension_numbers = #tpu.dot_dimension_numbers<[1], [0], [0], [1], [0, 0, 1, 1], [], []>} : vector<12x288xbf16>, vector<288x256xbf16>, vector<12x256xf32> -> vector<12x256xf32>
    %3 = math.tanh %2 : vector<12x256xf32>
    %c0_3 = arith.constant 0 : index
    %c0_4 = arith.constant 0 : index
    %4 = vector.load %arg3[%c0_3, %c0_4] : memref<12x256xf32, #tpu.memory_space<vmem>>, vector<12x256xf32>
    tpu.vector_store %arg3[%c0_3, %c0_4], %3 {strides = array<i32>} : memref<12x256xf32, #tpu.memory_space<vmem>>, vector<12x256xf32>,
    return
  }
  func.func @transform_0(%arg0: i32) -> (i32, i32) {
    %c0_i32 = arith.constant 0 : i32
    %c0_i32_0 = arith.constant 0 : i32
    return %c0_i32, %arg0 : i32, i32
  }
  func.func @transform_1(%arg0: i32) -> (i32, i32) {
    %c0_i32 = arith.constant 0 : i32
    %c0_i32_0 = arith.constant 0 : i32
    %c0_i32_1 = arith.constant 0 : i32
    return %c0_i32, %c0_i32_0 : i32, i32
  }
  func.func @transform_2(%arg0: i32) -> (i32, i32) {
    %c0_i32 = arith.constant 0 : i32
    %c0_i32_0 = arith.constant 0 : i32
    return %c0_i32, %arg0 : i32, i32
  }
}

</mosaic_0001>

<bundles_post_ra>
// kernel: gskip_forward.4
= control target key start
LH: loop header
LB: loop body
LE: loop exit
PB: predicated region body
PF: predicated region fallthrough
CT: control target
= control target key end

     0   :  { %v601_v28 = vmov 0   ;;  %s863_s0 = inlined_call_operand.vmem [shape: bf16[128,128], index: 0, kind: input, shape index: {}]   ;;  %s864_s1 = inlined_call_operand.vmem [shape: bf16[64,128], index: 1, kind: input, shape index: {}]   ;;  %s865_s2 = inlined_call_operand.vmem [shape: f32[64,1], index: 2, kind: input, shape index: {}]   ;;  %s866_s3 = inlined_call_operand.vmem [shape: f32[64,1], index: 3, kind: input, shape index: {}]   ;;  %s867_s4 = inlined_call_operand.vmem [shape: bf16[64,128], index: 4, kind: output, shape index: {}]  }
   0x1   :  { %v533_v0 = vld [vmem:[%s863_s0 + $0x38] sm:$0xff]  ;;  %v532_v1 = vld [vmem:[%s863_s0 + $0x30] sm:$0xff]  ;;  %v531_v2 = vld [vmem:[%s863_s0 + $0x28] sm:$0xff]  ;;  %582 = vset.pattern.permute.xlu1 %v601_v28  ;;  %583 = vset.pattern.permute.xlu0 %v601_v28 }
   0x2   :  { %113 = vmatpush.bf16.msra.mxu0 %v533_v0  ;;  %557 = vmatpush.bf16.msra.mxu1 %v533_v0  ;;  %v530_v3 = vld [vmem:[%s863_s0 + $0x20] sm:$0xff]  ;;  %v529_v4 = vld [vmem:[%s863_s0 + $0x18] sm:$0xff]  ;;  %v528_v5 = vld [vmem:[%s863_s0 + $0x10] sm:$0xff] }
   0x3   :  { %559 = vmatpush.bf16.msra.mxu3 %v533_v0  ;;  %558 = vmatpush.bf16.msra.mxu2 %v533_v0  ;;  %v527_v6 = vld [vmem:[%s863_s0 + $0x8] sm:$0xff]  ;;  %v526_v7 = vld [vmem:[%s863_s0] sm:$0xff]  ;;  %v525_v10 = vld [vmem:[%s864_s1 + $0x18] sm:$0xff] }
   0x4   :  { %v522_v8 = vld [vmem:[%s864_s1] sm:$0xff]  ;;  %v523_v9 = vld [vmem:[%s864_s1 + $0x8] sm:$0xff]  ;;  %v524_v11 = vld [vmem:[%s864_s1 + $0x10] sm:$0xff]  ;;  %584 = vset.pattern.permute.xlu2 %v601_v28 }
   0x6   :  { %114 = vmatpush.bf16.msra.mxu0 %v532_v1  ;;  %560 = vmatpush.bf16.msra.mxu1 %v532_v1 }
   0x7   :  { %562 = vmatpush.bf16.msra.mxu3 %v532_v1  ;;  %561 = vmatpush.bf16.msra.mxu2 %v532_v1 }
   0xa   :  { %115 = vmatpush.bf16.msra.mxu0 %v531_v2  ;;  %563 = vmatpush.bf16.msra.mxu1 %v531_v2 }
   0xb   :  { %565 = vmatpush.bf16.msra.mxu3 %v531_v2  ;;  %564 = vmatpush.bf16.msra.mxu2 %v531_v2 }
   0xe   :  { %116 = vmatpush.bf16.msra.mxu0 %v530_v3  ;;  %566 = vmatpush.bf16.msra.mxu1 %v530_v3 }
   0xf   :  { %568 = vmatpush.bf16.msra.mxu3 %v530_v3  ;;  %567 = vmatpush.bf16.msra.mxu2 %v530_v3 }
  0x12   :  { %117 = vmatpush.bf16.msra.mxu0 %v529_v4  ;;  %569 = vmatpush.bf16.msra.mxu1 %v529_v4 }
  0x13   :  { %571 = vmatpush.bf16.msra.mxu3 %v529_v4  ;;  %570 = vmatpush.bf16.msra.mxu2 %v529_v4 }
  0x16   :  { %118 = vmatpush.bf16.msra.mxu0 %v528_v5  ;;  %572 = vmatpush.bf16.msra.mxu1 %v528_v5 }
  0x17   :  { %574 = vmatpush.bf16.msra.mxu3 %v528_v5  ;;  %573 = vmatpush.bf16.msra.mxu2 %v528_v5 }
  0x1a   :  { %119 = vmatpush.bf16.msra.mxu0 %v527_v6  ;;  %575 = vmatpush.bf16.msra.mxu1 %v527_v6 }
  0x1b   :  { %577 = vmatpush.bf16.msra.mxu3 %v527_v6  ;;  %576 = vmatpush.bf16.msra.mxu2 %v527_v6 }
  0x1e   :  { %120 = vmatpush.bf16.msra.mxu0 %v526_v7  ;;  %578 = vmatpush.bf16.msra.mxu1 %v526_v7 }
  0x1f   :  { %580 = vmatpush.bf16.msra.mxu3 %v526_v7  ;;  %579 = vmatpush.bf16.msra.mxu2 %v526_v7  ;;  %v182_v7 = vld [vmem:[%s865_s2] sm:$0xff] }
  0x21   :  { %121 = vmatmul.bf16.vlgmr.msra.gmra.mxu0 %v522_v8  ;;  %126 = vmatmul.bf16.vlgmr.msra.gmra.mxu1 %v523_v9 }
  0x22   :  { %136 = vmatmul.bf16.vlgmr.msra.gmra.mxu3 %v525_v10  ;;  %131 = vmatmul.bf16.vlgmr.msra.gmra.mxu2 %v524_v11 }
  0x9e   :  { %v663_v12 = vpop.f32.mrf.mxu0  ;;  %v665_v13 = vpop.f32.mrf.mxu1 }
  0x9f   :  { %146 = vadd.xlane.f32.xlu1 %v665_v13  ;;  %142 = vadd.xlane.f32.xlu0 %v663_v12  ;;  %v158_v14 = vmul.f32 %v663_v12, %v663_v12  ;;  %v160_v15 = vmul.f32 %v665_v13, %v665_v13 }
  0xa1   :  { %166 = vadd.xlane.f32.xlu2 %v158_v14 }
  0xa5   :  { %v673_v16 = vpop.f32.mrf.mxu3  ;;  %v675_v17 = vpop.f32.mrf.mxu2 }
  0xa6   :  { %v679_v18 = vpop.f32.mrf.mxu1  ;;  %v681_v19 = vpop.f32.mrf.mxu0  ;;  %v164_v20 = vmul.f32 %v673_v16, %v673_v16  ;;  %v162_v21 = vmul.f32 %v675_v17, %v675_v17 }
  0xa7   :  { %170 = vadd.xlane.f32.xlu1 %v160_v15  ;;  %154 = vadd.xlane.f32.xlu0 %v673_v16  ;;  %v161_v23 = vmul.f32 %v679_v18, %v679_v18  ;;  %v159_v26 = vmul.f32 %v681_v19, %v681_v19 }
  0xa9   :  { %150 = vadd.xlane.f32.xlu2 %v675_v17 }
  0xad   :  { %v689_v22 = vpop.f32.mrf.mxu3  ;;  %v694_v24 = vpop.f32.mrf.mxu2 }
  0xae   :  { %v163_v25 = vmul.f32 %v694_v24, %v694_v24  ;;  %v165_v27 = vmul.f32 %v689_v22, %v689_v22 }
  0xaf   :  { %148 = vadd.xlane.f32.xlu1 %v679_v18  ;;  %144 = vadd.xlane.f32.xlu0 %v681_v19 }
  0xb1   :  { %178 = vadd.xlane.f32.xlu2 %v164_v20 }
  0xb7   :  { %156 = vadd.xlane.f32.xlu1 %v689_v22  ;;  %174 = vadd.xlane.f32.xlu0 %v162_v21 }
  0xb9   :  { %172 = vadd.xlane.f32.xlu2 %v161_v23 }
  0xbf   :  { %176 = vadd.xlane.f32.xlu1 %v163_v25  ;;  %168 = vadd.xlane.f32.xlu0 %v159_v26 }
  0xc1   :  { %152 = vadd.xlane.f32.xlu2 %v694_v24 }
  0xc7   :  { %180 = vadd.xlane.f32.xlu0 %v165_v27 }
 0x112   :  { %v147_v29 = vpop.xlane.xlu1 %146  ;;  %v143_v30 = vpop.xlane.xlu0 %142 }
 0x113   :  { %v703_v31 = vmul.f32 0.03125, %v143_v30  ;;  %v705_v33 = vmul.f32 0.03125, %v147_v29  ;;  %v184_v30 = vld [vmem:[%s865_s2 + $0x10] sm:$0xff] }
 0x114   :  { %v167_v32 = vpop.xlane.xlu2 %166 }
 0x115   :  { %v214_v34 = vmul.f32 %v703_v31, %v703_v31  ;;  %v206_v35 = vmul.f32 0.03125, %v167_v32  ;;  %v216_v37 = vmul.f32 %v705_v33, %v705_v33 }
 0x117   :  { %v222_v36 = vsub.f32 %v206_v35, %v214_v34 }
 0x119   :  { %v230_v38 = vmax.f32 %v222_v36, 0.0 }
 0x11a   :  { %v171_v39 = vpop.xlane.xlu1 %170  ;;  %v155_v40 = vpop.xlane.xlu0 %154 }
 0x11b   :  { %v238_v41 = vadd.f32 1e-05, %v230_v38  ;;  %v208_v42 = vmul.f32 0.03125, %v171_v39  ;;  %v711_v47 = vmul.f32 0.03125, %v155_v40 }
 0x11c   :  { %v151_v43 = vpop.xlane.xlu2 %150 }
 0x11d   :  { %585 = vrsqrt.f32 %v238_v41  ;;  %v224_v44 = vsub.f32 %v208_v42, %v216_v37  ;;  %v220_v53 = vmul.f32 %v711_v47, %v711_v47  ;;  %v715_v56 = vmul.f32 0.03125, %v151_v43  ;;  %v190_v42 = vld [vmem:[%s866_s3] sm:$0xff] }
 0x11e   :  { %vm252_vm1 = vweird.f32 %v238_v41 }
 0x11f   :  { %v232_v45 = vmax.f32 %v224_v44, 0.0  ;;  %v218_v2 = vmul.f32 %v715_v56, %v715_v56 }
 0x121   :  { %v240_v46 = vadd.f32 1e-05, %v232_v45 }
 0x122   :  { %v149_v48 = vpop.xlane.xlu1 %148  ;;  %v145_v49 = vpop.xlane.xlu0 %144 }
 0x123   :  { %v586_v50 = vpop.eup %585  ;;  %587 = vrsqrt.f32 %v240_v46  ;;  %v717_v63 = vmul.f32 0.03125, %v149_v48  ;;  %v729_v20 = vmul.f32 0.03125, %v145_v49  ;;  %vm272_vm3 = vweird.f32 %v240_v46 }
 0x124   :  { %v247_v51 = vmul.f32 %v586_v50, %v238_v41  ;;  %v179_v52 = vpop.xlane.xlu2 %178  ;;  %vm253_vm0 = vweird.f32 %v586_v50 }
 0x125   :  { %v212_v54 = vmul.f32 0.03125, %v179_v52  ;;  %vm254_vm2 = vmor %vm252_vm1, %vm253_vm0  ;;  %v217_v11 = vmul.f32 %v717_v63, %v717_v63  ;;  %v215_v35 = vmul.f32 %v729_v20, %v729_v20 }
 0x126   :  { %v248_v55 = vmul.f32 %v586_v50, %v247_v51 }
 0x127   :  { %v228_v57 = vsub.f32 %v212_v54, %v220_v53 }
 0x128   :  { %v249_v58 = vmul.f32 0.5, %v248_v55 }
 0x129   :  { %v588_v59 = vpop.eup %587  ;;  %v236_v60 = vmax.f32 %v228_v57, 0.0 }
 0x12a   :  { %v250_v61 = vsub.f32 1.5, %v249_v58  ;;  %v267_v62 = vmul.f32 %v588_v59, %v240_v46  ;;  %v157_v0 = vpop.xlane.xlu1 %156  ;;  %v175_v1 = vpop.xlane.xlu0 %174  ;;  %vm273_vm4 = vweird.f32 %v588_v59  ;;  %v192_v46 = vld [vmem:[%s866_s3 + $0x10] sm:$0xff] }
 0x12b   :  { %v721_v3 = vadd.f32 1e-05, %v236_v60  ;;  %v210_v4 = vmul.f32 0.03125, %v175_v1  ;;  %vm274_vm5 = vmor %vm272_vm3, %vm273_vm4  ;;  %v752_v49 = vmul.f32 0.03125, %v157_v0 }
 0x12c   :  { %v268_v5 = vmul.f32 %v588_v59, %v267_v62  ;;  %v173_v6 = vpop.xlane.xlu2 %172  ;;  %v251_v8 = vmul.f32 %v586_v50, %v250_v61 }
 0x12d   :  { %589 = vrsqrt.f32 %v721_v3  ;;  %v226_v9 = vsub.f32 %v210_v4, %v218_v2  ;;  %v209_v14 = vmul.f32 0.03125, %v173_v6  ;;  %v221_v62 = vmul.f32 %v752_v49, %v752_v49 }
 0x12e   :  { %v269_v10 = vmul.f32 0.5, %v268_v5  ;;  %v255_v15 = vsel %vm254_vm2, %v586_v50, %v251_v8  ;;  %vm312_vm11 = vweird.f32 %v721_v3 }
 0x12f   :  { %v234_v21 = vmax.f32 %v226_v9, 0.0  ;;  %v326_v23 = vmul.f32 %v255_v15, %v182_v7  ;;  %v225_v26 = vsub.f32 %v209_v14, %v217_v11 }
 0x130   :  { %v270_v25 = vsub.f32 1.5, %v269_v10 }
 0x131   :  { %v731_v27 = vadd.f32 1e-05, %v234_v21  ;;  %352 = vperm.xlu1 %582, %v326_v23   ;;  %v233_v28 = vmax.f32 %v225_v26, 0.0  ;;  %v334_v38 = vmul.f32 %v326_v23, %v703_v31  ;;  %v186_v26 = vld [vmem:[%s865_s2 + $0x20] sm:$0xff] }
 0x132   :  { %v169_v29 = vpop.xlane.xlu0 %168  ;;  %v271_v32 = vmul.f32 %v588_v59, %v270_v25  ;;  %v177_v36 = vpop.xlane.xlu1 %176 }
 0x133   :  { %v736_v34 = vpop.eup %589  ;;  %591 = vrsqrt.f32 %v731_v27  ;;  %v207_v37 = vmul.f32 0.03125, %v169_v29  ;;  %v743_v39 = vadd.f32 1e-05, %v233_v28  ;;  %v211_v31 = vmul.f32 0.03125, %v177_v36 }
 0x134   :  { %v153_v40 = vpop.xlane.xlu2 %152  ;;  %v275_v41 = vsel %vm274_vm5, %v588_v59, %v271_v32  ;;  %v307_v43 = vmul.f32 %v736_v34, %v721_v3  ;;  %v342_v52 = vsub.f32 %v190_v42, %v334_v38  ;;  %vm292_vm7 = vweird.f32 %v731_v27 }
 0x135   :  { %v223_v44 = vsub.f32 %v207_v37, %v215_v35  ;;  %v750_v45 = vmul.f32 0.03125, %v153_v40  ;;  %v328_v48 = vmul.f32 %v275_v41, %v184_v30  ;;  %593 = vrsqrt.f32 %v743_v39  ;;  %v194_v41 = vld [vmem:[%s866_s3 + $0x20] sm:$0xff] }
 0x136   :  { %v308_v55 = vmul.f32 %v736_v34, %v307_v43  ;;  %vm313_vm9 = vweird.f32 %v736_v34  ;;  %vm282_vm12 = vweird.f32 %v743_v39 }
 0x137   :  { %v231_v50 = vmax.f32 %v223_v44, 0.0  ;;  %v219_v51 = vmul.f32 %v750_v45, %v750_v45  ;;  %362 = vperm.xlu0 %583, %v328_v48   ;;  %v336_v53 = vmul.f32 %v328_v48, %v705_v33  ;;  %vm789_vm13 = vmor %vm312_vm11, %vm313_vm9 }
 0x138   :  { %v309_v4 = vmul.f32 0.5, %v308_v55 }
 0x139   :  { %v592_v54 = vpop.eup %591  ;;  %v762_v57 = vadd.f32 1e-05, %v231_v50  ;;  %v227_v58 = vsub.f32 %v211_v31, %v219_v51  ;;  %400 = vperm.xlu1 %582, %v342_v52   ;;  %v344_v59 = vsub.f32 %v192_v46, %v336_v53  ;;  %v188_v50 = vld [vmem:[%s865_s2 + $0x30] sm:$0xff]  ;;  %v183_v51 = vld [vmem:[%s865_s2 + $0x8] sm:$0xff]  ;;  %v185_v53 = vld [vmem:[%s865_s2 + $0x18] sm:$0xff] }
 0x13a   :  { %v287_v60 = vmul.f32 %v592_v54, %v731_v27  ;;  %v181_v61 = vpop.xlane.xlu0 %180  ;;  %vm293_vm6 = vweird.f32 %v592_v54  ;;  %v310_v15 = vsub.f32 1.5, %v309_v4 }
 0x13b   :  { %595 = vrsqrt.f32 %v762_v57  ;;  %v235_v0 = vmax.f32 %v227_v58, 0.0  ;;  %v213_v1 = vmul.f32 0.03125, %v181_v61  ;;  %410 = vperm.xlu2 %584, %v344_v59   ;;  %v594_v33 = vpop.eup %593  ;;  %vm294_vm8 = vmor %vm292_vm7, %vm293_vm6  ;;  %vm262_vm0 = vweird.f32 %v762_v57 }
 0x13c   :  { %v288_v2 = vmul.f32 %v592_v54, %v287_v60  ;;  %v277_v5 = vmul.f32 %v594_v33, %v743_v39  ;;  %v311_v37 = vmul.f32 %v736_v34, %v310_v15  ;;  %vm283_vm10 = vweird.f32 %v594_v33 }
 0x13d   :  { %v769_v6 = vadd.f32 1e-05, %v235_v0  ;;  %v229_v7 = vsub.f32 %v213_v1, %v221_v62  ;;  %vm793_vm15 = vmor %vm282_vm12, %vm283_vm10  ;;  %v191_v62 = vld [vmem:[%s866_s3 + $0x8] sm:$0xff] }
 0x13e   :  { %v289_v8 = vmul.f32 0.5, %v288_v2  ;;  %v278_v9 = vmul.f32 %v594_v33, %v277_v5 }
 0x13f   :  { %597 = vrsqrt.f32 %v769_v6  ;;  %v237_v10 = vmax.f32 %v229_v7, 0.0  ;;  %v193_v7 = vld [vmem:[%s866_s3 + $0x18] sm:$0xff]  ;;  %vm302_vm6 = vweird.f32 %v769_v6 }
 0x140   :  { %v290_v11 = vsub.f32 1.5, %v289_v8  ;;  %v279_v21 = vmul.f32 0.5, %v278_v9  ;;  %v189_v8 = vld [vmem:[%s865_s2 + $0x38] sm:$0xff] }
 0x141   :  { %v596_v14 = vpop.eup %595  ;;  %v245_v23 = vadd.f32 1e-05, %v237_v10 }
 0x142   :  { %v257_v25 = vmul.f32 %v596_v14, %v762_v57  ;;  %v291_v28 = vmul.f32 %v592_v54, %v290_v11  ;;  %v280_v29 = vsub.f32 1.5, %v279_v21  ;;  %vm263_vm14 = vweird.f32 %v596_v14 }
 0x143   :  { %599 = vrsqrt.f32 %v245_v23  ;;  %vm264_vm1 = vmor %vm262_vm0, %vm263_vm14  ;;  %vm322_vm3 = vweird.f32 %v245_v23 }
 0x144   :  { %v258_v30 = vmul.f32 %v596_v14, %v257_v25  ;;  %v295_v32 = vsel %vm294_vm8, %v592_v54, %v291_v28  ;;  %v281_v27 = vmul.f32 %v594_v33, %v280_v29 }
 0x145   :  { %v777_v35 = vpop.eup %597  ;;  %v330_v36 = vmul.f32 %v295_v32, %v186_v26  ;;  %v196_v26 = vld [vmem:[%s866_s3 + $0x30] sm:$0xff] }
 0x146   :  { %v259_v38 = vmul.f32 0.5, %v258_v30  ;;  %v297_v40 = vmul.f32 %v777_v35, %v769_v6  ;;  %v285_v54 = vsel %vm793_vm15, %v594_v33, %v281_v27  ;;  %vm303_vm5 = vweird.f32 %v777_v35 }
 0x147   :  { %372 = vperm.xlu1 %582, %v330_v36   ;;  %v338_v42 = vmul.f32 %v330_v36, %v715_v56  ;;  %v315_v56 = vsel %vm789_vm13, %v736_v34, %v311_v37  ;;  %v329_v59 = vmul.f32 %v285_v54, %v185_v53  ;;  %vm304_vm7 = vmor %vm302_vm6, %vm303_vm5 }
 0x148   :  { %v260_v43 = vsub.f32 1.5, %v259_v38  ;;  %v298_v3 = vmul.f32 %v777_v35, %v297_v40  ;;  %v332_v57 = vmul.f32 %v315_v56, %v188_v50 }
 0x149   :  { %v600_v48 = vpop.eup %599  ;;  %v346_v46 = vsub.f32 %v194_v41, %v338_v42  ;;  %v337_v2 = vmul.f32 %v329_v59, %v717_v63  ;;  %v197_v63 = vld [vmem:[%s866_s3 + $0x38] sm:$0xff] }
 0x14a   :  { %v317_v39 = vmul.f32 %v600_v48, %v245_v23  ;;  %v261_v52 = vmul.f32 %v596_v14, %v260_v43  ;;  %v299_v60 = vmul.f32 0.5, %v298_v3  ;;  %vm323_vm2 = vweird.f32 %v600_v48  ;;  %v187_v23 = vld [vmem:[%s865_s2 + $0x28] sm:$0xff] }
 0x14b   :  { %420 = vperm.xlu0 %583, %v346_v46   ;;  %vm324_vm4 = vmor %vm322_vm3, %vm323_vm2  ;;  %v340_v21 = vmul.f32 %v332_v57, %v711_v47  ;;  %v195_v47 = vld [vmem:[%s866_s3 + $0x28] sm:$0xff] }
 0x14c   :  { %v318_v34 = vmul.f32 %v600_v48, %v317_v39  ;;  %v265_v55 = vsel %vm264_vm1, %v596_v14, %v261_v52  ;;  %v300_v4 = vsub.f32 1.5, %v299_v60 }
 0x14d   :  { %v327_v58 = vmul.f32 %v265_v55, %v183_v51  ;;  %v348_v29 = vsub.f32 %v196_v26, %v340_v21 }
 0x14e   :  { %v319_v61 = vmul.f32 0.5, %v318_v34  ;;  %v301_v11 = vmul.f32 %v777_v35, %v300_v4 }
 0x14f   :  { %382 = vperm.xlu1 %582, %v332_v57   ;;  %357 = vperm.xlu2 %584, %v327_v58   ;;  %v335_v0 = vmul.f32 %v327_v58, %v729_v20  ;;  %v345_v20 = vsub.f32 %v193_v7, %v337_v2 }
 0x150   :  { %v320_v1 = vsub.f32 1.5, %v319_v61  ;;  %v305_v25 = vsel %vm304_vm7, %v777_v35, %v301_v11 }
 0x151   :  { %v343_v33 = vsub.f32 %v191_v62, %v335_v0  ;;  %v331_v28 = vmul.f32 %v305_v25, %v187_v23 }
 0x152   :  { %v321_v5 = vmul.f32 %v600_v48, %v320_v1 }
 0x153   :  { %405 = vperm.xlu0 %583, %v343_v33  }
 0x154   :  { %v325_v9 = vsel %vm324_vm4, %v600_v48, %v321_v5 }
 0x155   :  { %v333_v10 = vmul.f32 %v325_v9, %v189_v8 }
 0x157   :  { %415 = vperm.xlu1 %582, %v345_v20   ;;  %367 = vperm.xlu2 %584, %v329_v59   ;;  %v341_v14 = vmul.f32 %v333_v10, %v752_v49  ;;  %v339_v49 = vmul.f32 %v331_v28, %v750_v45 }
 0x159   :  { %v349_v15 = vsub.f32 %v197_v63, %v341_v14  ;;  %v347_v6 = vsub.f32 %v195_v47, %v339_v49 }
 0x15b   :  { %435 = vperm.xlu0 %583, %v349_v15  }
 0x15f   :  { %430 = vperm.xlu1 %582, %v348_v29   ;;  %377 = vperm.xlu2 %584, %v331_v28  }
 0x167   :  { %387 = vperm.xlu2 %584, %v333_v10  }
 0x16f   :  { %425 = vperm.xlu2 %584, %v347_v6  }
 0x195   :  { %v411_v30 = vpop.permute.xlu2 %410 }
 0x1a3   :  { %v353_v32 = vpop.permute.xlu1 %352 }
 0x1a4   :  { %v390_v42 = vmul.f32 %v353_v32, %v663_v12 }
 0x1a9   :  { %v358_v35 = vpop.permute.xlu2 %357  ;;  %v363_v27 = vpop.permute.xlu0 %362 }
 0x1aa   :  { %v392_v45 = vmul.f32 %v363_v27, %v665_v13  ;;  %v391_v31 = vmul.f32 %v358_v35, %v681_v19 }
 0x1ab   :  { %v401_v36 = vpop.permute.xlu1 %400 }
 0x1ac   :  { %v438_v48 = vadd.f32 %v401_v36, %v390_v42  ;;  %v440_v39 = vadd.f32 %v411_v30, %v392_v45 }
 0x1ae   :  { %v446_v50 = vmax.f32 %v438_v48, 0.0  ;;  %v448_v58 = vmax.f32 %v440_v39, 0.0 }
 0x1b1   :  { %v368_v37 = vpop.permute.xlu2 %367 }
 0x1b2   :  { %v393_v51 = vmul.f32 %v368_v37, %v679_v18 }
 0x1b9   :  { %v373_v38 = vpop.permute.xlu1 %372  ;;  %v378_v40 = vpop.permute.xlu2 %377 }
 0x1ba   :  { %v394_v56 = vmul.f32 %v373_v38, %v675_v17  ;;  %v395_v52 = vmul.f32 %v378_v40, %v694_v24 }
 0x1bd   :  { %v421_v41 = vpop.permute.xlu0 %420 }
 0x1be   :  { %v442_v53 = vadd.f32 %v421_v41, %v394_v56 }
 0x1c0   :  { %v450_v59 = vmax.f32 %v442_v53, 0.0 }
 0x1c1   :  { %v383_v43 = vpop.permute.xlu1 %382  ;;  %v388_v44 = vpop.permute.xlu2 %387 }
 0x1c2   :  { %v397_v18 = vmul.f32 %v388_v44, %v689_v22  ;;  %v396_v62 = vmul.f32 %v383_v43, %v673_v16 }
 0x1c5   :  { %v406_v46 = vpop.permute.xlu0 %405 }
 0x1c6   :  { %v439_v3 = vadd.f32 %v406_v46, %v391_v31 }
 0x1c8   :  { %v447_v54 = vmax.f32 %v439_v3, 0.0 }
 0x1c9   :  { %v416_v12 = vpop.permute.xlu1 %415  ;;  %v426_v34 = vpop.permute.xlu2 %425 }
 0x1ca   :  { %v537_v55 = vpack.c.bf16 %v447_v54, %v446_v50  ;;  %v441_v57 = vadd.f32 %v416_v12, %v393_v51  ;;  %v443_v13 = vadd.f32 %v426_v34, %v395_v52 }
 0x1cc   :  { %538 = vst [vmem:[%s867_s4] sm:$0xff] %v537_v55   ;;  %v449_v17 = vmax.f32 %v441_v57, 0.0  ;;  %v451_v19 = vmax.f32 %v443_v13, 0.0 }
 0x1cd   :  { %v436_v60 = vpop.permute.xlu0 %435 }
 0x1ce   :  { %v542_v61 = vpack.c.bf16 %v449_v17, %v448_v58  ;;  %v547_v24 = vpack.c.bf16 %v451_v19, %v450_v59  ;;  %v445_v0 = vadd.f32 %v436_v60, %v397_v18 }
 0x1d0   :  { %554 = vst [vmem:[%s867_s4 + $0x8] sm:$0xff] %v542_v61   ;;  %v453_v2 = vmax.f32 %v445_v0, 0.0 }
 0x1d1   :  { %555 = vst [vmem:[%s867_s4 + $0x10] sm:$0xff] %v547_v24   ;;  %v431_v1 = vpop.permute.xlu1 %430 }
 0x1d2   :  { %v444_v33 = vadd.f32 %v431_v1, %v396_v62 }
 0x1d4   :  { %v452_v4 = vmax.f32 %v444_v33, 0.0 }
 0x1d6   :  { %v552_v5 = vpack.c.bf16 %v453_v2, %v452_v4 }
 0x1d8   :  { %556 = vst [vmem:[%s867_s4 + $0x18] sm:$0xff] %v552_v5  }

// kernel: gskip_forward.5
= control target key start
LH: loop header
LB: loop body
LE: loop exit
PB: predicated region body
PF: predicated region fallthrough
CT: control target
= control target key end

     0   :  { %vm802_vm0 = vcmask 523264   ;;  %s3847_s0 = inlined_call_operand.vmem [shape: bf16[576,128], index: 0, kind: input, shape index: {}]   ;;  %s3848_s1 = inlined_call_operand.vmem [shape: bf16[256,576], index: 1, kind: input, shape index: {}]   ;;  %s3849_s2 = inlined_call_operand.vmem [shape: f32[64,1], index: 2, kind: input, shape index: {}]   ;;  %s3850_s3 = inlined_call_operand.vmem [shape: f32[64,1], index: 3, kind: input, shape index: {}]   ;;  %s3851_s4 = inlined_call_operand.vmem [shape: bf16[256,128], index: 4, kind: output, shape index: {}]  }
   0x1   :  { %v2483_v0 = vld [vmem:[%s3847_s0 + $0x38] sm:$0xff]  ;;  %v2482_v1 = vld [vmem:[%s3847_s0 + $0x30] sm:$0xff]  ;;  %v2481_v2 = vld [vmem:[%s3847_s0 + $0x28] sm:$0xff] }
   0x2   :  { %2607 = vmatpush.bf16.msra.mxu1 %v2483_v0  ;;  %2608 = vmatpush.bf16.msra.mxu2 %v2483_v0  ;;  %v2480_v3 = vld [vmem:[%s3847_s0 + $0x20] sm:$0xff]  ;;  %v2479_v4 = vld [vmem:[%s3847_s0 + $0x18] sm:$0xff]  ;;  %v2478_v5 = vld [vmem:[%s3847_s0 + $0x10] sm:$0xff] }
   0x3   :  { %2609 = vmatpush.bf16.msra.mxu3 %v2483_v0  ;;  %851 = vmatpush.bf16.msra.mxu0 %v2483_v0  ;;  %v2477_v6 = vld [vmem:[%s3847_s0 + $0x8] sm:$0xff]  ;;  %v2476_v7 = vld [vmem:[%s3847_s0] sm:$0xff]  ;;  %v2418_v9 = vld [vmem:[%s3848_s1 + $0xb0] sm:$0xf0] }
   0x4   :  { %v1998_v8 = vld [vmem:[%s3848_s1 + $0xa0] sm:$0xf]  ;;  %v2438_v11 = vld [vmem:[%s3848_s1 + $0x150] sm:$0xf0]  ;;  %v2499_v16 = vld [vmem:[%s3847_s0 + $0xb8] sm:$0xff] }
   0x5   :  { %v2078_v10 = vld [vmem:[%s3848_s1 + $0x140] sm:$0xf]  ;;  %v2458_v13 = vld [vmem:[%s3848_s1 + $0x1f0] sm:$0xf0]  ;;  %v2507_v17 = vld [vmem:[%s3847_s0 + $0xf8] sm:$0xff]  ;;  %v1999_v18 = vor.u32 %v2418_v9, %v1998_v8 }
   0x6   :  { %2610 = vmatpush.bf16.msra.mxu1 %v2482_v1  ;;  %2611 = vmatpush.bf16.msra.mxu2 %v2482_v1  ;;  %v2158_v12 = vld [vmem:[%s3848_s1 + $0x1e0] sm:$0xf]  ;;  %v2398_v15 = vld [vmem:[%s3848_s1 + $0x10] sm:$0xf0]  ;;  %v2079_v19 = vor.u32 %v2438_v11, %v2078_v10  ;;  %v2491_v22 = vld [vmem:[%s3847_s0 + $0x78] sm:$0xff] }
   0x7   :  { %2612 = vmatpush.bf16.msra.mxu3 %v2482_v1  ;;  %852 = vmatpush.bf16.msra.mxu0 %v2482_v1  ;;  %v1918_v14 = vld [vmem:[%s3848_s1] sm:$0xf]  ;;  %v2159_v20 = vor.u32 %v2458_v13, %v2158_v12  ;;  %v2511_v23 = vld [vmem:[%s3847_s0 + $0x118] sm:$0xff]  ;;  %v2498_v24 = vld [vmem:[%s3847_s0 + $0xb0] sm:$0xff] }
   0x8   :  { %v1919_v21 = vor.u32 %v2398_v15, %v1918_v14  ;;  %v2506_v25 = vld [vmem:[%s3847_s0 + $0xf0] sm:$0xff]  ;;  %v2497_v28 = vld [vmem:[%s3847_s0 + $0xa8] sm:$0xff]  ;;  %v2496_v32 = vld [vmem:[%s3847_s0 + $0xa0] sm:$0xff] }
   0x9   :  { %v2490_v26 = vld [vmem:[%s3847_s0 + $0x70] sm:$0xff]  ;;  %v2505_v29 = vld [vmem:[%s3847_s0 + $0xe8] sm:$0xff]  ;;  %v2504_v33 = vld [vmem:[%s3847_s0 + $0xe0] sm:$0xff] }
   0xa   :  { %2613 = vmatpush.bf16.msra.mxu1 %v2481_v2  ;;  %2614 = vmatpush.bf16.msra.mxu2 %v2481_v2  ;;  %v2510_v27 = vld [vmem:[%s3847_s0 + $0x110] sm:$0xff]  ;;  %v2489_v30 = vld [vmem:[%s3847_s0 + $0x68] sm:$0xff]  ;;  %v2423_v35 = vld [vmem:[%s3848_s1 + $0xd8] sm:$0xf0] }
   0xb   :  { %2615 = vmatpush.bf16.msra.mxu3 %v2481_v2  ;;  %853 = vmatpush.bf16.msra.mxu0 %v2481_v2  ;;  %v2509_v31 = vld [vmem:[%s3847_s0 + $0x108] sm:$0xff]  ;;  %v2443_v37 = vld [vmem:[%s3848_s1 + $0x178] sm:$0xf0]  ;;  %v2488_v42 = vld [vmem:[%s3847_s0 + $0x60] sm:$0xff] }
   0xc   :  { %v2018_v34 = vld [vmem:[%s3848_s1 + $0xc8] sm:$0xf]  ;;  %v2463_v39 = vld [vmem:[%s3848_s1 + $0x218] sm:$0xf0]  ;;  %v2494_v50 = vld [vmem:[%s3847_s0 + $0x90] sm:$0xff] }
   0xd   :  { %v2098_v36 = vld [vmem:[%s3848_s1 + $0x168] sm:$0xf]  ;;  %v2403_v41 = vld [vmem:[%s3848_s1 + $0x38] sm:$0xf0]  ;;  %v2019_v45 = vor.u32 %v2423_v35, %v2018_v34  ;;  %v2502_v51 = vld [vmem:[%s3847_s0 + $0xd0] sm:$0xff] }
   0xe   :  { %2616 = vmatpush.bf16.msra.mxu1 %v2480_v3  ;;  %2617 = vmatpush.bf16.msra.mxu2 %v2480_v3  ;;  %v2178_v38 = vld [vmem:[%s3848_s1 + $0x208] sm:$0xf]  ;;  %v2495_v43 = vld [vmem:[%s3847_s0 + $0x98] sm:$0xff]  ;;  %v2099_v46 = vor.u32 %v2443_v37, %v2098_v36  ;;  %v2486_v52 = vld [vmem:[%s3847_s0 + $0x50] sm:$0xff] }
   0xf   :  { %2618 = vmatpush.bf16.msra.mxu3 %v2480_v3  ;;  %854 = vmatpush.bf16.msra.mxu0 %v2480_v3  ;;  %v1938_v40 = vld [vmem:[%s3848_s1 + $0x28] sm:$0xf]  ;;  %v2503_v44 = vld [vmem:[%s3847_s0 + $0xd8] sm:$0xff]  ;;  %v2179_v47 = vor.u32 %v2463_v39, %v2178_v38  ;;  %v2508_v53 = vld [vmem:[%s3847_s0 + $0x100] sm:$0xff] }
  0x10   :  { %v1939_v48 = vor.u32 %v2403_v41, %v1938_v40  ;;  %v2487_v49 = vld [vmem:[%s3847_s0 + $0x58] sm:$0xff]  ;;  %v2493_v54 = vld [vmem:[%s3847_s0 + $0x88] sm:$0xff]  ;;  %v2492_v57 = vld [vmem:[%s3847_s0 + $0x80] sm:$0xff] }
  0x11   :  { %v2501_v55 = vld [vmem:[%s3847_s0 + $0xc8] sm:$0xff]  ;;  %v2500_v58 = vld [vmem:[%s3847_s0 + $0xc0] sm:$0xff]  ;;  %v2038_v59 = vld [vmem:[%s3848_s1 + $0xf0] sm:$0xf] }
  0x12   :  { %2619 = vmatpush.bf16.msra.mxu1 %v2479_v4  ;;  %2620 = vmatpush.bf16.msra.mxu2 %v2479_v4  ;;  %v2485_v56 = vld [vmem:[%s3847_s0 + $0x48] sm:$0xff]  ;;  %v2428_v60 = vld [vmem:[%s3848_s1 + $0x100] sm:$0xf0]  ;;  %v2118_v61 = vld [vmem:[%s3848_s1 + $0x190] sm:$0xf] }
  0x13   :  { %2621 = vmatpush.bf16.msra.mxu3 %v2479_v4  ;;  %855 = vmatpush.bf16.msra.mxu0 %v2479_v4  ;;  %v2448_v62 = vld [vmem:[%s3848_s1 + $0x1a0] sm:$0xf0]  ;;  %v2198_v63 = vld [vmem:[%s3848_s1 + $0x230] sm:$0xf]  ;;  %v2039_v4 = vor.u32 %v2428_v60, %v2038_v59  ;;  %v2058_v8 = vld [vmem:[%s3848_s1 + $0x118] sm:$0xf] }
  0x14   :  { %v2468_v0 = vld [vmem:[%s3848_s1 + $0x240] sm:$0xf0]  ;;  %v1958_v1 = vld [vmem:[%s3848_s1 + $0x50] sm:$0xf]  ;;  %v2433_v9 = vld [vmem:[%s3848_s1 + $0x128] sm:$0xf0] }
  0x15   :  { %v2408_v2 = vld [vmem:[%s3848_s1 + $0x60] sm:$0xf0]  ;;  %v2138_v10 = vld [vmem:[%s3848_s1 + $0x1b8] sm:$0xf]  ;;  %v2453_v11 = vld [vmem:[%s3848_s1 + $0x1c8] sm:$0xf0] }
  0x16   :  { %2622 = vmatpush.bf16.msra.mxu1 %v2478_v5  ;;  %2623 = vmatpush.bf16.msra.mxu2 %v2478_v5  ;;  %v2484_v3 = vld [vmem:[%s3847_s0 + $0x40] sm:$0xff]  ;;  %v2218_v12 = vld [vmem:[%s3848_s1 + $0x258] sm:$0xf]  ;;  %v2473_v13 = vld [vmem:[%s3848_s1 + $0x268] sm:$0xf0] }
  0x17   :  { %2624 = vmatpush.bf16.msra.mxu3 %v2478_v5  ;;  %856 = vmatpush.bf16.msra.mxu0 %v2478_v5  ;;  %v2119_v5 = vor.u32 %v2448_v62, %v2118_v61  ;;  %v1978_v14 = vld [vmem:[%s3848_s1 + $0x78] sm:$0xf]  ;;  %v2413_v15 = vld [vmem:[%s3848_s1 + $0x88] sm:$0xf0]  ;;  %v1946_v34 = vld [vmem:[%s3848_s1 + $0x30] sm:$0xf] }
  0x18   :  { %v2404_v35 = vld [vmem:[%s3848_s1 + $0x40] sm:$0xf0]  ;;  %v2402_v36 = vld [vmem:[%s3848_s1 + $0x34] sm:$0xf]  ;;  %v1948_v37 = vld [vmem:[%s3848_s1 + $0x44] sm:$0xf0] }
  0x19   :  { %v1954_v38 = vld [vmem:[%s3848_s1 + $0x38] sm:$0xf]  ;;  %v2405_v39 = vld [vmem:[%s3848_s1 + $0x48] sm:$0xf0]  ;;  %v1947_v41 = vor.u32 %v2404_v35, %v1946_v34  ;;  %v2414_v59 = vld [vmem:[%s3848_s1 + $0x90] sm:$0xf0] }
  0x1a   :  { %2625 = vmatpush.bf16.msra.mxu1 %v2477_v6  ;;  %2626 = vmatpush.bf16.msra.mxu2 %v2477_v6  ;;  %v2412_v60 = vld [vmem:[%s3848_s1 + $0x84] sm:$0xf]  ;;  %v1988_v61 = vld [vmem:[%s3848_s1 + $0x94] sm:$0xf0]  ;;  %v1994_v62 = vld [vmem:[%s3848_s1 + $0x88] sm:$0xf] }
  0x1b   :  { %2627 = vmatpush.bf16.msra.mxu3 %v2477_v6  ;;  %857 = vmatpush.bf16.msra.mxu0 %v2477_v6  ;;  %v2199_v6 = vor.u32 %v2468_v0, %v2198_v63  ;;  %v2415_v63 = vld [vmem:[%s3848_s1 + $0x98] sm:$0xf0] }
  0x1e   :  { %2628 = vmatpush.bf16.msra.mxu1 %v2476_v7  ;;  %2629 = vmatpush.bf16.msra.mxu2 %v2476_v7 }
  0x1f   :  { %2630 = vmatpush.bf16.msra.mxu3 %v2476_v7  ;;  %858 = vmatpush.bf16.msra.mxu0 %v2476_v7  ;;  %v1959_v7 = vor.u32 %v2408_v2, %v1958_v1  ;;  %v1991_v2 = vor.u32 %v2412_v60, %v1988_v61 }
  0x21   :  { %879 = vmatmul.bf16.vlgmr.msra.gmra.mxu1 %v1999_v18  ;;  %899 = vmatmul.bf16.vlgmr.msra.gmra.mxu2 %v2079_v19  ;;  %v2219_v18 = vor.u32 %v2473_v13, %v2218_v12  ;;  %v1979_v19 = vor.u32 %v2413_v15, %v1978_v14 }
  0x22   :  { %1029 = vmatpush.bf16.msrb.mxu2 %v2499_v16  ;;  %919 = vmatmul.bf16.vlgmr.msra.gmra.mxu3 %v2159_v20  ;;  %v2059_v16 = vor.u32 %v2433_v9, %v2058_v8  ;;  %v2396_v20 = vld [vmem:[%s3848_s1 + $0x4] sm:$0xf]  ;;  %v2417_v8 = vld [vmem:[%s3848_s1 + $0xac] sm:$0xf]  ;;  %v2008_v9 = vld [vmem:[%s3848_s1 + $0xbc] sm:$0xf0] }
  0x23   :  { %1118 = vmatpush.bf16.msrb.mxu3 %v2507_v17  ;;  %859 = vmatmul.bf16.vlgmr.msra.gmra.mxu0 %v1919_v21  ;;  %v2139_v17 = vor.u32 %v2453_v11, %v2138_v10  ;;  %v1920_v21 = vld [vmem:[%s3848_s1 + $0x14] sm:$0xf0]  ;;  %v2014_v10 = vld [vmem:[%s3848_s1 + $0xb0] sm:$0xf]  ;;  %v2420_v11 = vld [vmem:[%s3848_s1 + $0xc0] sm:$0xf0]  ;;  %v2011_v15 = vor.u32 %v2417_v8, %v2008_v9 }
  0x24   :  { %940 = vmatpush.bf16.msrb.mxu1 %v2491_v22  ;;  %1211 = vmatpush.bf16.msrb.mxu0 %v2511_v23  ;;  %v1926_v22 = vld [vmem:[%s3848_s1 + $0x8] sm:$0xf]  ;;  %v2399_v23 = vld [vmem:[%s3848_s1 + $0x18] sm:$0xf0] }
  0x26   :  { %1030 = vmatpush.bf16.msrb.mxu2 %v2498_v24  ;;  %v2397_v24 = vld [vmem:[%s3848_s1 + $0xc] sm:$0xf] }
  0x27   :  { %1119 = vmatpush.bf16.msrb.mxu3 %v2506_v25  ;;  %v1928_v25 = vld [vmem:[%s3848_s1 + $0x1c] sm:$0xf0] }
  0x28   :  { %941 = vmatpush.bf16.msrb.mxu1 %v2490_v26  ;;  %1212 = vmatpush.bf16.msrb.mxu0 %v2510_v27  ;;  %v1934_v26 = vld [vmem:[%s3848_s1 + $0x10] sm:$0xf]  ;;  %v2400_v27 = vld [vmem:[%s3848_s1 + $0x20] sm:$0xf0] }
  0x2a   :  { %1031 = vmatpush.bf16.msrb.mxu2 %v2497_v28  ;;  %v1923_v28 = vor.u32 %v2396_v20, %v1920_v21 }
  0x2b   :  { %1120 = vmatpush.bf16.msrb.mxu3 %v2505_v29  ;;  %v1927_v29 = vor.u32 %v2399_v23, %v1926_v22  ;;  %v2421_v22 = vld [vmem:[%s3848_s1 + $0xcc] sm:$0xf]  ;;  %v2020_v23 = vld [vmem:[%s3848_s1 + $0xdc] sm:$0xf0] }
  0x2c   :  { %942 = vmatpush.bf16.msrb.mxu1 %v2489_v30  ;;  %1213 = vmatpush.bf16.msrb.mxu0 %v2509_v31  ;;  %v1931_v30 = vor.u32 %v2397_v24, %v1928_v25  ;;  %v1935_v31 = vor.u32 %v2400_v27, %v1934_v26  ;;  %v2026_v24 = vld [vmem:[%s3848_s1 + $0xd0] sm:$0xf]  ;;  %v2424_v25 = vld [vmem:[%s3848_s1 + $0xe0] sm:$0xf0]  ;;  %v2422_v26 = vld [vmem:[%s3848_s1 + $0xd4] sm:$0xf] }
  0x2d   :  { %v2028_v27 = vld [vmem:[%s3848_s1 + $0xe4] sm:$0xf0] }
  0x2e   :  { %1032 = vmatpush.bf16.msrb.mxu2 %v2496_v32  ;;  %v2401_v32 = vld [vmem:[%s3848_s1 + $0x2c] sm:$0xf]  ;;  %v2031_v35 = vor.u32 %v2422_v26, %v2028_v27  ;;  %v2086_v26 = vld [vmem:[%s3848_s1 + $0x148] sm:$0xf]  ;;  %v2439_v27 = vld [vmem:[%s3848_s1 + $0x158] sm:$0xf0] }
  0x2f   :  { %1121 = vmatpush.bf16.msrb.mxu3 %v2504_v33  ;;  %v1940_v33 = vld [vmem:[%s3848_s1 + $0x3c] sm:$0xf0] }
  0x30   :  { %943 = vmatpush.bf16.msrb.mxu1 %v2488_v42  ;;  %1214 = vmatpush.bf16.msrb.mxu0 %v2508_v53  ;;  %v1943_v40 = vor.u32 %v2401_v32, %v1940_v33  ;;  %v1951_v42 = vor.u32 %v2402_v36, %v1948_v37  ;;  %v2023_v32 = vor.u32 %v2421_v22, %v2020_v23 }
  0x31   :  { %884 = vmatmul.bf16.gmra.mxu1 %v2019_v45  ;;  %904 = vmatmul.bf16.gmra.mxu2 %v2099_v46  ;;  %v1960_v45 = vld [vmem:[%s3848_s1 + $0x64] sm:$0xf0]  ;;  %v1966_v46 = vld [vmem:[%s3848_s1 + $0x58] sm:$0xf]  ;;  %v2027_v33 = vor.u32 %v2424_v25, %v2026_v24  ;;  %v2436_v24 = vld [vmem:[%s3848_s1 + $0x144] sm:$0xf] }
  0x32   :  { %1033 = vmatpush.bf16.msrb.mxu2 %v2495_v43  ;;  %924 = vmatmul.bf16.gmra.mxu3 %v2179_v47  ;;  %v1955_v43 = vor.u32 %v2405_v39, %v1954_v38  ;;  %v2409_v47 = vld [vmem:[%s3848_s1 + $0x68] sm:$0xf0]  ;;  %v2080_v25 = vld [vmem:[%s3848_s1 + $0x154] sm:$0xf0] }
  0x33   :  { %1122 = vmatpush.bf16.msrb.mxu3 %v2503_v44  ;;  %864 = vmatmul.bf16.gmra.mxu0 %v1939_v48  ;;  %v2406_v44 = vld [vmem:[%s3848_s1 + $0x54] sm:$0xf]  ;;  %v2407_v48 = vld [vmem:[%s3848_s1 + $0x5c] sm:$0xf]  ;;  %v1967_v53 = vor.u32 %v2409_v47, %v1966_v46  ;;  %v2048_v47 = vld [vmem:[%s3848_s1 + $0x10c] sm:$0xf0] }
  0x34   :  { %944 = vmatpush.bf16.msrb.mxu1 %v2487_v49  ;;  %v1968_v49 = vld [vmem:[%s3848_s1 + $0x6c] sm:$0xf0]  ;;  %v2427_v46 = vld [vmem:[%s3848_s1 + $0xfc] sm:$0xf] }
  0x36   :  { %1034 = vmatpush.bf16.msrb.mxu2 %v2494_v50  ;;  %v1974_v50 = vld [vmem:[%s3848_s1 + $0x60] sm:$0xf] }
  0x37   :  { %1123 = vmatpush.bf16.msrb.mxu3 %v2502_v51  ;;  %v2410_v51 = vld [vmem:[%s3848_s1 + $0x70] sm:$0xf0] }
  0x38   :  { %945 = vmatpush.bf16.msrb.mxu1 %v2486_v52  ;;  %v1963_v52 = vor.u32 %v2406_v44, %v1960_v45  ;;  %v2046_v44 = vld [vmem:[%s3848_s1 + $0xf8] sm:$0xf]  ;;  %v2429_v45 = vld [vmem:[%s3848_s1 + $0x108] sm:$0xf0] }
  0x3a   :  { %1035 = vmatpush.bf16.msrb.mxu2 %v2493_v54  ;;  %v1971_v54 = vor.u32 %v2407_v48, %v1968_v49  ;;  %v2054_v48 = vld [vmem:[%s3848_s1 + $0x100] sm:$0xf]  ;;  %v2430_v49 = vld [vmem:[%s3848_s1 + $0x110] sm:$0xf0] }
  0x3b   :  { %1124 = vmatpush.bf16.msrb.mxu3 %v2501_v55  ;;  %v1975_v55 = vor.u32 %v2410_v51, %v1974_v50 }
  0x3c   :  { %946 = vmatpush.bf16.msrb.mxu1 %v2485_v56  ;;  %v2411_v56 = vld [vmem:[%s3848_s1 + $0x7c] sm:$0xf] }
  0x3e   :  { %1036 = vmatpush.bf16.msrb.mxu2 %v2492_v57  ;;  %v1980_v57 = vld [vmem:[%s3848_s1 + $0x8c] sm:$0xf0] }
  0x3f   :  { %1125 = vmatpush.bf16.msrb.mxu3 %v2500_v58  ;;  %v1986_v58 = vld [vmem:[%s3848_s1 + $0x80] sm:$0xf]  ;;  %v1983_v0 = vor.u32 %v2411_v56, %v1980_v57  ;;  %v2055_v56 = vor.u32 %v2430_v49, %v2054_v48 }
  0x40   :  { %947 = vmatpush.bf16.msrb.mxu1 %v2484_v3  ;;  %v1987_v1 = vor.u32 %v2414_v59, %v1986_v58  ;;  %v1995_v3 = vor.u32 %v2415_v63, %v1994_v62  ;;  %v2431_v62 = vld [vmem:[%s3848_s1 + $0x11c] sm:$0xf]  ;;  %v2060_v63 = vld [vmem:[%s3848_s1 + $0x12c] sm:$0xf0] }
  0x41   :  { %889 = vmatmul.bf16.gmra.mxu1 %v2039_v4  ;;  %909 = vmatmul.bf16.gmra.mxu2 %v2119_v5  ;;  %v2416_v4 = vld [vmem:[%s3848_s1 + $0xa4] sm:$0xf]  ;;  %v2000_v5 = vld [vmem:[%s3848_s1 + $0xb4] sm:$0xf0]  ;;  %v2063_v8 = vor.u32 %v2431_v62, %v2060_v63 }
  0x42   :  { %929 = vmatmul.bf16.gmra.mxu3 %v2199_v6  ;;  %v2006_v6 = vld [vmem:[%s3848_s1 + $0xa8] sm:$0xf]  ;;  %v2003_v12 = vor.u32 %v2416_v4, %v2000_v5  ;;  %v2435_v5 = vld [vmem:[%s3848_s1 + $0x138] sm:$0xf0] }
  0x43   :  { %869 = vmatmul.bf16.gmra.mxu0 %v1959_v7  ;;  %v2419_v7 = vld [vmem:[%s3848_s1 + $0xb8] sm:$0xf0]  ;;  %v2074_v4 = vld [vmem:[%s3848_s1 + $0x128] sm:$0xf] }
  0x44   :  { %v2007_v13 = vor.u32 %v2419_v7, %v2006_v6 }
  0x51   :  { %894 = vmatmul.bf16.gmra.mxu1 %v2059_v16  ;;  %914 = vmatmul.bf16.gmra.mxu2 %v2139_v17  ;;  %v2015_v16 = vor.u32 %v2420_v11, %v2014_v10 }
  0x52   :  { %934 = vmatmul.bf16.gmra.mxu3 %v2219_v18 }
  0x53   :  { %874 = vmatmul.bf16.gmra.mxu0 %v1979_v19 }
  0x61   :  { %948 = vmatmul.bf16.vlgmr.msrb.gmra.mxu1 %v1923_v28  ;;  %1037 = vmatmul.bf16.vlgmr.msrb.gmra.mxu2 %v1927_v29  ;;  %v2034_v28 = vld [vmem:[%s3848_s1 + $0xd8] sm:$0xf]  ;;  %v2425_v29 = vld [vmem:[%s3848_s1 + $0xe8] sm:$0xf0] }
  0x62   :  { %1126 = vmatmul.bf16.vlgmr.msrb.gmra.mxu3 %v1931_v30  ;;  %v2035_v36 = vor.u32 %v2425_v29, %v2034_v28  ;;  %v2437_v28 = vld [vmem:[%s3848_s1 + $0x14c] sm:$0xf]  ;;  %v2088_v29 = vld [vmem:[%s3848_s1 + $0x15c] sm:$0xf0] }
  0x63   :  { %2380 = vmatmul.msk.bf16.vlgmr.msrb.gmra.mxu0 %vm802_vm0, %v1935_v31 }
  0x71   :  { %953 = vmatmul.bf16.gmra.mxu1 %v1943_v40  ;;  %1042 = vmatmul.bf16.gmra.mxu2 %v1947_v41 }
  0x72   :  { %1131 = vmatmul.bf16.gmra.mxu3 %v1951_v42  ;;  %v2426_v42 = vld [vmem:[%s3848_s1 + $0xf4] sm:$0xf] }
  0x73   :  { %2381 = vmatmul.msk.bf16.gmra.mxu0 %vm802_vm0, %v1955_v43  ;;  %v2040_v43 = vld [vmem:[%s3848_s1 + $0x104] sm:$0xf0] }
  0x81   :  { %958 = vmatmul.bf16.gmra.mxu1 %v1963_v52  ;;  %1047 = vmatmul.bf16.gmra.mxu2 %v1967_v53  ;;  %v2043_v52 = vor.u32 %v2426_v42, %v2040_v43  ;;  %v2047_v53 = vor.u32 %v2429_v45, %v2046_v44  ;;  %v2083_v42 = vor.u32 %v2436_v24, %v2080_v25 }
  0x82   :  { %1136 = vmatmul.bf16.gmra.mxu3 %v1971_v54  ;;  %v2087_v43 = vor.u32 %v2439_v27, %v2086_v26  ;;  %v2091_v45 = vor.u32 %v2437_v28, %v2088_v29 }
  0x83   :  { %2382 = vmatmul.msk.bf16.gmra.mxu0 %vm802_vm0, %v1975_v55  ;;  %v2051_v55 = vor.u32 %v2427_v46, %v2048_v47 }
  0x91   :  { %963 = vmatmul.bf16.gmra.mxu1 %v1983_v0  ;;  %1052 = vmatmul.bf16.gmra.mxu2 %v1987_v1  ;;  %v2066_v0 = vld [vmem:[%s3848_s1 + $0x120] sm:$0xf]  ;;  %v2434_v1 = vld [vmem:[%s3848_s1 + $0x130] sm:$0xf0] }
  0x92   :  { %1141 = vmatmul.bf16.gmra.mxu3 %v1991_v2  ;;  %v2432_v2 = vld [vmem:[%s3848_s1 + $0x124] sm:$0xf]  ;;  %v2067_v9 = vor.u32 %v2434_v1, %v2066_v0  ;;  %v2441_v0 = vld [vmem:[%s3848_s1 + $0x16c] sm:$0xf]  ;;  %v2100_v1 = vld [vmem:[%s3848_s1 + $0x17c] sm:$0xf0] }
  0x93   :  { %2383 = vmatmul.msk.bf16.gmra.mxu0 %vm802_vm0, %v1995_v3  ;;  %v2068_v3 = vld [vmem:[%s3848_s1 + $0x134] sm:$0xf0]  ;;  %v2103_v25 = vor.u32 %v2441_v0, %v2100_v1  ;;  %v2447_v0 = vld [vmem:[%s3848_s1 + $0x19c] sm:$0xf] }
  0x94   :  { %v2071_v11 = vor.u32 %v2432_v2, %v2068_v3  ;;  %v2444_v2 = vld [vmem:[%s3848_s1 + $0x180] sm:$0xf0]  ;;  %v2442_v3 = vld [vmem:[%s3848_s1 + $0x174] sm:$0xf] }
  0x9e   :  { %v3005_v14 = vpop.f32.mrf.mxu1 }
  0xa0   :  { %v3007_v17 = vpop.f32.mrf.mxu0 }
  0xa1   :  { %968 = vmatmul.bf16.gmra.mxu1 %v2003_v12  ;;  %1057 = vmatmul.bf16.gmra.mxu2 %v2007_v13  ;;  %v2075_v12 = vor.u32 %v2435_v5, %v2074_v4 }
  0xa2   :  { %1146 = vmatmul.bf16.gmra.mxu3 %v2011_v15 }
  0xa3   :  { %2384 = vmatmul.msk.bf16.gmra.mxu0 %vm802_vm0, %v2015_v16 }
  0xa4   :  { %v3010_v18 = vpop.f32.mrf.mxu2 }
  0xa5   :  { %v3012_v19 = vpop.f32.mrf.mxu3 }
  0xa6   :  { %v3014_v20 = vpop.f32.mrf.mxu1 }
  0xa8   :  { %v3016_v21 = vpop.f32.mrf.mxu0 }
  0xac   :  { %v3042_v30 = vpop.f32.mrf.mxu2 }
  0xad   :  { %v3044_v31 = vpop.f32.mrf.mxu3 }
  0xae   :  { %v3046_v34 = vpop.f32.mrf.mxu1 }
  0xb0   :  { %v3048_v37 = vpop.f32.mrf.mxu0 }
  0xb1   :  { %973 = vmatmul.bf16.gmra.mxu1 %v2023_v32  ;;  %1062 = vmatmul.bf16.gmra.mxu2 %v2027_v33  ;;  %v2094_v32 = vld [vmem:[%s3848_s1 + $0x150] sm:$0xf]  ;;  %v2440_v33 = vld [vmem:[%s3848_s1 + $0x160] sm:$0xf0] }
  0xb2   :  { %1151 = vmatmul.bf16.gmra.mxu3 %v2031_v35  ;;  %v2095_v46 = vor.u32 %v2440_v33, %v2094_v32 }
  0xb3   :  { %2385 = vmatmul.msk.bf16.gmra.mxu0 %vm802_vm0, %v2035_v36 }
  0xb4   :  { %v3051_v38 = vpop.f32.mrf.mxu2 }
  0xb5   :  { %v3053_v39 = vpop.f32.mrf.mxu3 }
  0xb6   :  { %v3055_v40 = vpop.f32.mrf.mxu1 }
  0xb8   :  { %v3057_v41 = vpop.f32.mrf.mxu0 }
  0xbc   :  { %v3083_v50 = vpop.f32.mrf.mxu2 }
  0xbd   :  { %v3085_v51 = vpop.f32.mrf.mxu3 }
  0xbe   :  { %v3087_v54 = vpop.f32.mrf.mxu1 }
  0xc0   :  { %v3089_v57 = vpop.f32.mrf.mxu0 }
  0xc1   :  { %978 = vmatmul.bf16.gmra.mxu1 %v2043_v52  ;;  %1067 = vmatmul.bf16.gmra.mxu2 %v2047_v53 }
  0xc2   :  { %1156 = vmatmul.bf16.gmra.mxu3 %v2051_v55 }
  0xc3   :  { %2386 = vmatmul.msk.bf16.gmra.mxu0 %vm802_vm0, %v2055_v56 }
  0xc4   :  { %v3092_v58 = vpop.f32.mrf.mxu2 }
  0xc5   :  { %v3094_v59 = vpop.f32.mrf.mxu3 }
  0xc6   :  { %v3096_v60 = vpop.f32.mrf.mxu1 }
  0xc8   :  { %v3098_v61 = vpop.f32.mrf.mxu0 }
  0xcc   :  { %v3124_v6 = vpop.f32.mrf.mxu2 }
  0xcd   :  { %v3126_v7 = vpop.f32.mrf.mxu3 }
  0xce   :  { %v3128_v10 = vpop.f32.mrf.mxu1 }
  0xd0   :  { %v3130_v13 = vpop.f32.mrf.mxu0 }
  0xd1   :  { %983 = vmatmul.bf16.gmra.mxu1 %v2063_v8  ;;  %1072 = vmatmul.bf16.gmra.mxu2 %v2067_v9  ;;  %v2108_v8 = vld [vmem:[%s3848_s1 + $0x184] sm:$0xf0]  ;;  %v2114_v9 = vld [vmem:[%s3848_s1 + $0x178] sm:$0xf] }
  0xd2   :  { %1161 = vmatmul.bf16.gmra.mxu3 %v2071_v11  ;;  %v2445_v11 = vld [vmem:[%s3848_s1 + $0x188] sm:$0xf0]  ;;  %v2111_v28 = vor.u32 %v2442_v3, %v2108_v8  ;;  %v2450_v3 = vld [vmem:[%s3848_s1 + $0x1b0] sm:$0xf0] }
  0xd3   :  { %2387 = vmatmul.msk.bf16.gmra.mxu0 %vm802_vm0, %v2075_v12  ;;  %v2115_v29 = vor.u32 %v2445_v11, %v2114_v9 }
  0xd4   :  { %v3133_v15 = vpop.f32.mrf.mxu2 }
  0xd5   :  { %v3135_v16 = vpop.f32.mrf.mxu3 }
  0xd6   :  { %v3137_v22 = vpop.f32.mrf.mxu1 }
  0xd8   :  { %v3139_v23 = vpop.f32.mrf.mxu0 }
  0xdc   :  { %v3165_v35 = vpop.f32.mrf.mxu2 }
  0xdd   :  { %v3167_v36 = vpop.f32.mrf.mxu3 }
  0xde   :  { %v949_v44 = vpop.f32.mrf.mxu1 }
  0xdf   :  { %v950_v48 = vadd.f32 %v949_v44, %v3007_v17  ;;  %v2106_v17 = vld [vmem:[%s3848_s1 + $0x170] sm:$0xf] }
  0xe0   :  { %v1216_v47 = vpop.f32.mrf.mxu0  ;;  %v2107_v26 = vor.u32 %v2444_v2, %v2106_v17  ;;  %v2128_v17 = vld [vmem:[%s3848_s1 + $0x1ac] sm:$0xf0]  ;;  %v2134_v2 = vld [vmem:[%s3848_s1 + $0x1a0] sm:$0xf] }
  0xe1   :  { %988 = vmatmul.bf16.gmra.mxu1 %v2083_v42  ;;  %1077 = vmatmul.bf16.gmra.mxu2 %v2087_v43 }
  0xe2   :  { %1166 = vmatmul.bf16.gmra.mxu3 %v2091_v45 }
  0xe3   :  { %2388 = vmatmul.msk.bf16.gmra.mxu0 %vm802_vm0, %v2095_v46 }
  0xe4   :  { %v1038_v49 = vpop.f32.mrf.mxu2 }
  0xe5   :  { %v1039_v52 = vadd.f32 %v1038_v49, %v950_v48  ;;  %v1127_v53 = vpop.f32.mrf.mxu3 }
  0xe6   :  { %v951_v55 = vpop.f32.mrf.mxu1 }
  0xe7   :  { %v1128_v56 = vadd.f32 %v1127_v53, %v1039_v52  ;;  %v952_v4 = vadd.f32 %v951_v55, %v3016_v21  ;;  %v2446_v55 = vld [vmem:[%s3848_s1 + $0x194] sm:$0xf] }
  0xe8   :  { %v1218_v62 = vpop.f32.mrf.mxu0 }
  0xe9   :  { %v3171_v63 = vadd.f32 %v1216_v47, %v1128_v56  ;;  %v2126_v56 = vld [vmem:[%s3848_s1 + $0x198] sm:$0xf] }
  0xeb   :  { %1296 = vadd.xlane.f32.xlu0 %v3171_v63  ;;  %v1360_v5 = vmul.f32 %v3171_v63, %v3171_v63 }
  0xec   :  { %v1040_v12 = vpop.f32.mrf.mxu2 }
  0xed   :  { %v1041_v24 = vadd.f32 %v1040_v12, %v952_v4  ;;  %v1129_v21 = vpop.f32.mrf.mxu3  ;;  %1392 = vadd.xlane.f32.xlu2 %v1360_v5  ;;  %v2131_v12 = vor.u32 %v2447_v0, %v2128_v17  ;;  %v2154_v0 = vld [vmem:[%s3848_s1 + $0x1c8] sm:$0xf] }
  0xee   :  { %v954_v27 = vpop.f32.mrf.mxu1 }
  0xef   :  { %v1130_v32 = vadd.f32 %v1129_v21, %v1041_v24  ;;  %v955_v43 = vadd.f32 %v954_v27, %v3048_v37  ;;  %v2120_v37 = vld [vmem:[%s3848_s1 + $0x1a4] sm:$0xf0]  ;;  %v2135_v24 = vor.u32 %v2450_v3, %v2134_v2 }
  0xf0   :  { %v1221_v33 = vpop.f32.mrf.mxu0  ;;  %v2123_v9 = vor.u32 %v2446_v55, %v2120_v37  ;;  %v2452_v55 = vld [vmem:[%s3848_s1 + $0x1c4] sm:$0xf] }
  0xf1   :  { %v3201_v42 = vadd.f32 %v1218_v62, %v1130_v32  ;;  %993 = vmatmul.bf16.gmra.mxu1 %v2103_v25  ;;  %1082 = vmatmul.bf16.gmra.mxu2 %v2107_v26  ;;  %v2449_v62 = vld [vmem:[%s3848_s1 + $0x1a8] sm:$0xf0] }
  0xf2   :  { %1171 = vmatmul.bf16.gmra.mxu3 %v2111_v28 }
  0xf3   :  { %2389 = vmatmul.msk.bf16.gmra.mxu0 %vm802_vm0, %v2115_v29  ;;  %1298 = vadd.xlane.f32.xlu0 %v3201_v42  ;;  %v1361_v53 = vmul.f32 %v3201_v42, %v3201_v42 }
  0xf4   :  { %v1043_v44 = vpop.f32.mrf.mxu2 }
  0xf5   :  { %v1044_v45 = vadd.f32 %v1043_v44, %v955_v43  ;;  %v1132_v46 = vpop.f32.mrf.mxu3 }
  0xf6   :  { %v956_v47 = vpop.f32.mrf.mxu1 }
  0xf7   :  { %v1133_v48 = vadd.f32 %v1132_v46, %v1044_v45  ;;  %v957_v1 = vadd.f32 %v956_v47, %v3057_v41  ;;  %v2127_v41 = vor.u32 %v2449_v62, %v2126_v56  ;;  %v2148_v62 = vld [vmem:[%s3848_s1 + $0x1d4] sm:$0xf0] }
  0xf8   :  { %v1223_v49 = vpop.f32.mrf.mxu0 }
  0xf9   :  { %v3206_v52 = vadd.f32 %v1221_v33, %v1133_v48  ;;  %v2451_v48 = vld [vmem:[%s3848_s1 + $0x1bc] sm:$0xf] }
  0xfb   :  { %1300 = vadd.xlane.f32.xlu1 %v3206_v52  ;;  %1394 = vadd.xlane.f32.xlu0 %v1361_v53  ;;  %v1362_v27 = vmul.f32 %v3206_v52, %v3206_v52  ;;  %v2454_v53 = vld [vmem:[%s3848_s1 + $0x1d0] sm:$0xf0] }
  0xfc   :  { %v1045_v4 = vpop.f32.mrf.mxu2 }
  0xfd   :  { %v1046_v5 = vadd.f32 %v1045_v4, %v957_v1  ;;  %v1134_v8 = vpop.f32.mrf.mxu3  ;;  %v2455_v1 = vld [vmem:[%s3848_s1 + $0x1d8] sm:$0xf0] }
  0xfe   :  { %v959_v11 = vpop.f32.mrf.mxu1 }
  0xff   :  { %v1135_v21 = vadd.f32 %v1134_v8, %v1046_v5  ;;  %v960_v28 = vadd.f32 %v959_v11, %v3089_v57  ;;  %v2140_v57 = vld [vmem:[%s3848_s1 + $0x1cc] sm:$0xf0]  ;;  %v2151_v8 = vor.u32 %v2452_v55, %v2148_v62 }
 0x100   :  { %v1226_v25 = vpop.f32.mrf.mxu0  ;;  %v2143_v3 = vor.u32 %v2451_v48, %v2140_v57  ;;  %v2457_v48 = vld [vmem:[%s3848_s1 + $0x1ec] sm:$0xf]  ;;  %v2174_v55 = vld [vmem:[%s3848_s1 + $0x1f0] sm:$0xf] }
 0x101   :  { %v3236_v26 = vadd.f32 %v1223_v49, %v1135_v21  ;;  %998 = vmatmul.bf16.gmra.mxu1 %v2123_v9  ;;  %1087 = vmatmul.bf16.gmra.mxu2 %v2127_v41  ;;  %v2146_v49 = vld [vmem:[%s3848_s1 + $0x1c0] sm:$0xf]  ;;  %v2155_v9 = vor.u32 %v2455_v1, %v2154_v0 }
 0x102   :  { %1176 = vmatmul.bf16.gmra.mxu3 %v2131_v12  ;;  %v2147_v4 = vor.u32 %v2454_v53, %v2146_v49  ;;  %v2168_v53 = vld [vmem:[%s3848_s1 + $0x1fc] sm:$0xf0] }
 0x103   :  { %2390 = vmatmul.msk.bf16.gmra.mxu0 %vm802_vm0, %v2135_v24  ;;  %1396 = vadd.xlane.f32.xlu1 %v1362_v27  ;;  %v1363_v29 = vmul.f32 %v3236_v26, %v3236_v26 }
 0x104   :  { %v1048_v32 = vpop.f32.mrf.mxu2 }
 0x105   :  { %v1049_v33 = vadd.f32 %v1048_v32, %v960_v28  ;;  %v1137_v43 = vpop.f32.mrf.mxu3  ;;  %1398 = vadd.xlane.f32.xlu2 %v1363_v29 }
 0x106   :  { %v961_v44 = vpop.f32.mrf.mxu1 }
 0x107   :  { %v1138_v45 = vadd.f32 %v1137_v43, %v1049_v33  ;;  %v962_v37 = vadd.f32 %v961_v44, %v3098_v61  ;;  %v2456_v44 = vld [vmem:[%s3848_s1 + $0x1e4] sm:$0xf] }
 0x108   :  { %v1228_v46 = vpop.f32.mrf.mxu0 }
 0x109   :  { %v3244_v47 = vadd.f32 %v1226_v25, %v1138_v45  ;;  %v2166_v45 = vld [vmem:[%s3848_s1 + $0x1e8] sm:$0xf] }
 0x10b   :  { %1302 = vadd.xlane.f32.xlu1 %v3236_v26  ;;  %v1364_v56 = vmul.f32 %v3244_v47, %v3244_v47 }
 0x10c   :  { %v1050_v17 = vpop.f32.mrf.mxu2 }
 0x10d   :  { %v1051_v2 = vadd.f32 %v1050_v17, %v962_v37  ;;  %v1139_v61 = vpop.f32.mrf.mxu3  ;;  %1400 = vadd.xlane.f32.xlu0 %v1364_v56  ;;  %1304 = vadd.xlane.f32.xlu2 %v3244_v47  ;;  %v2460_v37 = vld [vmem:[%s3848_s1 + $0x200] sm:$0xf0] }
 0x10e   :  { %v964_v5 = vpop.f32.mrf.mxu1 }
 0x10f   :  { %v1140_v41 = vadd.f32 %v1139_v61, %v1051_v2  ;;  %v965_v24 = vadd.f32 %v964_v5, %v3130_v13  ;;  %v2160_v13 = vld [vmem:[%s3848_s1 + $0x1f4] sm:$0xf0]  ;;  %v2171_v2 = vor.u32 %v2457_v48, %v2168_v53  ;;  %v2175_v61 = vor.u32 %v2460_v37, %v2174_v55 }
 0x110   :  { %v1231_v11 = vpop.f32.mrf.mxu0  ;;  %v2163_v0 = vor.u32 %v2456_v44, %v2160_v13  ;;  %v2462_v44 = vld [vmem:[%s3848_s1 + $0x214] sm:$0xf]  ;;  %v2194_v48 = vld [vmem:[%s3848_s1 + $0x218] sm:$0xf] }
 0x111   :  { %v3275_v12 = vadd.f32 %v1228_v46, %v1140_v41  ;;  %1003 = vmatmul.bf16.gmra.mxu1 %v2143_v3  ;;  %1092 = vmatmul.bf16.gmra.mxu2 %v2147_v4  ;;  %v2459_v46 = vld [vmem:[%s3848_s1 + $0x1f8] sm:$0xf0] }
 0x112   :  { %1181 = vmatmul.bf16.gmra.mxu3 %v2151_v8  ;;  %v2167_v1 = vor.u32 %v2459_v46, %v2166_v45  ;;  %v2188_v46 = vld [vmem:[%s3848_s1 + $0x224] sm:$0xf0] }
 0x113   :  { %3865 = vst [vmem:[#allocation2_spill] sm:$0xff] %v3275_v12  ;;  %2391 = vmatmul.msk.bf16.gmra.mxu0 %vm802_vm0, %v2155_v9  ;;  %v1365_v21 = vmul.f32 %v3275_v12, %v3275_v12 }
 0x114   :  { %v1053_v25 = vpop.f32.mrf.mxu2 }
 0x115   :  { %v1054_v27 = vadd.f32 %v1053_v25, %v965_v24  ;;  %v1142_v28 = vpop.f32.mrf.mxu3  ;;  %1402 = vadd.xlane.f32.xlu1 %v1365_v21  ;;  %1306 = vadd.xlane.f32.xlu2 %v3275_v12 }
 0x116   :  { %v966_v29 = vpop.f32.mrf.mxu1 }
 0x117   :  { %v1143_v32 = vadd.f32 %v1142_v28, %v1054_v27  ;;  %v967_v57 = vadd.f32 %v966_v29, %v3139_v23  ;;  %v2461_v29 = vld [vmem:[%s3848_s1 + $0x20c] sm:$0xf] }
 0x118   :  { %v1233_v33 = vpop.f32.mrf.mxu0 }
 0x119   :  { %v3282_v43 = vadd.f32 %v1231_v11, %v1143_v32  ;;  %v2186_v32 = vld [vmem:[%s3848_s1 + $0x210] sm:$0xf] }
 0x11b   :  { %3866 = vst [vmem:[#allocation3_spill] sm:$0xff] %v3282_v43  ;;  %1308 = vadd.xlane.f32.xlu0 %v3282_v43  ;;  %v1366_v49 = vmul.f32 %v3282_v43, %v3282_v43 }
 0x11c   :  { %v1055_v56 = vpop.f32.mrf.mxu2 }
 0x11d   :  { %v1056_v62 = vadd.f32 %v1055_v56, %v967_v57  ;;  %v1144_v23 = vpop.f32.mrf.mxu3  ;;  %1404 = vadd.xlane.f32.xlu2 %v1366_v49  ;;  %v2465_v57 = vld [vmem:[%s3848_s1 + $0x228] sm:$0xf0] }
 0x11e   :  { %v969_v17 = vpop.f32.mrf.mxu1 }
 0x11f   :  { %v1145_v3 = vadd.f32 %v1144_v23, %v1056_v62  ;;  %v970_v8 = vadd.f32 %v969_v17, %v3005_v14  ;;  %v2180_v14 = vld [vmem:[%s3848_s1 + $0x21c] sm:$0xf0]  ;;  %v2191_v62 = vor.u32 %v2462_v44, %v2188_v46  ;;  %v2195_v23 = vor.u32 %v2465_v57, %v2194_v48 }
 0x120   :  { %v1236_v4 = vpop.f32.mrf.mxu0  ;;  %v2183_v55 = vor.u32 %v2461_v29, %v2180_v14  ;;  %v2467_v29 = vld [vmem:[%s3848_s1 + $0x23c] sm:$0xf]  ;;  %v2214_v44 = vld [vmem:[%s3848_s1 + $0x240] sm:$0xf] }
 0x121   :  { %v3312_v5 = vadd.f32 %v1233_v33, %v1145_v3  ;;  %1008 = vmatmul.bf16.gmra.mxu1 %v2163_v0  ;;  %1097 = vmatmul.bf16.gmra.mxu2 %v2167_v1  ;;  %v2464_v33 = vld [vmem:[%s3848_s1 + $0x220] sm:$0xf0] }
 0x122   :  { %1186 = vmatmul.bf16.gmra.mxu3 %v2171_v2  ;;  %v2187_v37 = vor.u32 %v2464_v33, %v2186_v32  ;;  %v2208_v33 = vld [vmem:[%s3848_s1 + $0x24c] sm:$0xf0] }
 0x123   :  { %3867 = vst [vmem:[#allocation4_spill] sm:$0xff] %v3312_v5  ;;  %2392 = vmatmul.msk.bf16.gmra.mxu0 %vm802_vm0, %v2175_v61  ;;  %1310 = vadd.xlane.f32.xlu1 %v3312_v5  ;;  %v1367_v9 = vmul.f32 %v3312_v5, %v3312_v5 }
 0x124   :  { %v1058_v41 = vpop.f32.mrf.mxu2 }
 0x125   :  { %v1059_v11 = vadd.f32 %v1058_v41, %v970_v8  ;;  %v1147_v24 = vpop.f32.mrf.mxu3  ;;  %1406 = vadd.xlane.f32.xlu0 %v1367_v9 }
 0x126   :  { %v971_v21 = vpop.f32.mrf.mxu1 }
 0x127   :  { %v1148_v25 = vadd.f32 %v1147_v24, %v1059_v11  ;;  %v972_v13 = vadd.f32 %v971_v21, %v3014_v20  ;;  %v2466_v21 = vld [vmem:[%s3848_s1 + $0x234] sm:$0xf] }
 0x128   :  { %v1238_v27 = vpop.f32.mrf.mxu0 }
 0x129   :  { %v3319_v28 = vadd.f32 %v1236_v4, %v1148_v25  ;;  %v2206_v25 = vld [vmem:[%s3848_s1 + $0x238] sm:$0xf] }
 0x12b   :  { %1312 = vadd.xlane.f32.xlu2 %v3319_v28  ;;  %v1368_v45 = vmul.f32 %v3319_v28, %v3319_v28 }
 0x12c   :  { %v1060_v49 = vpop.f32.mrf.mxu2 }
 0x12d   :  { %v1061_v53 = vadd.f32 %v1060_v49, %v972_v13  ;;  %v1149_v20 = vpop.f32.mrf.mxu3  ;;  %1408 = vadd.xlane.f32.xlu1 %v1368_v45  ;;  %v2470_v13 = vld [vmem:[%s3848_s1 + $0x250] sm:$0xf0] }
 0x12e   :  { %v974_v56 = vpop.f32.mrf.mxu1 }
 0x12f   :  { %v1150_v0 = vadd.f32 %v1149_v20, %v1061_v53  ;;  %v975_v2 = vadd.f32 %v974_v56, %v3046_v34  ;;  %v2200_v34 = vld [vmem:[%s3848_s1 + $0x244] sm:$0xf0]  ;;  %v2211_v53 = vor.u32 %v2467_v29, %v2208_v33  ;;  %v2215_v20 = vor.u32 %v2470_v13, %v2214_v44 }
 0x130   :  { %v1241_v1 = vpop.f32.mrf.mxu0  ;;  %v2203_v48 = vor.u32 %v2466_v21, %v2200_v34  ;;  %v2472_v21 = vld [vmem:[%s3848_s1 + $0x264] sm:$0xf]  ;;  %v2234_v29 = vld [vmem:[%s3848_s1 + $0x268] sm:$0xf] }
 0x131   :  { %v3349_v17 = vadd.f32 %v1238_v27, %v1150_v0  ;;  %1013 = vmatmul.bf16.gmra.mxu1 %v2183_v55  ;;  %1102 = vmatmul.bf16.gmra.mxu2 %v2187_v37  ;;  %v2469_v27 = vld [vmem:[%s3848_s1 + $0x248] sm:$0xf0] }
 0x132   :  { %1191 = vmatmul.bf16.gmra.mxu3 %v2191_v62  ;;  %v2207_v57 = vor.u32 %v2469_v27, %v2206_v25  ;;  %v2228_v27 = vld [vmem:[%s3848_s1 + $0x274] sm:$0xf0] }
 0x133   :  { %2393 = vmatmul.msk.bf16.gmra.mxu0 %vm802_vm0, %v2195_v23  ;;  %1314 = vadd.xlane.f32.xlu0 %v3349_v17  ;;  %v1369_v61 = vmul.f32 %v3349_v17, %v3349_v17 }
 0x134   :  { %v1063_v3 = vpop.f32.mrf.mxu2 }
 0x135   :  { %v1064_v4 = vadd.f32 %v1063_v3, %v975_v2  ;;  %v1152_v8 = vpop.f32.mrf.mxu3  ;;  %1410 = vadd.xlane.f32.xlu2 %v1369_v61 }
 0x136   :  { %v976_v9 = vpop.f32.mrf.mxu1 }
 0x137   :  { %v1153_v41 = vadd.f32 %v1152_v8, %v1064_v4  ;;  %v977_v14 = vadd.f32 %v976_v9, %v3055_v40  ;;  %v2471_v9 = vld [vmem:[%s3848_s1 + $0x25c] sm:$0xf] }
 0x138   :  { %v1243_v11 = vpop.f32.mrf.mxu0 }
 0x139   :  { %v3356_v24 = vadd.f32 %v1241_v1, %v1153_v41  ;;  %v2226_v41 = vld [vmem:[%s3848_s1 + $0x260] sm:$0xf] }
 0x13b   :  { %1316 = vadd.xlane.f32.xlu1 %v3356_v24  ;;  %v1370_v32 = vmul.f32 %v3356_v24, %v3356_v24 }
 0x13c   :  { %v1065_v45 = vpop.f32.mrf.mxu2 }
 0x13d   :  { %v1066_v46 = vadd.f32 %v1065_v45, %v977_v14  ;;  %v1154_v40 = vpop.f32.mrf.mxu3  ;;  %1412 = vadd.xlane.f32.xlu0 %v1370_v32  ;;  %v2475_v14 = vld [vmem:[%s3848_s1 + $0x278] sm:$0xf0] }
 0x13e   :  { %v979_v49 = vpop.f32.mrf.mxu1 }
 0x13f   :  { %v1155_v55 = vadd.f32 %v1154_v40, %v1066_v46  ;;  %v980_v62 = vadd.f32 %v979_v49, %v3087_v54  ;;  %v2220_v54 = vld [vmem:[%s3848_s1 + $0x26c] sm:$0xf0]  ;;  %v2231_v46 = vor.u32 %v2472_v21, %v2228_v27  ;;  %v2235_v40 = vor.u32 %v2475_v14, %v2234_v29 }
 0x140   :  { %v1246_v37 = vpop.f32.mrf.mxu0  ;;  %v2223_v44 = vor.u32 %v2471_v9, %v2220_v54 }
 0x141   :  { %v3386_v56 = vadd.f32 %v1243_v11, %v1155_v55  ;;  %1018 = vmatmul.bf16.gmra.mxu1 %v2203_v48  ;;  %1107 = vmatmul.bf16.gmra.mxu2 %v2207_v57  ;;  %v2474_v11 = vld [vmem:[%s3848_s1 + $0x270] sm:$0xf0] }
 0x142   :  { %1196 = vmatmul.bf16.gmra.mxu3 %v2211_v53  ;;  %v2227_v13 = vor.u32 %v2474_v11, %v2226_v41 }
 0x143   :  { %2394 = vmatmul.msk.bf16.gmra.mxu0 %vm802_vm0, %v2215_v20  ;;  %1318 = vadd.xlane.f32.xlu2 %v3386_v56  ;;  %v1371_v23 = vmul.f32 %v3386_v56, %v3386_v56 }
 0x144   :  { %v1068_v0 = vpop.f32.mrf.mxu2 }
 0x145   :  { %v1069_v1 = vadd.f32 %v1068_v0, %v980_v62  ;;  %v1157_v2 = vpop.f32.mrf.mxu3  ;;  %1414 = vadd.xlane.f32.xlu1 %v1371_v23 }
 0x146   :  { %v981_v61 = vpop.f32.mrf.mxu1 }
 0x147   :  { %v1158_v3 = vadd.f32 %v1157_v2, %v1069_v1  ;;  %v982_v34 = vadd.f32 %v981_v61, %v3096_v60 }
 0x148   :  { %v1248_v4 = vpop.f32.mrf.mxu0 }
 0x149   :  { %v3393_v8 = vadd.f32 %v1246_v37, %v1158_v3 }
 0x14b   :  { %1320 = vadd.xlane.f32.xlu0 %v3393_v8  ;;  %v1372_v25 = vmul.f32 %v3393_v8, %v3393_v8 }
 0x14c   :  { %v1070_v32 = vpop.f32.mrf.mxu2 }
 0x14d   :  { %v1071_v33 = vadd.f32 %v1070_v32, %v982_v34  ;;  %v1159_v60 = vpop.f32.mrf.mxu3  ;;  %1416 = vadd.xlane.f32.xlu2 %v1372_v25 }
 0x14e   :  { %v984_v45 = vpop.f32.mrf.mxu1 }
 0x14f   :  { %v1160_v48 = vadd.f32 %v1159_v60, %v1071_v33  ;;  %v985_v53 = vadd.f32 %v984_v45, %v3128_v10 }
 0x150   :  { %v1251_v57 = vpop.f32.mrf.mxu0 }
 0x151   :  { %v3423_v49 = vadd.f32 %v1248_v4, %v1160_v48  ;;  %1023 = vmatmul.bf16.gmra.mxu1 %v2223_v44  ;;  %1112 = vmatmul.bf16.gmra.mxu2 %v2227_v13 }
 0x152   :  { %1201 = vmatmul.bf16.gmra.mxu3 %v2231_v46 }
 0x153   :  { %3868 = vst [vmem:[#allocation5_spill] sm:$0xff] %v3423_v49  ;;  %2395 = vmatmul.msk.bf16.gmra.mxu0 %vm802_vm0, %v2235_v40  ;;  %1322 = vadd.xlane.f32.xlu1 %v3423_v49  ;;  %v1373_v20 = vmul.f32 %v3423_v49, %v3423_v49 }
 0x154   :  { %v1073_v55 = vpop.f32.mrf.mxu2 }
 0x155   :  { %v1074_v37 = vadd.f32 %v1073_v55, %v985_v53  ;;  %v1162_v62 = vpop.f32.mrf.mxu3  ;;  %1418 = vadd.xlane.f32.xlu0 %v1373_v20 }
 0x156   :  { %v986_v23 = vpop.f32.mrf.mxu1 }
 0x157   :  { %v1163_v0 = vadd.f32 %v1162_v62, %v1074_v37  ;;  %v987_v61 = vadd.f32 %v986_v23, %v3137_v22 }
 0x158   :  { %v1253_v1 = vpop.f32.mrf.mxu0 }
 0x159   :  { %v3430_v2 = vadd.f32 %v1251_v57, %v1163_v0 }
 0x15b   :  { %3869 = vst [vmem:[#allocation6_spill] sm:$0xff] %v3430_v2  ;;  %1324 = vadd.xlane.f32.xlu2 %v3430_v2  ;;  %v1374_v10 = vmul.f32 %v3430_v2, %v3430_v2 }
 0x15c   :  { %v1075_v3 = vpop.f32.mrf.mxu2 }
 0x15d   :  { %v1076_v4 = vadd.f32 %v1075_v3, %v987_v61  ;;  %v1164_v9 = vpop.f32.mrf.mxu3  ;;  %1420 = vadd.xlane.f32.xlu1 %v1374_v10 }
 0x15e   :  { %v989_v54 = vpop.f32.mrf.mxu1  ;;  %v3450_v20 = vpop.xlane.xlu0 %1296 }
 0x15f   :  { %v1165_v41 = vadd.f32 %v1164_v9, %v1076_v4  ;;  %v990_v34 = vadd.f32 %v989_v54, %v3010_v18 }
 0x160   :  { %v1256_v11 = vpop.f32.mrf.mxu0  ;;  %v3448_v53 = vpop.xlane.xlu2 %1392 }
 0x161   :  { %v3436_v21 = vadd.f32 %v1253_v1, %v1165_v41 }
 0x163   :  { %3870 = vst [vmem:[#allocation7_spill] sm:$0xff] %v3436_v21  ;;  %1326 = vadd.xlane.f32.xlu0 %v3436_v21  ;;  %v1375_v22 = vmul.f32 %v3436_v21, %v3436_v21 }
 0x164   :  { %v1078_v25 = vpop.f32.mrf.mxu2 }
 0x165   :  { %v1079_v27 = vadd.f32 %v1078_v25, %v990_v34  ;;  %v1167_v29 = vpop.f32.mrf.mxu3  ;;  %1422 = vadd.xlane.f32.xlu2 %v1375_v22 }
 0x166   :  { %v991_v14 = vpop.f32.mrf.mxu1  ;;  %v3464_v54 = vpop.xlane.xlu0 %1298 }
 0x167   :  { %v1168_v32 = vadd.f32 %v1167_v29, %v1079_v27  ;;  %v992_v44 = vadd.f32 %v991_v14, %v3042_v30 }
 0x168   :  { %v1258_v33 = vpop.f32.mrf.mxu0 }
 0x169   :  { %v3442_v60 = vadd.f32 %v1256_v11, %v1168_v32 }
 0x16b   :  { %1328 = vadd.xlane.f32.xlu1 %v3442_v60  ;;  %v1376_v18 = vmul.f32 %v3442_v60, %v3442_v60 }
 0x16c   :  { %v1080_v13 = vpop.f32.mrf.mxu2 }
 0x16d   :  { %v1081_v45 = vadd.f32 %v1080_v13, %v992_v44  ;;  %v1169_v46 = vpop.f32.mrf.mxu3  ;;  %1424 = vadd.xlane.f32.xlu0 %v1376_v18 }
 0x16e   :  { %v994_v40 = vpop.f32.mrf.mxu1  ;;  %v3458_v62 = vpop.xlane.xlu1 %1300 }
 0x16f   :  { %v1170_v48 = vadd.f32 %v1169_v46, %v1081_v45  ;;  %v995_v30 = vadd.f32 %v994_v40, %v3051_v38  ;;  %v3480_v13 = vpop.xlane.xlu0 %1394 }
 0x170   :  { %v1261_v57 = vpop.f32.mrf.mxu0 }
 0x171   :  { %v3452_v55 = vadd.f32 %v1258_v33, %v1170_v48 }
 0x173   :  { %1330 = vadd.xlane.f32.xlu2 %v3452_v55  ;;  %v1377_v37 = vmul.f32 %v3452_v55, %v3452_v55 }
 0x174   :  { %v1083_v23 = vpop.f32.mrf.mxu2 }
 0x175   :  { %v1084_v0 = vadd.f32 %v1083_v23, %v995_v30  ;;  %v1172_v1 = vpop.f32.mrf.mxu3  ;;  %1426 = vadd.xlane.f32.xlu1 %v1377_v37 }
 0x176   :  { %v996_v61 = vpop.f32.mrf.mxu1  ;;  %v3470_v25 = vpop.xlane.xlu1 %1396 }
 0x177   :  { %v1173_v10 = vadd.f32 %v1172_v1, %v1084_v0  ;;  %v997_v38 = vadd.f32 %v996_v61, %v3083_v50 }
 0x178   :  { %v1263_v3 = vpop.f32.mrf.mxu0  ;;  %v3460_v4 = vpop.xlane.xlu2 %1398 }
 0x179   :  { %v3462_v9 = vadd.f32 %v1261_v57, %v1173_v10 }
 0x17b   :  { %1332 = vadd.xlane.f32.xlu0 %v3462_v9  ;;  %v1378_v41 = vmul.f32 %v3462_v9, %v3462_v9 }
 0x17c   :  { %v1085_v11 = vpop.f32.mrf.mxu2 }
 0x17d   :  { %v1086_v34 = vadd.f32 %v1085_v11, %v997_v38  ;;  %v1174_v22 = vpop.f32.mrf.mxu3  ;;  %1428 = vadd.xlane.f32.xlu2 %v1378_v41 }
 0x17e   :  { %v999_v27 = vpop.f32.mrf.mxu1  ;;  %v3482_v30 = vpop.xlane.xlu1 %1302 }
 0x17f   :  { %v1175_v29 = vadd.f32 %v1174_v22, %v1086_v34  ;;  %v1000_v50 = vadd.f32 %v999_v27, %v3092_v58 }
 0x180   :  { %v1266_v14 = vpop.f32.mrf.mxu0  ;;  %v3474_v33 = vpop.xlane.xlu2 %1304 }
 0x181   :  { %v3472_v32 = vadd.f32 %v1263_v3, %v1175_v29  ;;  %v3492_v61 = vpop.xlane.xlu0 %1400 }
 0x183   :  { %1334 = vadd.xlane.f32.xlu1 %v3472_v32  ;;  %v1379_v44 = vmul.f32 %v3472_v32, %v3472_v32 }
 0x184   :  { %v1088_v18 = vpop.f32.mrf.mxu2 }
 0x185   :  { %v1089_v45 = vadd.f32 %v1088_v18, %v1000_v50  ;;  %v1177_v46 = vpop.f32.mrf.mxu3  ;;  %1430 = vadd.xlane.f32.xlu0 %v1379_v44 }
 0x186   :  { %v1001_v40 = vpop.f32.mrf.mxu1 }
 0x187   :  { %v1178_v48 = vadd.f32 %v1177_v46, %v1089_v45  ;;  %v1002_v58 = vadd.f32 %v1001_v40, %v3124_v6 }
 0x188   :  { %v1268_v57 = vpop.f32.mrf.mxu0  ;;  %v3490_v0 = vpop.xlane.xlu2 %1306 }
 0x189   :  { %v3484_v37 = vadd.f32 %v1266_v14, %v1178_v48  ;;  %v3494_v34 = vpop.xlane.xlu1 %1402 }
 0x18b   :  { %1336 = vadd.xlane.f32.xlu2 %v3484_v37  ;;  %v1380_v23 = vmul.f32 %v3484_v37, %v3484_v37 }
 0x18c   :  { %v1090_v1 = vpop.f32.mrf.mxu2 }
 0x18d   :  { %v1091_v10 = vadd.f32 %v1090_v1, %v1002_v58  ;;  %v1179_v3 = vpop.f32.mrf.mxu3  ;;  %1432 = vadd.xlane.f32.xlu1 %v1380_v23 }
 0x18e   :  { %v1004_v38 = vpop.f32.mrf.mxu1  ;;  %v3502_v14 = vpop.xlane.xlu0 %1308 }
 0x18f   :  { %v1180_v41 = vadd.f32 %v1179_v3, %v1091_v10  ;;  %v1005_v6 = vadd.f32 %v1004_v38, %v3133_v15 }
 0x190   :  { %v1271_v11 = vpop.f32.mrf.mxu0  ;;  %v3504_v18 = vpop.xlane.xlu2 %1404 }
 0x191   :  { %v3496_v22 = vadd.f32 %v1268_v57, %v1180_v41 }
 0x193   :  { %3871 = vst [vmem:[#allocation8_spill] sm:$0xff] %v3496_v22  ;;  %1338 = vadd.xlane.f32.xlu0 %v3496_v22  ;;  %v1381_v27 = vmul.f32 %v3496_v22, %v3496_v22 }
 0x194   :  { %v1093_v29 = vpop.f32.mrf.mxu2 }
 0x195   :  { %v1094_v50 = vadd.f32 %v1093_v29, %v1005_v6  ;;  %v1182_v44 = vpop.f32.mrf.mxu3  ;;  %1434 = vadd.xlane.f32.xlu2 %v1381_v27 }
 0x196   :  { %v1006_v45 = vpop.f32.mrf.mxu1  ;;  %v3506_v48 = vpop.xlane.xlu1 %1310 }
 0x197   :  { %v1183_v46 = vadd.f32 %v1182_v44, %v1094_v50  ;;  %v1007_v15 = vadd.f32 %v1006_v45, %v3165_v35 }
 0x198   :  { %v1273_v40 = vpop.f32.mrf.mxu0  ;;  %v3514_v1 = vpop.xlane.xlu0 %1406 }
 0x199   :  { %v3508_v57 = vadd.f32 %v1271_v11, %v1183_v46 }
 0x19b   :  { %3872 = vst [vmem:[#allocation9_spill] sm:$0xff] %v3508_v57  ;;  %1340 = vadd.xlane.f32.xlu1 %v3508_v57  ;;  %v1382_v58 = vmul.f32 %v3508_v57, %v3508_v57 }
 0x19c   :  { %v1095_v23 = vpop.f32.mrf.mxu2 }
 0x19d   :  { %v1096_v10 = vadd.f32 %v1095_v23, %v1007_v15  ;;  %v1184_v3 = vpop.f32.mrf.mxu3  ;;  %1436 = vadd.xlane.f32.xlu0 %v1382_v58 }
 0x19e   :  { %v1009_v38 = vpop.f32.mrf.mxu1  ;;  %v1313_v41 = vpop.xlane.xlu2 %1312 }
 0x19f   :  { %v1185_v6 = vadd.f32 %v1184_v3, %v1096_v10  ;;  %v3517_v27 = vadd.f32 %v1313_v41, %v3450_v20  ;;  %v1010_v44 = vadd.f32 %v1009_v38, %v3012_v19 }
 0x1a0   :  { %v1276_v11 = vpop.f32.mrf.mxu0  ;;  %v1409_v29 = vpop.xlane.xlu1 %1408 }
 0x1a1   :  { %v3519_v35 = vadd.f32 %v1273_v40, %v1185_v6  ;;  %v3522_v50 = vadd.f32 %v1409_v29, %v3448_v53 }
 0x1a3   :  { %3873 = vst [vmem:[#allocation10_spill] sm:$0xff] %v3519_v35  ;;  %1342 = vadd.xlane.f32.xlu2 %v3519_v35  ;;  %v1383_v45 = vmul.f32 %v3519_v35, %v3519_v35 }
 0x1a4   :  { %v1098_v46 = vpop.f32.mrf.mxu2 }
 0x1a5   :  { %v1099_v15 = vadd.f32 %v1098_v46, %v1010_v44  ;;  %v1187_v58 = vpop.f32.mrf.mxu3  ;;  %1438 = vadd.xlane.f32.xlu1 %v1383_v45 }
 0x1a6   :  { %v1011_v20 = vpop.f32.mrf.mxu1  ;;  %v1315_v23 = vpop.xlane.xlu0 %1314 }
 0x1a7   :  { %v1188_v10 = vadd.f32 %v1187_v58, %v1099_v15  ;;  %v3529_v40 = vadd.f32 %v1315_v23, %v3464_v54  ;;  %v1012_v38 = vadd.f32 %v1011_v20, %v3044_v31 }
 0x1a8   :  { %v1278_v3 = vpop.f32.mrf.mxu0  ;;  %v1411_v53 = vpop.xlane.xlu2 %1410 }
 0x1a9   :  { %v3531_v41 = vadd.f32 %v1276_v11, %v1188_v10  ;;  %v3534_v19 = vadd.f32 %v1411_v53, %v3480_v13 }
 0x1ab   :  { %1344 = vadd.xlane.f32.xlu0 %v3531_v41  ;;  %v1384_v6 = vmul.f32 %v3531_v41, %v3531_v41 }
 0x1ac   :  { %v1100_v29 = vpop.f32.mrf.mxu2 }
 0x1ad   :  { %v1101_v44 = vadd.f32 %v1100_v29, %v1012_v38  ;;  %v1189_v45 = vpop.f32.mrf.mxu3  ;;  %1440 = vadd.xlane.f32.xlu2 %v1384_v6 }
 0x1ae   :  { %v1014_v54 = vpop.f32.mrf.mxu1  ;;  %v1317_v46 = vpop.xlane.xlu1 %1316 }
 0x1af   :  { %v1190_v15 = vadd.f32 %v1189_v45, %v1101_v44  ;;  %v3541_v11 = vadd.f32 %v1317_v46, %v3458_v62  ;;  %v1015_v20 = vadd.f32 %v1014_v54, %v3053_v39 }
 0x1b0   :  { %v1281_v58 = vpop.f32.mrf.mxu0  ;;  %v1413_v13 = vpop.xlane.xlu0 %1412 }
 0x1b1   :  { %v3543_v23 = vadd.f32 %v1278_v3, %v1190_v15  ;;  %v3546_v31 = vadd.f32 %v1413_v13, %v3470_v25 }
 0x1b3   :  { %1346 = vadd.xlane.f32.xlu1 %v3543_v23  ;;  %v1385_v10 = vmul.f32 %v3543_v23, %v3543_v23 }
 0x1b4   :  { %v1103_v53 = vpop.f32.mrf.mxu2 }
 0x1b5   :  { %v1104_v38 = vadd.f32 %v1103_v53, %v1015_v20  ;;  %v1192_v6 = vpop.f32.mrf.mxu3  ;;  %1442 = vadd.xlane.f32.xlu0 %v1385_v10 }
 0x1b6   :  { %v1016_v62 = vpop.f32.mrf.mxu1  ;;  %v1319_v29 = vpop.xlane.xlu2 %1318 }
 0x1b7   :  { %v1193_v44 = vadd.f32 %v1192_v6, %v1104_v38  ;;  %v3553_v3 = vadd.f32 %v1319_v29, %v3482_v30  ;;  %v1017_v54 = vadd.f32 %v1016_v62, %v3085_v51 }
 0x1b8   :  { %v1283_v45 = vpop.f32.mrf.mxu0  ;;  %v1415_v25 = vpop.xlane.xlu1 %1414 }
 0x1b9   :  { %v3555_v46 = vadd.f32 %v1281_v58, %v1193_v44  ;;  %v3558_v39 = vadd.f32 %v1415_v25, %v3460_v4 }
 0x1bb   :  { %1348 = vadd.xlane.f32.xlu2 %v3555_v46  ;;  %v1386_v15 = vmul.f32 %v3555_v46, %v3555_v46 }
 0x1bc   :  { %v1105_v13 = vpop.f32.mrf.mxu2 }
 0x1bd   :  { %v1106_v20 = vadd.f32 %v1105_v13, %v1017_v54  ;;  %v1194_v10 = vpop.f32.mrf.mxu3  ;;  %1444 = vadd.xlane.f32.xlu1 %v1386_v15 }
 0x1be   :  { %v1019_v30 = vpop.f32.mrf.mxu1  ;;  %v1321_v53 = vpop.xlane.xlu0 %1320 }
 0x1bf   :  { %v1195_v38 = vadd.f32 %v1194_v10, %v1106_v20  ;;  %v3565_v58 = vadd.f32 %v1321_v53, %v3474_v33  ;;  %v1020_v29 = vadd.f32 %v1019_v30, %v3094_v59 }
 0x1c0   :  { %v1417_v6 = vpop.xlane.xlu2 %1416  ;;  %v1286_v62 = vpop.f32.mrf.mxu0 }
 0x1c1   :  { %v3567_v4 = vadd.f32 %v1283_v45, %v1195_v38  ;;  %v3570_v51 = vadd.f32 %v1417_v6, %v3492_v61 }
 0x1c3   :  { %1350 = vadd.xlane.f32.xlu0 %v3567_v4  ;;  %v1387_v44 = vmul.f32 %v3567_v4, %v3567_v4 }
 0x1c4   :  { %v1108_v25 = vpop.f32.mrf.mxu2 }
 0x1c5   :  { %v1109_v54 = vadd.f32 %v1108_v25, %v1020_v29  ;;  %v1197_v15 = vpop.f32.mrf.mxu3  ;;  %1446 = vadd.xlane.f32.xlu2 %v1387_v44 }
 0x1c6   :  { %v1021_v33 = vpop.f32.mrf.mxu1  ;;  %v1323_v13 = vpop.xlane.xlu1 %1322 }
 0x1c7   :  { %v1198_v20 = vadd.f32 %v1197_v15, %v1109_v54  ;;  %v3577_v45 = vadd.f32 %v1323_v13, %v3490_v0  ;;  %v1022_v30 = vadd.f32 %v1021_v33, %v3126_v7 }
 0x1c8   :  { %v1419_v61 = vpop.xlane.xlu0 %1418  ;;  %v1288_v38 = vpop.f32.mrf.mxu0 }
 0x1c9   :  { %v3579_v10 = vadd.f32 %v1286_v62, %v1198_v20  ;;  %v3582_v59 = vadd.f32 %v1419_v61, %v3494_v34 }
 0x1cb   :  { %3874 = vst [vmem:[#allocation11_spill] sm:$0xff] %v3579_v10  ;;  %1352 = vadd.xlane.f32.xlu1 %v3579_v10  ;;  %v1388_v53 = vmul.f32 %v3579_v10, %v3579_v10 }
 0x1cc   :  { %v1110_v6 = vpop.f32.mrf.mxu2 }
 0x1cd   :  { %v1111_v29 = vadd.f32 %v1110_v6, %v1022_v30  ;;  %v1199_v44 = vpop.f32.mrf.mxu3  ;;  %1448 = vadd.xlane.f32.xlu0 %v1388_v53 }
 0x1ce   :  { %v1024_v0 = vpop.f32.mrf.mxu1  ;;  %v1325_v25 = vpop.xlane.xlu2 %1324 }
 0x1cf   :  { %v1200_v54 = vadd.f32 %v1199_v44, %v1111_v29  ;;  %v3589_v62 = vadd.f32 %v1325_v25, %v3502_v14  ;;  %v1025_v33 = vadd.f32 %v1024_v0, %v3135_v16 }
 0x1d0   :  { %v1421_v34 = vpop.xlane.xlu1 %1420  ;;  %v1291_v53 = vpop.f32.mrf.mxu0 }
 0x1d1   :  { %v3591_v15 = vadd.f32 %v1288_v38, %v1200_v54  ;;  %v3594_v7 = vadd.f32 %v1421_v34, %v3504_v18 }
 0x1d3   :  { %3875 = vst [vmem:[#allocation12_spill] sm:$0xff] %v3591_v15  ;;  %1354 = vadd.xlane.f32.xlu2 %v3591_v15  ;;  %v1389_v13 = vmul.f32 %v3591_v15, %v3591_v15 }
 0x1d4   :  { %v1113_v20 = vpop.f32.mrf.mxu2 }
 0x1d5   :  { %v1114_v61 = vadd.f32 %v1113_v20, %v1025_v33  ;;  %v1202_v30 = vpop.f32.mrf.mxu3  ;;  %1450 = vadd.xlane.f32.xlu1 %v1389_v13 }
 0x1d6   :  { %v1327_v14 = vpop.xlane.xlu0 %1326  ;;  %v1026_v29 = vpop.f32.mrf.mxu1 }
 0x1d7   :  { %v1203_v6 = vadd.f32 %v1202_v30, %v1114_v61  ;;  %v3601_v38 = vadd.f32 %v1327_v14, %v3506_v48  ;;  %v1027_v0 = vadd.f32 %v1026_v29, %v3167_v36 }
 0x1d8   :  { %v1423_v18 = vpop.xlane.xlu2 %1422  ;;  %v1293_v13 = vpop.f32.mrf.mxu0 }
 0x1d9   :  { %v3603_v44 = vadd.f32 %v1291_v53, %v1203_v6  ;;  %v3606_v16 = vadd.f32 %v1423_v18, %v3514_v1 }
 0x1db   :  { %3876 = vst [vmem:[#allocation13_spill] sm:$0xff] %v3603_v44  ;;  %1356 = vadd.xlane.f32.xlu0 %v3603_v44  ;;  %v1390_v25 = vmul.f32 %v3603_v44, %v3603_v44  ;;  %v2651_v44 = vmov 0  }
 0x1dc   :  { %v1115_v54 = vpop.f32.mrf.mxu2  ;;  %2632 = vset.pattern.permute.xlu1 %v2651_v44  ;;  %2633 = vset.pattern.permute.xlu2 %v2651_v44 }
 0x1dd   :  { %v1116_v34 = vadd.f32 %v1115_v54, %v1027_v0  ;;  %1452 = vadd.xlane.f32.xlu2 %v1390_v25  ;;  %v1204_v33 = vpop.f32.mrf.mxu3  ;;  %2634 = vset.pattern.permute.xlu0 %v2651_v44 }
 0x1de   :  { %v1329_v36 = vpop.xlane.xlu1 %1328 }
 0x1df   :  { %v1205_v48 = vadd.f32 %v1204_v33, %v1116_v34 }
 0x1e0   :  { %v1425_v61 = vpop.xlane.xlu0 %1424 }
 0x1e1   :  { %v3612_v20 = vadd.f32 %v1293_v13, %v1205_v48  ;;  %v1480_v21 = vadd.f32 %v3522_v50, %v1425_v61 }
 0x1e3   :  { %3877 = vst [vmem:[#allocation14_spill] sm:$0xff] %v3612_v20  ;;  %1358 = vadd.xlane.f32.xlu1 %v3612_v20  ;;  %v1391_v1 = vmul.f32 %v3612_v20, %v3612_v20 }
 0x1e5   :  { %1454 = vadd.xlane.f32.xlu0 %v1391_v1  ;;  %v1472_v1 = vadd.f32 %v3517_v27, %v1329_v36 }
 0x1e6   :  { %v1331_v30 = vpop.xlane.xlu2 %1330 }
 0x1e7   :  { %v1473_v27 = vadd.f32 %v3529_v40, %v1331_v30 }
 0x1e8   :  { %v1427_v53 = vpop.xlane.xlu1 %1426 }
 0x1e9   :  { %v1481_v12 = vadd.f32 %v3534_v19, %v1427_v53 }
 0x1ee   :  { %v1333_v14 = vpop.xlane.xlu0 %1332 }
 0x1f0   :  { %v1429_v6 = vpop.xlane.xlu2 %1428 }
 0x1f6   :  { %v1335_v29 = vpop.xlane.xlu1 %1334 }
 0x1f8   :  { %v1431_v18 = vpop.xlane.xlu0 %1430 }
 0x1fe   :  { %v3617_v0 = vpop.xlane.xlu2 %1336 }
 0x200   :  { %v3619_v25 = vpop.xlane.xlu1 %1432 }
 0x206   :  { %v3621_v54 = vpop.xlane.xlu0 %1338 }
 0x208   :  { %v3623_v34 = vpop.xlane.xlu2 %1434 }
 0x20e   :  { %v3625_v33 = vpop.xlane.xlu1 %1340 }
 0x210   :  { %v3627_v48 = vpop.xlane.xlu0 %1436 }
 0x216   :  { %v3629_v13 = vpop.xlane.xlu2 %1342 }
 0x218   :  { %v3632_v20 = vpop.xlane.xlu1 %1438 }
 0x21e   :  { %v1345_v35 = vpop.xlane.xlu0 %1344 }
 0x21f   :  { %v1488_v5 = vadd.f32 %v1472_v1, %v1345_v35 }
 0x220   :  { %v1441_v57 = vpop.xlane.xlu2 %1440 }
 0x221   :  { %v3635_v2 = vmul.f32 0.0078125, %v1488_v5  ;;  %v1496_v43 = vadd.f32 %v1480_v21, %v1441_v57 }
 0x223   :  { %v1536_v15 = vmul.f32 %v3635_v2, %v3635_v2  ;;  %v1528_v22 = vmul.f32 0.0078125, %v1496_v43  ;;  %v1474_v43 = vadd.f32 %v3541_v11, %v1333_v14  ;;  %v1475_v11 = vadd.f32 %v3553_v3, %v1335_v29  ;;  %v1504_v3 = vld [vmem:[%s3849_s2] sm:$0xff] }
 0x225   :  { %v1544_v36 = vsub.f32 %v1528_v22, %v1536_v15  ;;  %v1482_v22 = vadd.f32 %v3546_v31, %v1429_v6  ;;  %v1483_v6 = vadd.f32 %v3558_v39, %v1431_v18 }
 0x226   :  { %v1347_v49 = vpop.xlane.xlu1 %1346 }
 0x227   :  { %v1552_v50 = vmax.f32 %v1544_v36, 0.0  ;;  %v1489_v35 = vadd.f32 %v1473_v27, %v1347_v49 }
 0x228   :  { %v1443_v61 = vpop.xlane.xlu0 %1442 }
 0x229   :  { %v1560_v1 = vadd.f32 1e-05, %v1552_v50  ;;  %v3641_v10 = vmul.f32 0.0078125, %v1489_v35  ;;  %v1497_v44 = vadd.f32 %v1481_v12, %v1443_v61 }
 0x22b   :  { %2635 = vrsqrt.f32 %v1560_v1  ;;  %v1537_v5 = vmul.f32 %v3641_v10, %v3641_v10  ;;  %v1529_v21 = vmul.f32 0.0078125, %v1497_v44  ;;  %vm1574_vm2 = vweird.f32 %v1560_v1 }
 0x22d   :  { %v1545_v57 = vsub.f32 %v1529_v21, %v1537_v5 }
 0x22e   :  { %v1349_v40 = vpop.xlane.xlu2 %1348 }
 0x22f   :  { %v1553_v15 = vmax.f32 %v1545_v57, 0.0  ;;  %v1490_v19 = vadd.f32 %v1474_v43, %v1349_v40 }
 0x230   :  { %v1445_v30 = vpop.xlane.xlu1 %1444 }
 0x231   :  { %v2636_v49 = vpop.eup %2635  ;;  %v1561_v53 = vadd.f32 1e-05, %v1553_v15  ;;  %v3647_v27 = vmul.f32 0.0078125, %v1490_v19  ;;  %v1498_v36 = vadd.f32 %v1482_v22, %v1445_v30 }
 0x232   :  { %v1569_v12 = vmul.f32 %v2636_v49, %v1560_v1  ;;  %vm1575_vm1 = vweird.f32 %v2636_v49 }
 0x233   :  { %2637 = vrsqrt.f32 %v1561_v53  ;;  %v1538_v50 = vmul.f32 %v3647_v27, %v3647_v27  ;;  %v1530_v35 = vmul.f32 0.0078125, %v1498_v36  ;;  %vm1576_vm3 = vmor %vm1574_vm2, %vm1575_vm1  ;;  %vm1584_vm5 = vweird.f32 %v1561_v53 }
 0x234   :  { %v1570_v61 = vmul.f32 %v2636_v49, %v1569_v12 }
 0x235   :  { %v1546_v14 = vsub.f32 %v1530_v35, %v1538_v50  ;;  %v1476_v50 = vadd.f32 %v3565_v58, %v3617_v0 }
 0x236   :  { %v1571_v44 = vmul.f32 0.5, %v1570_v61  ;;  %v1351_v31 = vpop.xlane.xlu0 %1350 }
 0x237   :  { %v1554_v5 = vmax.f32 %v1546_v14, 0.0  ;;  %v1491_v21 = vadd.f32 %v1475_v11, %v1351_v31 }
 0x238   :  { %v1447_v43 = vpop.xlane.xlu2 %1446  ;;  %v1572_v57 = vsub.f32 1.5, %v1571_v44  ;;  %v1484_v44 = vadd.f32 %v3570_v51, %v3619_v25  ;;  %v1512_v51 = vld [vmem:[%s3850_s3] sm:$0xff]  ;;  %v1505_v25 = vld [vmem:[%s3849_s2 + $0x8] sm:$0xff] }
 0x239   :  { %v2638_v40 = vpop.eup %2637  ;;  %v3653_v22 = vadd.f32 1e-05, %v1554_v5  ;;  %v3655_v15 = vmul.f32 0.0078125, %v1491_v21  ;;  %v1499_v19 = vadd.f32 %v1483_v6, %v1447_v43 }
 0x23a   :  { %v1579_v30 = vmul.f32 %v2638_v40, %v1561_v53  ;;  %v1573_v29 = vmul.f32 %v2636_v49, %v1572_v57  ;;  %vm1585_vm4 = vweird.f32 %v2638_v40  ;;  %v1513_v53 = vld [vmem:[%s3850_s3 + $0x8] sm:$0xff] }
 0x23b   :  { %2639 = vrsqrt.f32 %v3653_v22  ;;  %v1539_v39 = vmul.f32 %v3655_v15, %v3655_v15  ;;  %v1531_v18 = vmul.f32 0.0078125, %v1499_v19  ;;  %vm1586_vm6 = vmor %vm1584_vm5, %vm1585_vm4  ;;  %vm1594_vm8 = vweird.f32 %v3653_v22 }
 0x23c   :  { %v1580_v36 = vmul.f32 %v2638_v40, %v1579_v30  ;;  %v1577_v12 = vsel %vm1576_vm3, %v2636_v49, %v1573_v29 }
 0x23d   :  { %v1547_v35 = vsub.f32 %v1531_v18, %v1539_v39  ;;  %v1648_v61 = vmul.f32 %v1577_v12, %v1504_v3  ;;  %v1477_v39 = vadd.f32 %v3577_v45, %v3621_v54 }
 0x23e   :  { %v1581_v11 = vmul.f32 0.5, %v1580_v36  ;;  %v1353_v14 = vpop.xlane.xlu1 %1352 }
 0x23f   :  { %v1555_v1 = vmax.f32 %v1547_v35, 0.0  ;;  %v1492_v31 = vadd.f32 %v1476_v50, %v1353_v14  ;;  %1674 = vperm.xlu1 %2632, %v1648_v61   ;;  %v1656_v6 = vmul.f32 %v1648_v61, %v3635_v2  ;;  %v1485_v61 = vadd.f32 %v3582_v59, %v3623_v34  ;;  %v1506_v34 = vld [vmem:[%s3849_s2 + $0x10] sm:$0xff] }
 0x240   :  { %v1449_v5 = vpop.xlane.xlu0 %1448  ;;  %v1582_v21 = vsub.f32 1.5, %v1581_v11 }
 0x241   :  { %v2640_v43 = vpop.eup %2639  ;;  %v3668_v49 = vadd.f32 1e-05, %v1555_v1  ;;  %v3670_v57 = vmul.f32 0.0078125, %v1492_v31  ;;  %v1500_v58 = vadd.f32 %v1484_v44, %v1449_v5  ;;  %v1664_v36 = vsub.f32 %v1512_v51, %v1656_v6 }
 0x242   :  { %v1589_v0 = vmul.f32 %v2640_v43, %v3653_v22  ;;  %v1583_v2 = vmul.f32 %v2638_v40, %v1582_v21  ;;  %vm1595_vm7 = vweird.f32 %v2640_v43  ;;  %v1478_v22 = vadd.f32 %v3589_v62, %v3625_v33 }
 0x243   :  { %2641 = vrsqrt.f32 %v3668_v49  ;;  %v1540_v19 = vmul.f32 %v3670_v57, %v3670_v57  ;;  %v1532_v30 = vmul.f32 0.0078125, %v1500_v58  ;;  %vm1596_vm9 = vmor %vm1594_vm8, %vm1595_vm7  ;;  %vm1604_vm11 = vweird.f32 %v3668_v49 }
 0x244   :  { %v1590_v3 = vmul.f32 %v2640_v43, %v1589_v0  ;;  %v1587_v29 = vsel %vm1586_vm6, %v2638_v40, %v1583_v2 }
 0x245   :  { %v1548_v18 = vsub.f32 %v1532_v30, %v1540_v19  ;;  %v1649_v12 = vmul.f32 %v1587_v29, %v1505_v25  ;;  %v1486_v29 = vadd.f32 %v3594_v7, %v3627_v48  ;;  %v1507_v7 = vld [vmem:[%s3849_s2 + $0x18] sm:$0xff] }
 0x246   :  { %v1591_v50 = vmul.f32 0.5, %v1590_v3  ;;  %v1355_v35 = vpop.xlane.xlu2 %1354  ;;  %v1514_v3 = vld [vmem:[%s3850_s3 + $0x10] sm:$0xff] }
 0x247   :  { %v1556_v11 = vmax.f32 %v1548_v18, 0.0  ;;  %v1493_v14 = vadd.f32 %v1477_v39, %v1355_v35  ;;  %1746 = vperm.xlu1 %2632, %v1664_v36   ;;  %1679 = vperm.xlu2 %2633, %v1649_v12   ;;  %v1657_v40 = vmul.f32 %v1649_v12, %v3641_v10 }
 0x248   :  { %v1592_v44 = vsub.f32 1.5, %v1591_v50  ;;  %v1451_v45 = vpop.xlane.xlu1 %1450 }
 0x249   :  { %v2642_v54 = vpop.eup %2641  ;;  %v3690_v1 = vadd.f32 1e-05, %v1556_v11  ;;  %v3692_v31 = vmul.f32 0.0078125, %v1493_v14  ;;  %v1501_v6 = vadd.f32 %v1485_v61, %v1451_v45  ;;  %v1665_v5 = vsub.f32 %v1513_v53, %v1657_v40 }
 0x24a   :  { %v1599_v59 = vmul.f32 %v2642_v54, %v3668_v49  ;;  %v1593_v21 = vmul.f32 %v2640_v43, %v1592_v44  ;;  %vm1605_vm10 = vweird.f32 %v2642_v54  ;;  %v1479_v44 = vadd.f32 %v3601_v38, %v3629_v13  ;;  %v1515_v49 = vld [vmem:[%s3850_s3 + $0x18] sm:$0xff] }
 0x24b   :  { %2643 = vrsqrt.f32 %v3690_v1  ;;  %v1541_v10 = vmul.f32 %v3692_v31, %v3692_v31  ;;  %v1533_v58 = vmul.f32 0.0078125, %v1501_v6  ;;  %1751 = vperm.xlu0 %2634, %v1665_v5   ;;  %vm1606_vm12 = vmor %vm1604_vm11, %vm1605_vm10  ;;  %vm1614_vm14 = vweird.f32 %v3690_v1 }
 0x24c   :  { %v1600_v0 = vmul.f32 %v2642_v54, %v1599_v59  ;;  %v1597_v51 = vsel %vm1596_vm9, %v2640_v43, %v1593_v21 }
 0x24d   :  { %v1549_v25 = vsub.f32 %v1533_v58, %v1541_v10  ;;  %v1650_v2 = vmul.f32 %v1597_v51, %v1506_v34  ;;  %v1487_v34 = vadd.f32 %v3606_v16, %v3632_v20 }
 0x24e   :  { %v1601_v19 = vmul.f32 0.5, %v1600_v0  ;;  %v1357_v30 = vpop.xlane.xlu0 %1356 }
 0x24f   :  { %v1557_v39 = vmax.f32 %v1549_v25, 0.0  ;;  %v1494_v18 = vadd.f32 %v1478_v22, %v1357_v30  ;;  %v1658_v36 = vmul.f32 %v1650_v2, %v3647_v27 }
 0x250   :  { %v1453_v12 = vpop.xlane.xlu2 %1452  ;;  %v1602_v43 = vsub.f32 1.5, %v1601_v19  ;;  %v1508_v19 = vld [vmem:[%s3849_s2 + $0x20] sm:$0xff] }
 0x251   :  { %v2644_v50 = vpop.eup %2643  ;;  %v3710_v62 = vadd.f32 1e-05, %v1557_v39  ;;  %v3712_v33 = vmul.f32 0.0078125, %v1494_v18  ;;  %v1502_v35 = vadd.f32 %v1486_v29, %v1453_v12  ;;  %v1666_v53 = vsub.f32 %v1514_v3, %v1658_v36  ;;  %v1516_v36 = vld [vmem:[%s3850_s3 + $0x20] sm:$0xff] }
 0x252   :  { %v1609_v61 = vmul.f32 %v2644_v50, %v3690_v1  ;;  %v1603_v48 = vmul.f32 %v2642_v54, %v1602_v43  ;;  %vm1615_vm13 = vweird.f32 %v2644_v50 }
 0x253   :  { %2645 = vrsqrt.f32 %v3710_v62  ;;  %v1542_v27 = vmul.f32 %v3712_v33, %v3712_v33  ;;  %v1534_v11 = vmul.f32 0.0078125, %v1502_v35  ;;  %1756 = vperm.xlu2 %2633, %v1666_v53   ;;  %1684 = vperm.xlu0 %2634, %v1650_v2   ;;  %vm1616_vm15 = vmor %vm1614_vm14, %vm1615_vm13  ;;  %vm1624_vm1 = vweird.f32 %v3710_v62 }
 0x254   :  { %v1610_v14 = vmul.f32 %v2644_v50, %v1609_v61  ;;  %v1607_v40 = vsel %vm1606_vm12, %v2642_v54, %v1603_v48 }
 0x255   :  { %v1550_v45 = vsub.f32 %v1534_v11, %v1542_v27  ;;  %v1651_v6 = vmul.f32 %v1607_v40, %v1507_v7 }
 0x256   :  { %v1611_v5 = vmul.f32 0.5, %v1610_v14  ;;  %v1359_v59 = vpop.xlane.xlu1 %1358 }
 0x257   :  { %v1558_v21 = vmax.f32 %v1550_v45, 0.0  ;;  %v1495_v10 = vadd.f32 %v1479_v44, %v1359_v59  ;;  %v1659_v58 = vmul.f32 %v1651_v6, %v3655_v15 }
 0x258   :  { %v1455_v0 = vpop.xlane.xlu0 %1454  ;;  %v1612_v54 = vsub.f32 1.5, %v1611_v5  ;;  %v1510_v5 = vld [vmem:[%s3849_s2 + $0x30] sm:$0xff] }
 0x259   :  { %v2646_v51 = vpop.eup %2645  ;;  %v1566_v38 = vadd.f32 1e-05, %v1558_v21  ;;  %v3731_v13 = vmul.f32 0.0078125, %v1495_v10  ;;  %v1503_v22 = vadd.f32 %v1487_v34, %v1455_v0  ;;  %v1667_v25 = vsub.f32 %v1515_v49, %v1659_v58  ;;  %v1511_v0 = vld [vmem:[%s3849_s2 + $0x38] sm:$0xff] }
 0x25a   :  { %v1619_v2 = vmul.f32 %v2646_v51, %v3710_v62  ;;  %v1613_v16 = vmul.f32 %v2644_v50, %v1612_v54  ;;  %vm1625_vm0 = vweird.f32 %v2646_v51 }
 0x25b   :  { %2647 = vrsqrt.f32 %v1566_v38  ;;  %v1543_v20 = vmul.f32 %v3731_v13, %v3731_v13  ;;  %v1535_v15 = vmul.f32 0.0078125, %v1503_v22  ;;  %1689 = vperm.xlu2 %2633, %v1651_v6   ;;  %1761 = vperm.xlu1 %2632, %v1667_v25   ;;  %vm1626_vm2 = vmor %vm1624_vm1, %vm1625_vm0  ;;  %vm1634_vm4 = vweird.f32 %v1566_v38 }
 0x25c   :  { %v1620_v30 = vmul.f32 %v2646_v51, %v1619_v2  ;;  %v1617_v3 = vsel %vm1616_vm15, %v2644_v50, %v1613_v16  ;;  %v1509_v50 = vld [vmem:[%s3849_s2 + $0x28] sm:$0xff] }
 0x25d   :  { %v1551_v29 = vsub.f32 %v1535_v15, %v1543_v20  ;;  %v1652_v39 = vmul.f32 %v1617_v3, %v1508_v19  ;;  %v1517_v19 = vld [vmem:[%s3850_s3 + $0x28] sm:$0xff] }
 0x25e   :  { %v1621_v18 = vmul.f32 0.5, %v1620_v30 }
 0x25f   :  { %v1559_v12 = vmax.f32 %v1551_v29, 0.0  ;;  %v1660_v1 = vmul.f32 %v1652_v39, %v3670_v57 }
 0x260   :  { %v1622_v43 = vsub.f32 1.5, %v1621_v18 }
 0x261   :  { %v2648_v35 = vpop.eup %2647  ;;  %v1567_v53 = vadd.f32 1e-05, %v1559_v12  ;;  %v1668_v61 = vsub.f32 %v1516_v36, %v1660_v1 }
 0x262   :  { %v1629_v7 = vmul.f32 %v2648_v35, %v1566_v38  ;;  %v1623_v48 = vmul.f32 %v2646_v51, %v1622_v43  ;;  %vm1635_vm3 = vweird.f32 %v2648_v35 }
 0x263   :  { %2649 = vrsqrt.f32 %v1567_v53  ;;  %1694 = vperm.xlu1 %2632, %v1652_v39   ;;  %1766 = vperm.xlu0 %2634, %v1668_v61   ;;  %vm1636_vm5 = vmor %vm1634_vm4, %vm1635_vm3  ;;  %vm1644_vm7 = vweird.f32 %v1567_v53 }
 0x264   :  { %v1630_v27 = vmul.f32 %v2648_v35, %v1629_v7  ;;  %v1627_v11 = vsel %vm1626_vm2, %v2646_v51, %v1623_v48 }
 0x265   :  { %v1653_v57 = vmul.f32 %v1627_v11, %v1509_v50 }
 0x266   :  { %v1631_v14 = vmul.f32 0.5, %v1630_v27 }
 0x267   :  { %1699 = vperm.xlu2 %2633, %v1653_v57   ;;  %v1661_v40 = vmul.f32 %v1653_v57, %v3692_v31  ;;  %v1518_v31 = vld [vmem:[%s3850_s3 + $0x30] sm:$0xff] }
 0x268   :  { %v1632_v44 = vsub.f32 1.5, %v1631_v14 }
 0x269   :  { %v2650_v45 = vpop.eup %2649  ;;  %v1669_v16 = vsub.f32 %v1517_v19, %v1661_v40 }
 0x26a   :  { %v1639_v6 = vmul.f32 %v2650_v45, %v1567_v53  ;;  %v1633_v62 = vmul.f32 %v2648_v35, %v1632_v44  ;;  %vm1645_vm6 = vweird.f32 %v2650_v45 }
 0x26b   :  { %vm1646_vm8 = vmor %vm1644_vm7, %vm1645_vm6 }
 0x26c   :  { %v1640_v59 = vmul.f32 %v2650_v45, %v1639_v6  ;;  %v1637_v49 = vsel %vm1636_vm5, %v2648_v35, %v1633_v62 }
 0x26d   :  { %v1654_v34 = vmul.f32 %v1637_v49, %v1510_v5 }
 0x26e   :  { %v1641_v21 = vmul.f32 0.5, %v1640_v59 }
 0x26f   :  { %1704 = vperm.xlu1 %2632, %v1654_v34   ;;  %v1662_v10 = vmul.f32 %v1654_v34, %v3712_v33  ;;  %v1519_v33 = vld [vmem:[%s3850_s3 + $0x38] sm:$0xff] }
 0x270   :  { %v1642_v58 = vsub.f32 1.5, %v1641_v21 }
 0x271   :  { %v1670_v38 = vsub.f32 %v1518_v31, %v1662_v10 }
 0x272   :  { %v1643_v54 = vmul.f32 %v2650_v45, %v1642_v58 }
 0x274   :  { %v1647_v51 = vsel %vm1646_vm8, %v2650_v45, %v1643_v54 }
 0x275   :  { %v1655_v22 = vmul.f32 %v1647_v51, %v1511_v0 }
 0x277   :  { %1776 = vperm.xlu1 %2632, %v1670_v38   ;;  %1709 = vperm.xlu2 %2633, %v1655_v22   ;;  %v1663_v25 = vmul.f32 %v1655_v22, %v3731_v13 }
 0x279   :  { %v1671_v2 = vsub.f32 %v1519_v33, %v1663_v25 }
 0x27b   :  { %1781 = vperm.xlu0 %2634, %v1671_v2  }
 0x27f   :  { %1771 = vperm.xlu2 %2633, %v1669_v16  }
 0x2a1   :  { %v1680_v20 = vpop.permute.xlu2 %1679 }
 0x2a2   :  { %v1713_v43 = vmul.f32 %v1680_v20, %v3201_v42  ;;  %v1721_v35 = vmul.f32 %v1680_v20, %v3349_v17  ;;  %v1729_v53 = vmul.f32 %v1680_v20, %v3452_v55  ;;  %v1737_v61 = vmul.f32 %v1680_v20, %v3543_v23 }
 0x2ad   :  { %v1757_v30 = vpop.permute.xlu2 %1756 }
 0x2b1   :  { %v1675_v15 = vpop.permute.xlu1 %1674 }
 0x2b2   :  { %v1712_v3 = vmul.f32 %v1675_v15, %v3171_v63  ;;  %v1720_v29 = vmul.f32 %v1675_v15, %v3319_v28  ;;  %v1728_v39 = vmul.f32 %v1675_v15, %v3442_v60  ;;  %v1736_v13 = vmul.f32 %v1675_v15, %v3531_v41 }
 0x2b5   :  { %v1690_v42 = vpop.permute.xlu2 %1689 }
 0x2b6   :  { %v1715_v0 = vmul.f32 %v1690_v42, %v3236_v26  ;;  %v1723_v54 = vmul.f32 %v1690_v42, %v3386_v56  ;;  %v1731_v51 = vmul.f32 %v1690_v42, %v3472_v32  ;;  %v1739_v38 = vmul.f32 %v1690_v42, %v3567_v4 }
 0x2b9   :  { %v1747_v18 = vpop.permute.xlu1 %1746 }
 0x2ba   :  { %v1784_v36 = vadd.f32 %v1747_v18, %v1712_v3  ;;  %v1792_v12 = vadd.f32 %v1747_v18, %v1720_v29  ;;  %v1800_v1 = vadd.f32 %v1747_v18, %v1728_v39  ;;  %v1808_v7 = vadd.f32 %v1747_v18, %v1736_v13 }
 0x2bc   :  { %v1816_v27 = vmax.f32 %v1784_v36, 0.0  ;;  %v1824_v11 = vmax.f32 %v1792_v12, 0.0  ;;  %v1832_v41 = vmax.f32 %v1800_v1, 0.0  ;;  %v1840_v45 = vmax.f32 %v1808_v7, 0.0  ;;  %v3878_v12 = vld [vmem:[#allocation11_spill] sm:$0xff]  ;;  %v3879_v7 = vld [vmem:[#allocation2_spill] sm:$0xff] }
 0x2bd   :  { %v1752_v63 = vpop.permute.xlu0 %1751 }
 0x2be   :  { %v1785_v50 = vadd.f32 %v1752_v63, %v1713_v43  ;;  %v1793_v28 = vadd.f32 %v1752_v63, %v1721_v35  ;;  %v1801_v48 = vadd.f32 %v1752_v63, %v1729_v53  ;;  %v1809_v60 = vadd.f32 %v1752_v63, %v1737_v61 }
 0x2c0   :  { %v1817_v57 = vmax.f32 %v1785_v50, 0.0  ;;  %v1825_v14 = vmax.f32 %v1793_v28, 0.0  ;;  %v1833_v40 = vmax.f32 %v1801_v48, 0.0  ;;  %v1841_v44 = vmax.f32 %v1809_v60, 0.0  ;;  %v3880_v50 = vld [vmem:[#allocation5_spill] sm:$0xff]  ;;  %v3881_v48 = vld [vmem:[#allocation8_spill] sm:$0xff] }
 0x2c1   :  { %v1700_v34 = vpop.permute.xlu2 %1699  ;;  %v3882_v60 = vld [vmem:[#allocation12_spill] sm:$0xff] }
 0x2c2   :  { %v2515_v17 = vpack.c.bf16 %v1817_v57, %v1816_v27  ;;  %v2535_v6 = vpack.c.bf16 %v1825_v14, %v1824_v11  ;;  %v2555_v55 = vpack.c.bf16 %v1833_v40, %v1832_v41  ;;  %v2575_v5 = vpack.c.bf16 %v1841_v44, %v1840_v45 }
 0x2c3   :  { %v1717_v63 = vmul.f32 %v1700_v34, %v3879_v7  ;;  %v1725_v28 = vmul.f32 %v1700_v34, %v3880_v50 }
 0x2c4   :  { %2516 = vst [vmem:[%s3851_s4] sm:$0xff] %v2515_v17  }
 0x2c5   :  { %2595 = vst [vmem:[%s3851_s4 + $0x20] sm:$0xff] %v2535_v6   ;;  %v1685_v23 = vpop.permute.xlu0 %1684 }
 0x2c6   :  { %2599 = vst [vmem:[%s3851_s4 + $0x40] sm:$0xff] %v2555_v55   ;;  %v1714_v62 = vmul.f32 %v1685_v23, %v3206_v52  ;;  %v1722_v59 = vmul.f32 %v1685_v23, %v3356_v24  ;;  %v1730_v49 = vmul.f32 %v1685_v23, %v3462_v9  ;;  %v1738_v21 = vmul.f32 %v1685_v23, %v3555_v46 }
 0x2c7   :  { %2603 = vst [vmem:[%s3851_s4 + $0x60] sm:$0xff] %v2575_v5  }
 0x2c8   :  { %v1786_v10 = vadd.f32 %v1757_v30, %v1714_v62  ;;  %v1794_v58 = vadd.f32 %v1757_v30, %v1722_v59  ;;  %v1802_v31 = vadd.f32 %v1757_v30, %v1730_v49  ;;  %v1810_v22 = vadd.f32 %v1757_v30, %v1738_v21  ;;  %v3883_v21 = vld [vmem:[#allocation3_spill] sm:$0xff] }
 0x2ca   :  { %v1818_v2 = vmax.f32 %v1786_v10, 0.0  ;;  %v1826_v19 = vmax.f32 %v1794_v58, 0.0  ;;  %v1834_v46 = vmax.f32 %v1802_v31, 0.0  ;;  %v1842_v26 = vmax.f32 %v1810_v22, 0.0  ;;  %v3884_v58 = vld [vmem:[#allocation6_spill] sm:$0xff] }
 0x2cd   :  { %v1762_v52 = vpop.permute.xlu1 %1761 }
 0x2ce   :  { %v1787_v33 = vadd.f32 %v1762_v52, %v1715_v0  ;;  %v1795_v24 = vadd.f32 %v1762_v52, %v1723_v54  ;;  %v1803_v25 = vadd.f32 %v1762_v52, %v1731_v51  ;;  %v1811_v9 = vadd.f32 %v1762_v52, %v1739_v38  ;;  %v3885_v0 = vld [vmem:[#allocation9_spill] sm:$0xff] }
 0x2cf   :  { %v3886_v38 = vld [vmem:[#allocation13_spill] sm:$0xff] }
 0x2d0   :  { %v1819_v16 = vmax.f32 %v1787_v33, 0.0  ;;  %v1827_v20 = vmax.f32 %v1795_v24, 0.0  ;;  %v1835_v15 = vmax.f32 %v1803_v25, 0.0  ;;  %v1843_v3 = vmax.f32 %v1811_v9, 0.0  ;;  %v3887_v25 = vld [vmem:[#allocation4_spill] sm:$0xff] }
 0x2d1   :  { %v1710_v29 = vpop.permute.xlu2 %1709 }
 0x2d2   :  { %v2520_v56 = vpack.c.bf16 %v1819_v16, %v1818_v2  ;;  %v2540_v39 = vpack.c.bf16 %v1827_v20, %v1826_v19  ;;  %v2560_v32 = vpack.c.bf16 %v1835_v15, %v1834_v46  ;;  %v2580_v18 = vpack.c.bf16 %v1843_v3, %v1842_v26  ;;  %v3888_v2 = vld [vmem:[#allocation7_spill] sm:$0xff]  ;;  %v3889_v46 = vld [vmem:[#allocation10_spill] sm:$0xff] }
 0x2d3   :  { %v1719_v9 = vmul.f32 %v1710_v29, %v3887_v25  ;;  %v1727_v19 = vmul.f32 %v1710_v29, %v3888_v2  ;;  %v1735_v16 = vmul.f32 %v1710_v29, %v3889_v46  ;;  %v3890_v20 = vld [vmem:[#allocation14_spill] sm:$0xff] }
 0x2d4   :  { %2592 = vst [vmem:[%s3851_s4 + $0x8] sm:$0xff] %v2520_v56   ;;  %v1743_v15 = vmul.f32 %v1710_v29, %v3890_v20 }
 0x2d5   :  { %2596 = vst [vmem:[%s3851_s4 + $0x28] sm:$0xff] %v2540_v39   ;;  %v1695_v4 = vpop.permute.xlu1 %1694  ;;  %v1767_v43 = vpop.permute.xlu0 %1766 }
 0x2d6   :  { %2600 = vst [vmem:[%s3851_s4 + $0x48] sm:$0xff] %v2560_v32   ;;  %v1716_v30 = vmul.f32 %v1695_v4, %v3244_v47  ;;  %v1724_v13 = vmul.f32 %v1695_v4, %v3393_v8  ;;  %v1732_v36 = vmul.f32 %v1695_v4, %v3484_v37  ;;  %v1740_v1 = vmul.f32 %v1695_v4, %v3878_v12 }
 0x2d7   :  { %2604 = vst [vmem:[%s3851_s4 + $0x68] sm:$0xff] %v2580_v18   ;;  %v1733_v47 = vmul.f32 %v1700_v34, %v3881_v48  ;;  %v1741_v8 = vmul.f32 %v1700_v34, %v3882_v60 }
 0x2d8   :  { %v1788_v35 = vadd.f32 %v1767_v43, %v1716_v30  ;;  %v1796_v53 = vadd.f32 %v1767_v43, %v1724_v13  ;;  %v1804_v61 = vadd.f32 %v1767_v43, %v1732_v36  ;;  %v1812_v37 = vadd.f32 %v1767_v43, %v1740_v1 }
 0x2d9   :  { %v1772_v27 = vpop.permute.xlu2 %1771 }
 0x2da   :  { %v1789_v11 = vadd.f32 %v1772_v27, %v1717_v63  ;;  %v1797_v41 = vadd.f32 %v1772_v27, %v1725_v28  ;;  %v1805_v57 = vadd.f32 %v1772_v27, %v1733_v47  ;;  %v1813_v14 = vadd.f32 %v1772_v27, %v1741_v8 }
 0x2db   :  { %v1820_v40 = vmax.f32 %v1788_v35, 0.0  ;;  %v1828_v44 = vmax.f32 %v1796_v53, 0.0  ;;  %v1836_v42 = vmax.f32 %v1804_v61, 0.0  ;;  %v1844_v5 = vmax.f32 %v1812_v37, 0.0 }
 0x2dc   :  { %v1821_v45 = vmax.f32 %v1789_v11, 0.0  ;;  %v1829_v17 = vmax.f32 %v1797_v41, 0.0  ;;  %v1837_v6 = vmax.f32 %v1805_v57, 0.0  ;;  %v1845_v55 = vmax.f32 %v1813_v14, 0.0 }
 0x2de   :  { %v2525_v23 = vpack.c.bf16 %v1821_v45, %v1820_v40  ;;  %v2545_v62 = vpack.c.bf16 %v1829_v17, %v1828_v44  ;;  %v2565_v59 = vpack.c.bf16 %v1837_v6, %v1836_v42  ;;  %v2585_v49 = vpack.c.bf16 %v1845_v55, %v1844_v5 }
 0x2e0   :  { %2593 = vst [vmem:[%s3851_s4 + $0x10] sm:$0xff] %v2525_v23  }
 0x2e1   :  { %v1705_v34 = vpop.permute.xlu1 %1704  ;;  %2597 = vst [vmem:[%s3851_s4 + $0x30] sm:$0xff] %v2545_v62  }
 0x2e2   :  { %2601 = vst [vmem:[%s3851_s4 + $0x50] sm:$0xff] %v2565_v59   ;;  %v1718_v10 = vmul.f32 %v1705_v34, %v3883_v21  ;;  %v1726_v31 = vmul.f32 %v1705_v34, %v3884_v58  ;;  %v1734_v54 = vmul.f32 %v1705_v34, %v3885_v0  ;;  %v1742_v22 = vmul.f32 %v1705_v34, %v3886_v38 }
 0x2e3   :  { %2605 = vst [vmem:[%s3851_s4 + $0x70] sm:$0xff] %v2585_v49  }
 0x2e9   :  { %v1777_v51 = vpop.permute.xlu1 %1776 }
 0x2ea   :  { %v1790_v52 = vadd.f32 %v1777_v51, %v1718_v10  ;;  %v1798_v33 = vadd.f32 %v1777_v51, %v1726_v31  ;;  %v1806_v24 = vadd.f32 %v1777_v51, %v1734_v54  ;;  %v1814_v3 = vadd.f32 %v1777_v51, %v1742_v22 }
 0x2ec   :  { %v1822_v4 = vmax.f32 %v1790_v52, 0.0  ;;  %v1830_v30 = vmax.f32 %v1798_v33, 0.0  ;;  %v1838_v13 = vmax.f32 %v1806_v24, 0.0  ;;  %v1846_v35 = vmax.f32 %v1814_v3, 0.0 }
 0x2ed   :  { %v1782_v26 = vpop.permute.xlu0 %1781 }
 0x2ee   :  { %v1791_v56 = vadd.f32 %v1782_v26, %v1719_v9  ;;  %v1799_v39 = vadd.f32 %v1782_v26, %v1727_v19  ;;  %v1807_v32 = vadd.f32 %v1782_v26, %v1735_v16  ;;  %v1815_v18 = vadd.f32 %v1782_v26, %v1743_v15 }
 0x2f0   :  { %v1823_v36 = vmax.f32 %v1791_v56, 0.0  ;;  %v1831_v12 = vmax.f32 %v1799_v39, 0.0  ;;  %v1839_v1 = vmax.f32 %v1807_v32, 0.0  ;;  %v1847_v43 = vmax.f32 %v1815_v18, 0.0 }
 0x2f2   :  { %v2530_v53 = vpack.c.bf16 %v1823_v36, %v1822_v4  ;;  %v2550_v61 = vpack.c.bf16 %v1831_v12, %v1830_v30  ;;  %v2570_v7 = vpack.c.bf16 %v1839_v1, %v1838_v13  ;;  %v2590_v63 = vpack.c.bf16 %v1847_v43, %v1846_v35 }
 0x2f4   :  { %2594 = vst [vmem:[%s3851_s4 + $0x18] sm:$0xff] %v2530_v53  }
 0x2f5   :  { %2598 = vst [vmem:[%s3851_s4 + $0x38] sm:$0xff] %v2550_v61  }
 0x2f6   :  { %2602 = vst [vmem:[%s3851_s4 + $0x58] sm:$0xff] %v2570_v7  }
 0x2f7   :  { %2606 = vst [vmem:[%s3851_s4 + $0x78] sm:$0xff] %v2590_v63  }

// kernel: gskip_forward.6
= control target key start
LH: loop header
LB: loop body
LE: loop exit
PB: predicated region body
PF: predicated region fallthrough
CT: control target
= control target key end

     0   :  { %vm554_vm0 = vcmask 523264   ;;  %s2198_s0 = inlined_call_operand.vmem [shape: bf16[576,128], index: 0, kind: input, shape index: {}]   ;;  %s2199_s1 = inlined_call_operand.vmem [shape: bf16[128,576], index: 1, kind: input, shape index: {}]   ;;  %s2200_s2 = inlined_call_operand.vmem [shape: f32[32,1], index: 2, kind: input, shape index: {}]   ;;  %s2201_s3 = inlined_call_operand.vmem [shape: f32[32,1], index: 3, kind: input, shape index: {}]   ;;  %s2202_s4 = inlined_call_operand.vmem [shape: bf16[128,128], index: 4, kind: output, shape index: {}]  }
   0x1   :  { %v1495_v0 = vld [vmem:[%s2198_s0 + $0x38] sm:$0xff]  ;;  %v1494_v1 = vld [vmem:[%s2198_s0 + $0x30] sm:$0xff]  ;;  %v1493_v2 = vld [vmem:[%s2198_s0 + $0x28] sm:$0xff] }
   0x2   :  { %1571 = vmatpush.bf16.msra.mxu1 %v1495_v0  ;;  %1572 = vmatpush.bf16.msra.mxu2 %v1495_v0  ;;  %v1492_v3 = vld [vmem:[%s2198_s0 + $0x20] sm:$0xff]  ;;  %v1491_v4 = vld [vmem:[%s2198_s0 + $0x18] sm:$0xff]  ;;  %v1490_v5 = vld [vmem:[%s2198_s0 + $0x10] sm:$0xff] }
   0x3   :  { %1573 = vmatpush.bf16.msra.mxu3 %v1495_v0  ;;  %579 = vmatpush.bf16.msra.mxu0 %v1495_v0  ;;  %v1489_v6 = vld [vmem:[%s2198_s0 + $0x8] sm:$0xff]  ;;  %v1488_v7 = vld [vmem:[%s2198_s0] sm:$0xff]  ;;  %v1178_v8 = vld [vmem:[%s2199_s1 + $0x50] sm:$0xf] }
   0x4   :  { %v1460_v9 = vld [vmem:[%s2199_s1 + $0x60] sm:$0xf0]  ;;  %v1218_v10 = vld [vmem:[%s2199_s1 + $0xa0] sm:$0xf]  ;;  %v1470_v11 = vld [vmem:[%s2199_s1 + $0xb0] sm:$0xf0] }
   0x5   :  { %v1258_v12 = vld [vmem:[%s2199_s1 + $0xf0] sm:$0xf]  ;;  %v1480_v13 = vld [vmem:[%s2199_s1 + $0x100] sm:$0xf0]  ;;  %v1138_v14 = vld [vmem:[%s2199_s1] sm:$0xf]  ;;  %v1179_v18 = vor.u32 %v1460_v9, %v1178_v8  ;;  %v1219_v19 = vor.u32 %v1470_v11, %v1218_v10 }
   0x6   :  { %1574 = vmatpush.bf16.msra.mxu1 %v1494_v1  ;;  %1575 = vmatpush.bf16.msra.mxu2 %v1494_v1  ;;  %v1450_v15 = vld [vmem:[%s2199_s1 + $0x10] sm:$0xf0]  ;;  %v1511_v16 = vld [vmem:[%s2198_s0 + $0xb8] sm:$0xff]  ;;  %v1259_v20 = vor.u32 %v1480_v13, %v1258_v12  ;;  %v1509_v28 = vld [vmem:[%s2198_s0 + $0xa8] sm:$0xff] }
   0x7   :  { %1576 = vmatpush.bf16.msra.mxu3 %v1494_v1  ;;  %580 = vmatpush.bf16.msra.mxu0 %v1494_v1  ;;  %v1503_v17 = vld [vmem:[%s2198_s0 + $0x78] sm:$0xff]  ;;  %v1139_v21 = vor.u32 %v1450_v15, %v1138_v14  ;;  %v1510_v24 = vld [vmem:[%s2198_s0 + $0xb0] sm:$0xff]  ;;  %v1501_v29 = vld [vmem:[%s2198_s0 + $0x68] sm:$0xff] }
   0x8   :  { %v1519_v22 = vld [vmem:[%s2198_s0 + $0xf8] sm:$0xff]  ;;  %v1502_v25 = vld [vmem:[%s2198_s0 + $0x70] sm:$0xff]  ;;  %v1517_v30 = vld [vmem:[%s2198_s0 + $0xe8] sm:$0xff] }
   0x9   :  { %v1523_v23 = vld [vmem:[%s2198_s0 + $0x118] sm:$0xff]  ;;  %v1518_v26 = vld [vmem:[%s2198_s0 + $0xf0] sm:$0xff]  ;;  %v1521_v31 = vld [vmem:[%s2198_s0 + $0x108] sm:$0xff] }
   0xa   :  { %1577 = vmatpush.bf16.msra.mxu1 %v1493_v2  ;;  %1578 = vmatpush.bf16.msra.mxu2 %v1493_v2  ;;  %v1522_v27 = vld [vmem:[%s2198_s0 + $0x110] sm:$0xff]  ;;  %v1508_v32 = vld [vmem:[%s2198_s0 + $0xa0] sm:$0xff]  ;;  %v1198_v35 = vld [vmem:[%s2199_s1 + $0x78] sm:$0xf] }
   0xb   :  { %1579 = vmatpush.bf16.msra.mxu3 %v1493_v2  ;;  %581 = vmatpush.bf16.msra.mxu0 %v1493_v2  ;;  %v1500_v33 = vld [vmem:[%s2198_s0 + $0x60] sm:$0xff]  ;;  %v1465_v36 = vld [vmem:[%s2199_s1 + $0x88] sm:$0xf0]  ;;  %v1238_v37 = vld [vmem:[%s2199_s1 + $0xc8] sm:$0xf] }
   0xc   :  { %v1516_v34 = vld [vmem:[%s2198_s0 + $0xe0] sm:$0xff]  ;;  %v1475_v38 = vld [vmem:[%s2199_s1 + $0xd8] sm:$0xf0]  ;;  %v1278_v39 = vld [vmem:[%s2199_s1 + $0x118] sm:$0xf]  ;;  %v1199_v46 = vor.u32 %v1465_v36, %v1198_v35 }
   0xd   :  { %v1485_v40 = vld [vmem:[%s2199_s1 + $0x128] sm:$0xf0]  ;;  %v1158_v41 = vld [vmem:[%s2199_s1 + $0x28] sm:$0xf]  ;;  %v1455_v42 = vld [vmem:[%s2199_s1 + $0x38] sm:$0xf0]  ;;  %v1239_v47 = vor.u32 %v1475_v38, %v1238_v37 }
   0xe   :  { %1580 = vmatpush.bf16.msra.mxu1 %v1492_v3  ;;  %1581 = vmatpush.bf16.msra.mxu2 %v1492_v3  ;;  %v1520_v43 = vld [vmem:[%s2198_s0 + $0x100] sm:$0xff]  ;;  %v1507_v44 = vld [vmem:[%s2198_s0 + $0x98] sm:$0xff]  ;;  %v1279_v48 = vor.u32 %v1485_v40, %v1278_v39  ;;  %v1159_v49 = vor.u32 %v1455_v42, %v1158_v41  ;;  %v1506_v51 = vld [vmem:[%s2198_s0 + $0x90] sm:$0xff] }
   0xf   :  { %1582 = vmatpush.bf16.msra.mxu3 %v1492_v3  ;;  %582 = vmatpush.bf16.msra.mxu0 %v1492_v3  ;;  %v1499_v45 = vld [vmem:[%s2198_s0 + $0x58] sm:$0xff]  ;;  %v1498_v52 = vld [vmem:[%s2198_s0 + $0x50] sm:$0xff]  ;;  %v1505_v54 = vld [vmem:[%s2198_s0 + $0x88] sm:$0xff] }
  0x10   :  { %v1515_v50 = vld [vmem:[%s2198_s0 + $0xd8] sm:$0xff]  ;;  %v1514_v53 = vld [vmem:[%s2198_s0 + $0xd0] sm:$0xff]  ;;  %v1497_v55 = vld [vmem:[%s2198_s0 + $0x48] sm:$0xff] }
  0x11   :  { %v1513_v56 = vld [vmem:[%s2198_s0 + $0xc8] sm:$0xff]  ;;  %v1504_v57 = vld [vmem:[%s2198_s0 + $0x80] sm:$0xff]  ;;  %v1140_v61 = vld [vmem:[%s2199_s1 + $0x14] sm:$0xf0] }
  0x12   :  { %1583 = vmatpush.bf16.msra.mxu1 %v1491_v4  ;;  %1584 = vmatpush.bf16.msra.mxu2 %v1491_v4  ;;  %v1496_v58 = vld [vmem:[%s2198_s0 + $0x40] sm:$0xff]  ;;  %v1146_v62 = vld [vmem:[%s2199_s1 + $0x8] sm:$0xf]  ;;  %v1451_v63 = vld [vmem:[%s2199_s1 + $0x18] sm:$0xf0] }
  0x13   :  { %1585 = vmatpush.bf16.msra.mxu3 %v1491_v4  ;;  %583 = vmatpush.bf16.msra.mxu0 %v1491_v4  ;;  %v1512_v59 = vld [vmem:[%s2198_s0 + $0xc0] sm:$0xff]  ;;  %v1449_v0 = vld [vmem:[%s2199_s1 + $0xc] sm:$0xf]  ;;  %v1154_v2 = vld [vmem:[%s2199_s1 + $0x10] sm:$0xf] }
  0x14   :  { %v1448_v60 = vld [vmem:[%s2199_s1 + $0x4] sm:$0xf]  ;;  %v1148_v1 = vld [vmem:[%s2199_s1 + $0x1c] sm:$0xf0]  ;;  %v1453_v8 = vld [vmem:[%s2199_s1 + $0x2c] sm:$0xf] }
  0x15   :  { %v1452_v3 = vld [vmem:[%s2199_s1 + $0x20] sm:$0xf0]  ;;  %v1143_v4 = vor.u32 %v1448_v60, %v1140_v61  ;;  %v1160_v9 = vld [vmem:[%s2199_s1 + $0x3c] sm:$0xf0]  ;;  %v1166_v10 = vld [vmem:[%s2199_s1 + $0x30] sm:$0xf] }
  0x16   :  { %1586 = vmatpush.bf16.msra.mxu1 %v1490_v5  ;;  %1587 = vmatpush.bf16.msra.mxu2 %v1490_v5  ;;  %v1456_v11 = vld [vmem:[%s2199_s1 + $0x40] sm:$0xf0]  ;;  %v1454_v12 = vld [vmem:[%s2199_s1 + $0x34] sm:$0xf]  ;;  %v1168_v13 = vld [vmem:[%s2199_s1 + $0x44] sm:$0xf0] }
  0x17   :  { %1588 = vmatpush.bf16.msra.mxu3 %v1490_v5  ;;  %584 = vmatpush.bf16.msra.mxu0 %v1490_v5  ;;  %v1147_v5 = vor.u32 %v1451_v63, %v1146_v62  ;;  %v1174_v14 = vld [vmem:[%s2199_s1 + $0x38] sm:$0xf]  ;;  %v1457_v15 = vld [vmem:[%s2199_s1 + $0x48] sm:$0xf0]  ;;  %v1466_v35 = vld [vmem:[%s2199_s1 + $0x90] sm:$0xf0] }
  0x18   :  { %v1464_v36 = vld [vmem:[%s2199_s1 + $0x84] sm:$0xf]  ;;  %v1208_v37 = vld [vmem:[%s2199_s1 + $0x94] sm:$0xf0]  ;;  %v1214_v38 = vld [vmem:[%s2199_s1 + $0x88] sm:$0xf] }
  0x19   :  { %v1467_v39 = vld [vmem:[%s2199_s1 + $0x98] sm:$0xf0]  ;;  %v1211_v42 = vor.u32 %v1464_v36, %v1208_v37  ;;  %v1474_v60 = vld [vmem:[%s2199_s1 + $0xd4] sm:$0xf]  ;;  %v1248_v61 = vld [vmem:[%s2199_s1 + $0xe4] sm:$0xf0] }
  0x1a   :  { %1589 = vmatpush.bf16.msra.mxu1 %v1489_v6  ;;  %1590 = vmatpush.bf16.msra.mxu2 %v1489_v6  ;;  %v1254_v62 = vld [vmem:[%s2199_s1 + $0xd8] sm:$0xf]  ;;  %v1477_v63 = vld [vmem:[%s2199_s1 + $0xe8] sm:$0xf0] }
  0x1b   :  { %1591 = vmatpush.bf16.msra.mxu3 %v1489_v6  ;;  %585 = vmatpush.bf16.msra.mxu0 %v1489_v6  ;;  %v1151_v6 = vor.u32 %v1449_v0, %v1148_v1 }
  0x1e   :  { %1592 = vmatpush.bf16.msra.mxu1 %v1488_v7  ;;  %1593 = vmatpush.bf16.msra.mxu2 %v1488_v7 }
  0x1f   :  { %1594 = vmatpush.bf16.msra.mxu3 %v1488_v7  ;;  %586 = vmatpush.bf16.msra.mxu0 %v1488_v7  ;;  %v1155_v7 = vor.u32 %v1452_v3, %v1154_v2  ;;  %v1251_v2 = vor.u32 %v1474_v60, %v1248_v61  ;;  %v1255_v3 = vor.u32 %v1477_v63, %v1254_v62 }
  0x21   :  { %597 = vmatmul.bf16.vlgmr.msra.gmra.mxu1 %v1179_v18  ;;  %607 = vmatmul.bf16.vlgmr.msra.gmra.mxu2 %v1219_v19  ;;  %v1171_v18 = vor.u32 %v1454_v12, %v1168_v13  ;;  %v1175_v19 = vor.u32 %v1457_v15, %v1174_v14 }
  0x22   :  { %677 = vmatpush.bf16.msrb.mxu2 %v1511_v16  ;;  %628 = vmatpush.bf16.msrb.mxu1 %v1503_v17  ;;  %v1163_v16 = vor.u32 %v1453_v8, %v1160_v9  ;;  %v1167_v17 = vor.u32 %v1456_v11, %v1166_v10  ;;  %v1479_v8 = vld [vmem:[%s2199_s1 + $0xfc] sm:$0xf]  ;;  %v1268_v9 = vld [vmem:[%s2199_s1 + $0x10c] sm:$0xf0]  ;;  %v1274_v10 = vld [vmem:[%s2199_s1 + $0x100] sm:$0xf] }
  0x23   :  { %617 = vmatmul.bf16.vlgmr.msra.gmra.mxu3 %v1259_v20  ;;  %587 = vmatmul.bf16.vlgmr.msra.gmra.mxu0 %v1139_v21  ;;  %v1458_v20 = vld [vmem:[%s2199_s1 + $0x54] sm:$0xf]  ;;  %v1180_v21 = vld [vmem:[%s2199_s1 + $0x64] sm:$0xf0]  ;;  %v1271_v15 = vor.u32 %v1479_v8, %v1268_v9 }
  0x24   :  { %726 = vmatpush.bf16.msrb.mxu3 %v1519_v22  ;;  %779 = vmatpush.bf16.msrb.mxu0 %v1523_v23  ;;  %v1186_v22 = vld [vmem:[%s2199_s1 + $0x58] sm:$0xf]  ;;  %v1461_v23 = vld [vmem:[%s2199_s1 + $0x68] sm:$0xf0]  ;;  %v1482_v11 = vld [vmem:[%s2199_s1 + $0x110] sm:$0xf0] }
  0x26   :  { %678 = vmatpush.bf16.msrb.mxu2 %v1510_v24  ;;  %629 = vmatpush.bf16.msrb.mxu1 %v1502_v25  ;;  %v1459_v24 = vld [vmem:[%s2199_s1 + $0x5c] sm:$0xf]  ;;  %v1188_v25 = vld [vmem:[%s2199_s1 + $0x6c] sm:$0xf0] }
  0x28   :  { %727 = vmatpush.bf16.msrb.mxu3 %v1518_v26  ;;  %780 = vmatpush.bf16.msrb.mxu0 %v1522_v27  ;;  %v1194_v26 = vld [vmem:[%s2199_s1 + $0x60] sm:$0xf]  ;;  %v1462_v27 = vld [vmem:[%s2199_s1 + $0x70] sm:$0xf0] }
  0x2a   :  { %679 = vmatpush.bf16.msrb.mxu2 %v1509_v28  ;;  %630 = vmatpush.bf16.msrb.mxu1 %v1501_v29  ;;  %v1183_v28 = vor.u32 %v1458_v20, %v1180_v21  ;;  %v1187_v29 = vor.u32 %v1461_v23, %v1186_v22  ;;  %v1483_v22 = vld [vmem:[%s2199_s1 + $0x11c] sm:$0xf]  ;;  %v1280_v23 = vld [vmem:[%s2199_s1 + $0x12c] sm:$0xf0] }
  0x2c   :  { %728 = vmatpush.bf16.msrb.mxu3 %v1517_v30  ;;  %781 = vmatpush.bf16.msrb.mxu0 %v1521_v31  ;;  %v1191_v30 = vor.u32 %v1459_v24, %v1188_v25  ;;  %v1195_v31 = vor.u32 %v1462_v27, %v1194_v26  ;;  %v1286_v24 = vld [vmem:[%s2199_s1 + $0x120] sm:$0xf]  ;;  %v1486_v25 = vld [vmem:[%s2199_s1 + $0x130] sm:$0xf0]  ;;  %v1484_v26 = vld [vmem:[%s2199_s1 + $0x124] sm:$0xf] }
  0x2d   :  { %v1288_v27 = vld [vmem:[%s2199_s1 + $0x134] sm:$0xf0] }
  0x2e   :  { %680 = vmatpush.bf16.msrb.mxu2 %v1508_v32  ;;  %631 = vmatpush.bf16.msrb.mxu1 %v1500_v33  ;;  %v1463_v32 = vld [vmem:[%s2199_s1 + $0x7c] sm:$0xf]  ;;  %v1200_v33 = vld [vmem:[%s2199_s1 + $0x8c] sm:$0xf0] }
  0x2f   :  { %v1203_v40 = vor.u32 %v1463_v32, %v1200_v33  ;;  %v1283_v32 = vor.u32 %v1483_v22, %v1280_v23  ;;  %v1287_v33 = vor.u32 %v1486_v25, %v1286_v24 }
  0x30   :  { %729 = vmatpush.bf16.msrb.mxu3 %v1516_v34  ;;  %782 = vmatpush.bf16.msrb.mxu0 %v1520_v43  ;;  %v1206_v34 = vld [vmem:[%s2199_s1 + $0x80] sm:$0xf]  ;;  %v1215_v43 = vor.u32 %v1467_v39, %v1214_v38 }
  0x31   :  { %602 = vmatmul.bf16.gmra.mxu1 %v1199_v46  ;;  %612 = vmatmul.bf16.gmra.mxu2 %v1239_v47  ;;  %v1207_v41 = vor.u32 %v1466_v35, %v1206_v34  ;;  %v1226_v46 = vld [vmem:[%s2199_s1 + $0xa8] sm:$0xf]  ;;  %v1471_v47 = vld [vmem:[%s2199_s1 + $0xb8] sm:$0xf0]  ;;  %v1291_v35 = vor.u32 %v1484_v26, %v1288_v27 }
  0x32   :  { %681 = vmatpush.bf16.msrb.mxu2 %v1507_v44  ;;  %632 = vmatpush.bf16.msrb.mxu1 %v1499_v45  ;;  %v1468_v44 = vld [vmem:[%s2199_s1 + $0xa4] sm:$0xf]  ;;  %v1220_v45 = vld [vmem:[%s2199_s1 + $0xb4] sm:$0xf0] }
  0x33   :  { %622 = vmatmul.bf16.gmra.mxu3 %v1279_v48  ;;  %592 = vmatmul.bf16.gmra.mxu0 %v1159_v49  ;;  %v1469_v48 = vld [vmem:[%s2199_s1 + $0xac] sm:$0xf]  ;;  %v1228_v49 = vld [vmem:[%s2199_s1 + $0xbc] sm:$0xf0] }
  0x34   :  { %730 = vmatpush.bf16.msrb.mxu3 %v1515_v50  ;;  %v1234_v50 = vld [vmem:[%s2199_s1 + $0xb0] sm:$0xf] }
  0x36   :  { %682 = vmatpush.bf16.msrb.mxu2 %v1506_v51  ;;  %633 = vmatpush.bf16.msrb.mxu1 %v1498_v52  ;;  %v1472_v51 = vld [vmem:[%s2199_s1 + $0xc0] sm:$0xf0]  ;;  %v1223_v52 = vor.u32 %v1468_v44, %v1220_v45 }
  0x38   :  { %731 = vmatpush.bf16.msrb.mxu3 %v1514_v53  ;;  %v1227_v53 = vor.u32 %v1471_v47, %v1226_v46 }
  0x3a   :  { %683 = vmatpush.bf16.msrb.mxu2 %v1505_v54  ;;  %634 = vmatpush.bf16.msrb.mxu1 %v1497_v55  ;;  %v1231_v54 = vor.u32 %v1469_v48, %v1228_v49  ;;  %v1235_v55 = vor.u32 %v1472_v51, %v1234_v50 }
  0x3c   :  { %732 = vmatpush.bf16.msrb.mxu3 %v1513_v56  ;;  %v1473_v56 = vld [vmem:[%s2199_s1 + $0xcc] sm:$0xf] }
  0x3e   :  { %684 = vmatpush.bf16.msrb.mxu2 %v1504_v57  ;;  %635 = vmatpush.bf16.msrb.mxu1 %v1496_v58  ;;  %v1240_v57 = vld [vmem:[%s2199_s1 + $0xdc] sm:$0xf0]  ;;  %v1246_v58 = vld [vmem:[%s2199_s1 + $0xd0] sm:$0xf] }
  0x3f   :  { %v1243_v0 = vor.u32 %v1473_v56, %v1240_v57 }
  0x40   :  { %733 = vmatpush.bf16.msrb.mxu3 %v1512_v59  ;;  %v1476_v59 = vld [vmem:[%s2199_s1 + $0xe0] sm:$0xf0] }
  0x41   :  { %636 = vmatmul.bf16.vlgmr.msrb.gmra.mxu1 %v1143_v4  ;;  %685 = vmatmul.bf16.vlgmr.msrb.gmra.mxu2 %v1147_v5  ;;  %v1247_v1 = vor.u32 %v1476_v59, %v1246_v58  ;;  %v1478_v4 = vld [vmem:[%s2199_s1 + $0xf4] sm:$0xf]  ;;  %v1260_v5 = vld [vmem:[%s2199_s1 + $0x104] sm:$0xf0] }
  0x42   :  { %v1263_v12 = vor.u32 %v1478_v4, %v1260_v5 }
  0x43   :  { %734 = vmatmul.bf16.vlgmr.msrb.gmra.mxu3 %v1151_v6  ;;  %1440 = vmatmul.msk.bf16.vlgmr.msrb.gmra.mxu0 %vm554_vm0, %v1155_v7  ;;  %v1266_v6 = vld [vmem:[%s2199_s1 + $0xf8] sm:$0xf]  ;;  %v1481_v7 = vld [vmem:[%s2199_s1 + $0x108] sm:$0xf0] }
  0x44   :  { %v1267_v13 = vor.u32 %v1481_v7, %v1266_v6 }
  0x51   :  { %641 = vmatmul.bf16.gmra.mxu1 %v1163_v16  ;;  %690 = vmatmul.bf16.gmra.mxu2 %v1167_v17  ;;  %v1275_v16 = vor.u32 %v1482_v11, %v1274_v10 }
  0x53   :  { %739 = vmatmul.bf16.gmra.mxu3 %v1171_v18  ;;  %1441 = vmatmul.msk.bf16.gmra.mxu0 %vm554_vm0, %v1175_v19 }
  0x61   :  { %646 = vmatmul.bf16.gmra.mxu1 %v1183_v28  ;;  %695 = vmatmul.bf16.gmra.mxu2 %v1187_v29  ;;  %v1294_v28 = vld [vmem:[%s2199_s1 + $0x128] sm:$0xf]  ;;  %v1487_v29 = vld [vmem:[%s2199_s1 + $0x138] sm:$0xf0] }
  0x62   :  { %v1295_v36 = vor.u32 %v1487_v29, %v1294_v28 }
  0x63   :  { %744 = vmatmul.bf16.gmra.mxu3 %v1191_v30  ;;  %1442 = vmatmul.msk.bf16.gmra.mxu0 %vm554_vm0, %v1195_v31 }
  0x71   :  { %651 = vmatmul.bf16.gmra.mxu1 %v1203_v40  ;;  %700 = vmatmul.bf16.gmra.mxu2 %v1207_v41 }
  0x73   :  { %749 = vmatmul.bf16.gmra.mxu3 %v1211_v42  ;;  %1443 = vmatmul.msk.bf16.gmra.mxu0 %vm554_vm0, %v1215_v43 }
  0x81   :  { %656 = vmatmul.bf16.gmra.mxu1 %v1223_v52  ;;  %705 = vmatmul.bf16.gmra.mxu2 %v1227_v53 }
  0x83   :  { %754 = vmatmul.bf16.gmra.mxu3 %v1231_v54  ;;  %1444 = vmatmul.msk.bf16.gmra.mxu0 %vm554_vm0, %v1235_v55 }
  0x91   :  { %661 = vmatmul.bf16.gmra.mxu1 %v1243_v0  ;;  %710 = vmatmul.bf16.gmra.mxu2 %v1247_v1 }
  0x93   :  { %759 = vmatmul.bf16.gmra.mxu3 %v1251_v2  ;;  %1445 = vmatmul.msk.bf16.gmra.mxu0 %vm554_vm0, %v1255_v3 }
  0x9e   :  { %v1963_v14 = vpop.f32.mrf.mxu1 }
  0xa0   :  { %v588_v17 = vpop.f32.mrf.mxu0 }
  0xa1   :  { %666 = vmatmul.bf16.gmra.mxu1 %v1263_v12  ;;  %715 = vmatmul.bf16.gmra.mxu2 %v1267_v13 }
  0xa3   :  { %764 = vmatmul.bf16.gmra.mxu3 %v1271_v15  ;;  %1446 = vmatmul.msk.bf16.gmra.mxu0 %vm554_vm0, %v1275_v16 }
  0xa4   :  { %v1966_v18 = vpop.f32.mrf.mxu2 }
  0xa6   :  { %v1968_v19 = vpop.f32.mrf.mxu3  ;;  %v1970_v20 = vpop.f32.mrf.mxu1 }
  0xa8   :  { %v590_v21 = vpop.f32.mrf.mxu0 }
  0xac   :  { %v1996_v30 = vpop.f32.mrf.mxu2 }
  0xae   :  { %v1998_v31 = vpop.f32.mrf.mxu3  ;;  %v2000_v34 = vpop.f32.mrf.mxu1 }
  0xb0   :  { %v593_v37 = vpop.f32.mrf.mxu0 }
  0xb1   :  { %671 = vmatmul.bf16.gmra.mxu1 %v1283_v32  ;;  %720 = vmatmul.bf16.gmra.mxu2 %v1287_v33 }
  0xb3   :  { %769 = vmatmul.bf16.gmra.mxu3 %v1291_v35  ;;  %1447 = vmatmul.msk.bf16.gmra.mxu0 %vm554_vm0, %v1295_v36 }
  0xb4   :  { %v2003_v38 = vpop.f32.mrf.mxu2 }
  0xb6   :  { %v2005_v39 = vpop.f32.mrf.mxu3  ;;  %v2007_v40 = vpop.f32.mrf.mxu1 }
  0xb8   :  { %v595_v41 = vpop.f32.mrf.mxu0 }
  0xbc   :  { %v2009_v42 = vpop.f32.mrf.mxu2 }
  0xbe   :  { %v2011_v43 = vpop.f32.mrf.mxu3  ;;  %v637_v44 = vpop.f32.mrf.mxu1 }
  0xbf   :  { %v638_v46 = vadd.f32 %v637_v44, %v588_v17 }
  0xc0   :  { %v784_v45 = vpop.f32.mrf.mxu0 }
  0xc4   :  { %v686_v47 = vpop.f32.mrf.mxu2 }
  0xc5   :  { %v687_v48 = vadd.f32 %v686_v47, %v638_v46 }
  0xc6   :  { %v735_v49 = vpop.f32.mrf.mxu3  ;;  %v639_v50 = vpop.f32.mrf.mxu1 }
  0xc7   :  { %v736_v51 = vadd.f32 %v735_v49, %v687_v48  ;;  %v640_v54 = vadd.f32 %v639_v50, %v590_v21 }
  0xc8   :  { %v786_v52 = vpop.f32.mrf.mxu0 }
  0xc9   :  { %v2013_v53 = vadd.f32 %v784_v45, %v736_v51 }
  0xcb   :  { %824 = vadd.xlane.f32.xlu0 %v2013_v53  ;;  %v856_v62 = vmul.f32 %v2013_v53, %v2013_v53 }
  0xcc   :  { %v688_v55 = vpop.f32.mrf.mxu2 }
  0xcd   :  { %v689_v56 = vadd.f32 %v688_v55, %v640_v54 }
  0xce   :  { %v737_v57 = vpop.f32.mrf.mxu3  ;;  %v642_v58 = vpop.f32.mrf.mxu1 }
  0xcf   :  { %v738_v59 = vadd.f32 %v737_v57, %v689_v56  ;;  %v643_v63 = vadd.f32 %v642_v58, %v593_v37 }
  0xd0   :  { %v789_v60 = vpop.f32.mrf.mxu0 }
  0xd1   :  { %v2016_v61 = vadd.f32 %v786_v52, %v738_v59 }
  0xd3   :  { %872 = vadd.xlane.f32.xlu0 %v856_v62  ;;  %v857_v0 = vmul.f32 %v2016_v61, %v2016_v61 }
  0xd4   :  { %v691_v1 = vpop.f32.mrf.mxu2 }
  0xd5   :  { %v692_v2 = vadd.f32 %v691_v1, %v643_v63  ;;  %874 = vadd.xlane.f32.xlu1 %v857_v0 }
  0xd6   :  { %v740_v3 = vpop.f32.mrf.mxu3  ;;  %v644_v4 = vpop.f32.mrf.mxu1 }
  0xd7   :  { %v741_v5 = vadd.f32 %v740_v3, %v692_v2  ;;  %v645_v8 = vadd.f32 %v644_v4, %v595_v41 }
  0xd8   :  { %v791_v6 = vpop.f32.mrf.mxu0 }
  0xd9   :  { %v2022_v7 = vadd.f32 %v789_v60, %v741_v5 }
  0xdb   :  { %826 = vadd.xlane.f32.xlu0 %v2016_v61  ;;  %v858_v9 = vmul.f32 %v2022_v7, %v2022_v7 }
  0xdc   :  { %v693_v10 = vpop.f32.mrf.mxu2 }
  0xdd   :  { %v694_v11 = vadd.f32 %v693_v10, %v645_v8  ;;  %876 = vadd.xlane.f32.xlu2 %v858_v9  ;;  %828 = vadd.xlane.f32.xlu1 %v2022_v7 }
  0xde   :  { %v742_v12 = vpop.f32.mrf.mxu3  ;;  %v647_v13 = vpop.f32.mrf.mxu1 }
  0xdf   :  { %v743_v15 = vadd.f32 %v742_v12, %v694_v11  ;;  %v648_v21 = vadd.f32 %v647_v13, %v1963_v14 }
  0xe0   :  { %v794_v16 = vpop.f32.mrf.mxu0 }
  0xe1   :  { %v2028_v17 = vadd.f32 %v791_v6, %v743_v15 }
  0xe3   :  { %v859_v22 = vmul.f32 %v2028_v17, %v2028_v17 }
  0xe4   :  { %v696_v23 = vpop.f32.mrf.mxu2 }
  0xe5   :  { %v697_v24 = vadd.f32 %v696_v23, %v648_v21  ;;  %830 = vadd.xlane.f32.xlu1 %v2028_v17  ;;  %878 = vadd.xlane.f32.xlu0 %v859_v22 }
  0xe6   :  { %v745_v25 = vpop.f32.mrf.mxu3  ;;  %v649_v26 = vpop.f32.mrf.mxu1 }
  0xe7   :  { %v746_v27 = vadd.f32 %v745_v25, %v697_v24  ;;  %v650_v32 = vadd.f32 %v649_v26, %v1970_v20 }
  0xe8   :  { %v796_v28 = vpop.f32.mrf.mxu0 }
  0xe9   :  { %v2034_v29 = vadd.f32 %v794_v16, %v746_v27 }
  0xeb   :  { %832 = vadd.xlane.f32.xlu2 %v2034_v29  ;;  %v860_v14 = vmul.f32 %v2034_v29, %v2034_v29 }
  0xec   :  { %v698_v33 = vpop.f32.mrf.mxu2 }
  0xed   :  { %v699_v35 = vadd.f32 %v698_v33, %v650_v32  ;;  %880 = vadd.xlane.f32.xlu1 %v860_v14 }
  0xee   :  { %v747_v36 = vpop.f32.mrf.mxu3  ;;  %v652_v37 = vpop.f32.mrf.mxu1 }
  0xef   :  { %v748_v41 = vadd.f32 %v747_v36, %v699_v35  ;;  %v653_v46 = vadd.f32 %v652_v37, %v2000_v34 }
  0xf0   :  { %v799_v44 = vpop.f32.mrf.mxu0 }
  0xf1   :  { %v2040_v45 = vadd.f32 %v796_v28, %v748_v41 }
  0xf3   :  { %834 = vadd.xlane.f32.xlu2 %v2040_v45  ;;  %v861_v54 = vmul.f32 %v2040_v45, %v2040_v45 }
  0xf4   :  { %v701_v47 = vpop.f32.mrf.mxu2 }
  0xf5   :  { %v702_v20 = vadd.f32 %v701_v47, %v653_v46 }
  0xf6   :  { %v750_v48 = vpop.f32.mrf.mxu3  ;;  %v654_v49 = vpop.f32.mrf.mxu1 }
  0xf7   :  { %v751_v50 = vadd.f32 %v750_v48, %v702_v20  ;;  %v655_v55 = vadd.f32 %v654_v49, %v2007_v40 }
  0xf8   :  { %v801_v51 = vpop.f32.mrf.mxu0 }
  0xf9   :  { %v2044_v52 = vadd.f32 %v799_v44, %v751_v50 }
  0xfb   :  { %882 = vadd.xlane.f32.xlu2 %v861_v54  ;;  %836 = vadd.xlane.f32.xlu0 %v2044_v52  ;;  %v862_v63 = vmul.f32 %v2044_v52, %v2044_v52 }
  0xfc   :  { %v703_v56 = vpop.f32.mrf.mxu2 }
  0xfd   :  { %v704_v34 = vadd.f32 %v703_v56, %v655_v55 }
  0xfe   :  { %v752_v57 = vpop.f32.mrf.mxu3  ;;  %v657_v58 = vpop.f32.mrf.mxu1 }
  0xff   :  { %v753_v59 = vadd.f32 %v752_v57, %v704_v34  ;;  %v658_v0 = vadd.f32 %v657_v58, %v1966_v18 }
 0x100   :  { %v804_v60 = vpop.f32.mrf.mxu0 }
 0x101   :  { %v2050_v62 = vadd.f32 %v801_v51, %v753_v59 }
 0x103   :  { %838 = vadd.xlane.f32.xlu1 %v2050_v62  ;;  %884 = vadd.xlane.f32.xlu0 %v862_v63  ;;  %v863_v8 = vmul.f32 %v2050_v62, %v2050_v62 }
 0x104   :  { %v706_v40 = vpop.f32.mrf.mxu2 }
 0x105   :  { %v707_v1 = vadd.f32 %v706_v40, %v658_v0 }
 0x106   :  { %v755_v2 = vpop.f32.mrf.mxu3  ;;  %v659_v3 = vpop.f32.mrf.mxu1 }
 0x107   :  { %v756_v4 = vadd.f32 %v755_v2, %v707_v1  ;;  %v660_v9 = vadd.f32 %v659_v3, %v1996_v30 }
 0x108   :  { %v806_v5 = vpop.f32.mrf.mxu0 }
 0x109   :  { %v2056_v6 = vadd.f32 %v804_v60, %v756_v4 }
 0x10b   :  { %840 = vadd.xlane.f32.xlu2 %v2056_v6  ;;  %886 = vadd.xlane.f32.xlu1 %v863_v8  ;;  %v864_v18 = vmul.f32 %v2056_v6, %v2056_v6 }
 0x10c   :  { %v708_v10 = vpop.f32.mrf.mxu2 }
 0x10d   :  { %v709_v11 = vadd.f32 %v708_v10, %v660_v9  ;;  %888 = vadd.xlane.f32.xlu0 %v864_v18 }
 0x10e   :  { %v757_v12 = vpop.f32.mrf.mxu3  ;;  %v662_v13 = vpop.f32.mrf.mxu1 }
 0x10f   :  { %v758_v15 = vadd.f32 %v757_v12, %v709_v11  ;;  %v663_v22 = vadd.f32 %v662_v13, %v2003_v38 }
 0x110   :  { %v809_v16 = vpop.f32.mrf.mxu0 }
 0x111   :  { %v2064_v21 = vadd.f32 %v806_v5, %v758_v15 }
 0x113   :  { %v865_v30 = vmul.f32 %v2064_v21, %v2064_v21 }
 0x114   :  { %v711_v23 = vpop.f32.mrf.mxu2 }
 0x115   :  { %v712_v24 = vadd.f32 %v711_v23, %v663_v22  ;;  %890 = vadd.xlane.f32.xlu1 %v865_v30  ;;  %842 = vadd.xlane.f32.xlu0 %v2064_v21 }
 0x116   :  { %v760_v25 = vpop.f32.mrf.mxu3  ;;  %v664_v26 = vpop.f32.mrf.mxu1 }
 0x117   :  { %v761_v27 = vadd.f32 %v760_v25, %v712_v24  ;;  %v665_v14 = vadd.f32 %v664_v26, %v2009_v42 }
 0x118   :  { %v811_v28 = vpop.f32.mrf.mxu0 }
 0x119   :  { %v2070_v32 = vadd.f32 %v809_v16, %v761_v27 }
 0x11b   :  { %v866_v33 = vmul.f32 %v2070_v32, %v2070_v32 }
 0x11c   :  { %v713_v38 = vpop.f32.mrf.mxu2 }
 0x11d   :  { %v714_v35 = vadd.f32 %v713_v38, %v665_v14  ;;  %892 = vadd.xlane.f32.xlu2 %v866_v33  ;;  %844 = vadd.xlane.f32.xlu1 %v2070_v32 }
 0x11e   :  { %v762_v36 = vpop.f32.mrf.mxu3  ;;  %v667_v37 = vpop.f32.mrf.mxu1 }
 0x11f   :  { %v763_v41 = vadd.f32 %v762_v36, %v714_v35  ;;  %v668_v47 = vadd.f32 %v667_v37, %v1968_v19 }
 0x120   :  { %v814_v46 = vpop.f32.mrf.mxu0 }
 0x121   :  { %v2076_v44 = vadd.f32 %v811_v28, %v763_v41 }
 0x123   :  { %v867_v20 = vmul.f32 %v2076_v44, %v2076_v44 }
 0x124   :  { %v716_v42 = vpop.f32.mrf.mxu2 }
 0x125   :  { %v717_v48 = vadd.f32 %v716_v42, %v668_v47  ;;  %846 = vadd.xlane.f32.xlu2 %v2076_v44  ;;  %894 = vadd.xlane.f32.xlu0 %v867_v20 }
 0x126   :  { %v765_v49 = vpop.f32.mrf.mxu3  ;;  %v669_v50 = vpop.f32.mrf.mxu1 }
 0x127   :  { %v766_v51 = vadd.f32 %v765_v49, %v717_v48  ;;  %v670_v55 = vadd.f32 %v669_v50, %v1998_v31 }
 0x128   :  { %v816_v34 = vpop.f32.mrf.mxu0 }
 0x129   :  { %v2082_v54 = vadd.f32 %v814_v46, %v766_v51 }
 0x12b   :  { %v868_v56 = vmul.f32 %v2082_v54, %v2082_v54 }
 0x12c   :  { %v718_v19 = vpop.f32.mrf.mxu2 }
 0x12d   :  { %v719_v57 = vadd.f32 %v718_v19, %v670_v55  ;;  %848 = vadd.xlane.f32.xlu2 %v2082_v54  ;;  %896 = vadd.xlane.f32.xlu1 %v868_v56 }
 0x12e   :  { %v767_v58 = vpop.f32.mrf.mxu3  ;;  %v672_v59 = vpop.f32.mrf.mxu1 }
 0x12f   :  { %v768_v60 = vadd.f32 %v767_v58, %v719_v57  ;;  %v673_v0 = vadd.f32 %v672_v59, %v2005_v39 }
 0x130   :  { %v819_v2 = vpop.f32.mrf.mxu0 }
 0x131   :  { %v2088_v63 = vadd.f32 %v816_v34, %v768_v60 }
 0x133   :  { %850 = vadd.xlane.f32.xlu0 %v2088_v63 }
 0x134   :  { %v721_v40 = vpop.f32.mrf.mxu2 }
 0x135   :  { %v722_v31 = vadd.f32 %v721_v40, %v673_v0  ;;  %v1607_v0 = vmov 0  }
 0x136   :  { %v770_v1 = vpop.f32.mrf.mxu3  ;;  %v674_v4 = vpop.f32.mrf.mxu1  ;;  %1596 = vset.pattern.permute.xlu2 %v1607_v0  ;;  %1597 = vset.pattern.permute.xlu0 %v1607_v0 }
 0x137   :  { %v771_v3 = vadd.f32 %v770_v1, %v722_v31  ;;  %v675_v8 = vadd.f32 %v674_v4, %v2011_v43  ;;  %v869_v43 = vmul.f32 %v2088_v63, %v2088_v63  ;;  %1598 = vset.pattern.permute.xlu1 %v1607_v0 }
 0x138   :  { %v821_v12 = vpop.f32.mrf.mxu0 }
 0x139   :  { %v2092_v5 = vadd.f32 %v819_v2, %v771_v3 }
 0x13b   :  { %852 = vadd.xlane.f32.xlu1 %v2092_v5  ;;  %v870_v9 = vmul.f32 %v2092_v5, %v2092_v5 }
 0x13c   :  { %v723_v18 = vpop.f32.mrf.mxu2 }
 0x13d   :  { %v724_v10 = vadd.f32 %v723_v18, %v675_v8  ;;  %900 = vadd.xlane.f32.xlu0 %v870_v9 }
 0x13e   :  { %v772_v39 = vpop.f32.mrf.mxu3  ;;  %v825_v22 = vpop.xlane.xlu0 %824 }
 0x13f   :  { %v773_v11 = vadd.f32 %v772_v39, %v724_v10 }
 0x141   :  { %v2098_v13 = vadd.f32 %v821_v12, %v773_v11 }
 0x143   :  { %854 = vadd.xlane.f32.xlu2 %v2098_v13  ;;  %v871_v15 = vmul.f32 %v2098_v13, %v2098_v13 }
 0x145   :  { %902 = vadd.xlane.f32.xlu1 %v871_v15 }
 0x146   :  { %v873_v23 = vpop.xlane.xlu0 %872 }
 0x148   :  { %v2105_v16 = vpop.xlane.xlu1 %874 }
 0x14b   :  { %898 = vadd.xlane.f32.xlu2 %v869_v43 }
 0x14e   :  { %v827_v26 = vpop.xlane.xlu0 %826 }
 0x150   :  { %v829_v30 = vpop.xlane.xlu1 %828  ;;  %v877_v24 = vpop.xlane.xlu2 %876 }
 0x158   :  { %v831_v25 = vpop.xlane.xlu1 %830  ;;  %v879_v28 = vpop.xlane.xlu0 %878 }
 0x15e   :  { %v833_v27 = vpop.xlane.xlu2 %832 }
 0x15f   :  { %v904_v51 = vadd.f32 %v833_v27, %v825_v22 }
 0x160   :  { %v881_v14 = vpop.xlane.xlu1 %880 }
 0x161   :  { %v908_v55 = vadd.f32 %v881_v14, %v873_v23 }
 0x166   :  { %v835_v33 = vpop.xlane.xlu2 %834 }
 0x16e   :  { %v837_v38 = vpop.xlane.xlu0 %836  ;;  %v2107_v36 = vpop.xlane.xlu2 %882 }
 0x16f   :  { %v906_v8 = vadd.f32 %v837_v38, %v829_v30 }
 0x176   :  { %v839_v35 = vpop.xlane.xlu1 %838  ;;  %v885_v37 = vpop.xlane.xlu0 %884 }
 0x177   :  { %v910_v18 = vadd.f32 %v885_v37, %v877_v24  ;;  %v907_v27 = vadd.f32 %v839_v35, %v831_v25 }
 0x17e   :  { %v887_v41 = vpop.xlane.xlu1 %886  ;;  %v841_v46 = vpop.xlane.xlu2 %840 }
 0x17f   :  { %v912_v56 = vadd.f32 %v904_v51, %v841_v46  ;;  %v905_v51 = vadd.f32 %v835_v33, %v827_v26  ;;  %v911_v30 = vadd.f32 %v887_v41, %v879_v28  ;;  %v909_v26 = vadd.f32 %v2107_v36, %v2105_v16  ;;  %v928_v41 = vld [vmem:[%s2200_s2] sm:$0xff] }
 0x180   :  { %v889_v47 = vpop.xlane.xlu0 %888 }
 0x181   :  { %v916_v34 = vadd.f32 %v908_v55, %v889_v47 }
 0x188   :  { %v2109_v20 = vpop.xlane.xlu1 %890  ;;  %v843_v48 = vpop.xlane.xlu0 %842 }
 0x189   :  { %v913_v55 = vadd.f32 %v905_v51, %v843_v48 }
 0x190   :  { %v893_v42 = vpop.xlane.xlu2 %892  ;;  %v845_v49 = vpop.xlane.xlu1 %844 }
 0x191   :  { %v914_v10 = vadd.f32 %v906_v8, %v845_v49  ;;  %v918_v11 = vadd.f32 %v910_v18, %v893_v42 }
 0x198   :  { %v847_v50 = vpop.xlane.xlu2 %846  ;;  %v895_v19 = vpop.xlane.xlu0 %894 }
 0x199   :  { %v915_v38 = vadd.f32 %v907_v27, %v847_v50  ;;  %v919_v42 = vadd.f32 %v911_v30, %v895_v19  ;;  %v917_v50 = vadd.f32 %v909_v26, %v2109_v20 }
 0x1a0   :  { %v849_v57 = vpop.xlane.xlu2 %848  ;;  %v897_v58 = vpop.xlane.xlu1 %896 }
 0x1a1   :  { %v920_v59 = vadd.f32 %v912_v56, %v849_v57  ;;  %v924_v60 = vadd.f32 %v916_v34, %v897_v58 }
 0x1a3   :  { %v2111_v40 = vmul.f32 0.001953125, %v920_v59  ;;  %v940_v1 = vmul.f32 0.001953125, %v924_v60 }
 0x1a5   :  { %v944_v31 = vmul.f32 %v2111_v40, %v2111_v40 }
 0x1a6   :  { %v851_v3 = vpop.xlane.xlu0 %850 }
 0x1a7   :  { %v948_v2 = vsub.f32 %v940_v1, %v944_v31  ;;  %v921_v59 = vadd.f32 %v913_v55, %v851_v3 }
 0x1a9   :  { %v952_v4 = vmax.f32 %v948_v2, 0.0  ;;  %v2129_v19 = vmul.f32 0.001953125, %v921_v59 }
 0x1ab   :  { %v956_v9 = vadd.f32 1e-05, %v952_v4  ;;  %v945_v8 = vmul.f32 %v2129_v19, %v2129_v19 }
 0x1ad   :  { %1599 = vrsqrt.f32 %v956_v9  ;;  %vm966_vm2 = vweird.f32 %v956_v9 }
 0x1ae   :  { %v853_v39 = vpop.xlane.xlu1 %852 }
 0x1af   :  { %v922_v12 = vadd.f32 %v914_v10, %v853_v39 }
 0x1b0   :  { %v901_v15 = vpop.xlane.xlu0 %900 }
 0x1b1   :  { %v2115_v43 = vmul.f32 0.001953125, %v922_v12  ;;  %v926_v22 = vadd.f32 %v918_v11, %v901_v15  ;;  %v932_v12 = vld [vmem:[%s2201_s3] sm:$0xff] }
 0x1b3   :  { %v1600_v23 = vpop.eup %1599  ;;  %v946_v14 = vmul.f32 %v2115_v43, %v2115_v43  ;;  %v942_v46 = vmul.f32 0.001953125, %v926_v22 }
 0x1b4   :  { %v961_v47 = vmul.f32 %v1600_v23, %v956_v9  ;;  %vm967_vm1 = vweird.f32 %v1600_v23 }
 0x1b5   :  { %v950_v24 = vsub.f32 %v942_v46, %v946_v14  ;;  %vm968_vm3 = vmor %vm966_vm2, %vm967_vm1 }
 0x1b6   :  { %v962_v37 = vmul.f32 %v1600_v23, %v961_v47  ;;  %v855_v49 = vpop.xlane.xlu2 %854 }
 0x1b7   :  { %v954_v56 = vmax.f32 %v950_v24, 0.0  ;;  %v923_v34 = vadd.f32 %v915_v38, %v855_v49 }
 0x1b8   :  { %v963_v57 = vmul.f32 0.5, %v962_v37  ;;  %v903_v58 = vpop.xlane.xlu1 %902 }
 0x1b9   :  { %v958_v60 = vadd.f32 1e-05, %v954_v56  ;;  %v2119_v25 = vmul.f32 0.001953125, %v923_v34  ;;  %v927_v35 = vadd.f32 %v919_v42, %v903_v58 }
 0x1ba   :  { %v964_v0 = vsub.f32 1.5, %v963_v57  ;;  %v931_v57 = vld [vmem:[%s2200_s2 + $0x18] sm:$0xff] }
 0x1bb   :  { %1601 = vrsqrt.f32 %v958_v60  ;;  %v947_v28 = vmul.f32 %v2119_v25, %v2119_v25  ;;  %v943_v33 = vmul.f32 0.001953125, %v927_v35  ;;  %vm986_vm5 = vweird.f32 %v958_v60 }
 0x1bc   :  { %v965_v48 = vmul.f32 %v1600_v23, %v964_v0 }
 0x1bd   :  { %v951_v31 = vsub.f32 %v943_v33, %v947_v28  ;;  %v934_v33 = vld [vmem:[%s2201_s3 + $0x10] sm:$0xff] }
 0x1be   :  { %v899_v1 = vpop.xlane.xlu2 %898  ;;  %v969_v2 = vsel %vm968_vm3, %v1600_v23, %v965_v48  ;;  %v933_v48 = vld [vmem:[%s2201_s3 + $0x8] sm:$0xff] }
 0x1bf   :  { %v955_v16 = vmax.f32 %v951_v31, 0.0  ;;  %v925_v36 = vadd.f32 %v917_v50, %v899_v1  ;;  %v1000_v3 = vmul.f32 %v969_v2, %v928_v41 }
 0x1c1   :  { %v1602_v4 = vpop.eup %1601  ;;  %v959_v18 = vadd.f32 1e-05, %v955_v16  ;;  %v941_v10 = vmul.f32 0.001953125, %v925_v36  ;;  %1014 = vperm.xlu2 %1596, %v1000_v3   ;;  %v1004_v20 = vmul.f32 %v1000_v3, %v2111_v40  ;;  %v930_v40 = vld [vmem:[%s2200_s2 + $0x10] sm:$0xff]  ;;  %v935_v16 = vld [vmem:[%s2201_s3 + $0x18] sm:$0xff] }
 0x1c2   :  { %v981_v39 = vmul.f32 %v1602_v4, %v958_v60  ;;  %vm987_vm4 = vweird.f32 %v1602_v4 }
 0x1c3   :  { %1603 = vrsqrt.f32 %v959_v18  ;;  %v949_v9 = vsub.f32 %v941_v10, %v945_v8  ;;  %v1008_v27 = vsub.f32 %v932_v12, %v1004_v20  ;;  %vm988_vm6 = vmor %vm986_vm5, %vm987_vm4  ;;  %vm996_vm8 = vweird.f32 %v959_v18 }
 0x1c4   :  { %v982_v11 = vmul.f32 %v1602_v4, %v981_v39 }
 0x1c5   :  { %v953_v15 = vmax.f32 %v949_v9, 0.0 }
 0x1c6   :  { %v983_v22 = vmul.f32 0.5, %v982_v11 }
 0x1c7   :  { %v957_v23 = vadd.f32 1e-05, %v953_v15 }
 0x1c8   :  { %v984_v14 = vsub.f32 1.5, %v983_v22 }
 0x1c9   :  { %v1604_v46 = vpop.eup %1603  ;;  %1605 = vrsqrt.f32 %v957_v23  ;;  %1050 = vperm.xlu2 %1596, %v1008_v27   ;;  %vm976_vm11 = vweird.f32 %v957_v23 }
 0x1ca   :  { %v991_v47 = vmul.f32 %v1604_v46, %v959_v18  ;;  %v985_v51 = vmul.f32 %v1602_v4, %v984_v14  ;;  %vm997_vm7 = vweird.f32 %v1604_v46 }
 0x1cb   :  { %vm998_vm9 = vmor %vm996_vm8, %vm997_vm7 }
 0x1cc   :  { %v992_v30 = vmul.f32 %v1604_v46, %v991_v47  ;;  %v989_v38 = vsel %vm988_vm6, %v1602_v4, %v985_v51 }
 0x1cd   :  { %v1002_v24 = vmul.f32 %v989_v38, %v930_v40 }
 0x1ce   :  { %v993_v37 = vmul.f32 0.5, %v992_v30 }
 0x1cf   :  { %v1606_v49 = vpop.eup %1605  ;;  %v1006_v55 = vmul.f32 %v1002_v24, %v2115_v43  ;;  %v929_v43 = vld [vmem:[%s2200_s2 + $0x8] sm:$0xff] }
 0x1d0   :  { %v971_v42 = vmul.f32 %v1606_v49, %v957_v23  ;;  %v994_v56 = vsub.f32 1.5, %v993_v37  ;;  %vm977_vm10 = vweird.f32 %v1606_v49 }
 0x1d1   :  { %vm978_vm12 = vmor %vm976_vm11, %vm977_vm10  ;;  %v1010_v50 = vsub.f32 %v934_v33, %v1006_v55 }
 0x1d2   :  { %v972_v34 = vmul.f32 %v1606_v49, %v971_v42  ;;  %v995_v58 = vmul.f32 %v1604_v46, %v994_v56 }
 0x1d4   :  { %v973_v59 = vmul.f32 0.5, %v972_v34  ;;  %v999_v60 = vsel %vm998_vm9, %v1604_v46, %v995_v58 }
 0x1d5   :  { %v1003_v35 = vmul.f32 %v999_v60, %v931_v57 }
 0x1d6   :  { %v974_v0 = vsub.f32 1.5, %v973_v59 }
 0x1d7   :  { %1029 = vperm.xlu2 %1596, %v1003_v35   ;;  %v1007_v2 = vmul.f32 %v1003_v35, %v2119_v25 }
 0x1d8   :  { %v975_v26 = vmul.f32 %v1606_v49, %v974_v0 }
 0x1d9   :  { %v1011_v36 = vsub.f32 %v935_v16, %v1007_v2 }
 0x1da   :  { %v979_v28 = vsel %vm978_vm12, %v1606_v49, %v975_v26 }
 0x1db   :  { %v1001_v41 = vmul.f32 %v979_v28, %v929_v43 }
 0x1dd   :  { %1019 = vperm.xlu0 %1597, %v1001_v41   ;;  %v1005_v31 = vmul.f32 %v1001_v41, %v2129_v19 }
 0x1df   :  { %1060 = vperm.xlu2 %1596, %v1010_v50   ;;  %v1009_v1 = vsub.f32 %v933_v48, %v1005_v31 }
 0x1e1   :  { %1055 = vperm.xlu1 %1598, %v1009_v1  }
 0x1e9   :  { %1024 = vperm.xlu1 %1598, %v1002_v24  }
 0x1f1   :  { %1065 = vperm.xlu1 %1598, %v1011_v36  }
 0x21b   :  { %v1015_v3 = vpop.permute.xlu2 %1014 }
 0x21c   :  { %v1032_v8 = vmul.f32 %v1015_v3, %v2013_v53  ;;  %v1036_v18 = vmul.f32 %v1015_v3, %v2034_v29  ;;  %v1040_v19 = vmul.f32 %v1015_v3, %v2056_v6  ;;  %v1044_v39 = vmul.f32 %v1015_v3, %v2082_v54 }
 0x223   :  { %v1051_v4 = vpop.permute.xlu2 %1050 }
 0x224   :  { %v1068_v9 = vadd.f32 %v1051_v4, %v1032_v8  ;;  %v1072_v20 = vadd.f32 %v1051_v4, %v1036_v18  ;;  %v1076_v25 = vadd.f32 %v1051_v4, %v1040_v19  ;;  %v1080_v23 = vadd.f32 %v1051_v4, %v1044_v39 }
 0x226   :  { %v1084_v46 = vmax.f32 %v1068_v9, 0.0  ;;  %v1088_v47 = vmax.f32 %v1072_v20, 0.0  ;;  %v1092_v54 = vmax.f32 %v1076_v25, 0.0  ;;  %v1096_v24 = vmax.f32 %v1080_v23, 0.0 }
 0x231   :  { %v1030_v40 = vpop.permute.xlu2 %1029 }
 0x232   :  { %v1035_v35 = vmul.f32 %v1030_v40, %v2028_v17  ;;  %v1039_v0 = vmul.f32 %v1030_v40, %v2050_v62  ;;  %v1043_v43 = vmul.f32 %v1030_v40, %v2076_v44  ;;  %v1047_v26 = vmul.f32 %v1030_v40, %v2098_v13 }
 0x239   :  { %v1061_v57 = vpop.permute.xlu2 %1060 }
 0x24f   :  { %v1020_v10 = vpop.permute.xlu0 %1019 }
 0x250   :  { %v1033_v11 = vmul.f32 %v1020_v10, %v2016_v61  ;;  %v1037_v12 = vmul.f32 %v1020_v10, %v2040_v45  ;;  %v1041_v15 = vmul.f32 %v1020_v10, %v2064_v21  ;;  %v1045_v22 = vmul.f32 %v1020_v10, %v2088_v63 }
 0x253   :  { %v1056_v53 = vpop.permute.xlu1 %1055 }
 0x254   :  { %v1069_v27 = vadd.f32 %v1056_v53, %v1033_v11  ;;  %v1073_v29 = vadd.f32 %v1056_v53, %v1037_v12  ;;  %v1077_v14 = vadd.f32 %v1056_v53, %v1041_v15  ;;  %v1081_v6 = vadd.f32 %v1056_v53, %v1045_v22 }
 0x256   :  { %v1085_v51 = vmax.f32 %v1069_v27, 0.0  ;;  %v1089_v30 = vmax.f32 %v1073_v29, 0.0  ;;  %v1093_v38 = vmax.f32 %v1077_v14, 0.0  ;;  %v1097_v61 = vmax.f32 %v1081_v6, 0.0 }
 0x258   :  { %v1527_v45 = vpack.c.bf16 %v1085_v51, %v1084_v46  ;;  %v1537_v37 = vpack.c.bf16 %v1089_v30, %v1088_v47  ;;  %v1547_v21 = vpack.c.bf16 %v1093_v38, %v1092_v54  ;;  %v1557_v49 = vpack.c.bf16 %v1097_v61, %v1096_v24 }
 0x25a   :  { %1528 = vst [vmem:[%s2202_s4] sm:$0xff] %v1527_v45  }
 0x25b   :  { %1565 = vst [vmem:[%s2202_s4 + $0x10] sm:$0xff] %v1537_v37   ;;  %v1025_v63 = vpop.permute.xlu1 %1024 }
 0x25c   :  { %1567 = vst [vmem:[%s2202_s4 + $0x20] sm:$0xff] %v1547_v21   ;;  %v1034_v55 = vmul.f32 %v1025_v63, %v2022_v7  ;;  %v1038_v42 = vmul.f32 %v1025_v63, %v2044_v52  ;;  %v1042_v56 = vmul.f32 %v1025_v63, %v2070_v32  ;;  %v1046_v34 = vmul.f32 %v1025_v63, %v2092_v5 }
 0x25d   :  { %1569 = vst [vmem:[%s2202_s4 + $0x30] sm:$0xff] %v1557_v49  }
 0x25e   :  { %v1070_v58 = vadd.f32 %v1061_v57, %v1034_v55  ;;  %v1074_v59 = vadd.f32 %v1061_v57, %v1038_v42  ;;  %v1078_v60 = vadd.f32 %v1061_v57, %v1042_v56  ;;  %v1082_v28 = vadd.f32 %v1061_v57, %v1046_v34 }
 0x260   :  { %v1086_v48 = vmax.f32 %v1070_v58, 0.0  ;;  %v1090_v5 = vmax.f32 %v1074_v59, 0.0  ;;  %v1094_v50 = vmax.f32 %v1078_v60, 0.0  ;;  %v1098_v17 = vmax.f32 %v1082_v28, 0.0 }
 0x263   :  { %v1066_v7 = vpop.permute.xlu1 %1065 }
 0x264   :  { %v1071_v33 = vadd.f32 %v1066_v7, %v1035_v35  ;;  %v1075_v52 = vadd.f32 %v1066_v7, %v1039_v0  ;;  %v1079_v41 = vadd.f32 %v1066_v7, %v1043_v43  ;;  %v1083_v32 = vadd.f32 %v1066_v7, %v1047_v26 }
 0x266   :  { %v1087_v31 = vmax.f32 %v1071_v33, 0.0  ;;  %v1091_v1 = vmax.f32 %v1075_v52, 0.0  ;;  %v1095_v2 = vmax.f32 %v1079_v41, 0.0  ;;  %v1099_v16 = vmax.f32 %v1083_v32, 0.0 }
 0x268   :  { %v1532_v36 = vpack.c.bf16 %v1087_v31, %v1086_v48  ;;  %v1542_v62 = vpack.c.bf16 %v1091_v1, %v1090_v5  ;;  %v1552_v3 = vpack.c.bf16 %v1095_v2, %v1094_v50  ;;  %v1562_v44 = vpack.c.bf16 %v1099_v16, %v1098_v17 }
 0x26a   :  { %1564 = vst [vmem:[%s2202_s4 + $0x8] sm:$0xff] %v1532_v36  }
 0x26b   :  { %1566 = vst [vmem:[%s2202_s4 + $0x18] sm:$0xff] %v1542_v62  }
 0x26c   :  { %1568 = vst [vmem:[%s2202_s4 + $0x28] sm:$0xff] %v1552_v3  }
 0x26d   :  { %1570 = vst [vmem:[%s2202_s4 + $0x38] sm:$0xff] %v1562_v44  }

// kernel: gskip_forward.7
= control target key start
LH: loop header
LB: loop body
LE: loop exit
PB: predicated region body
PF: predicated region fallthrough
CT: control target
= control target key end

     0   :  { %s1022_s9 = smov 0   ;;  %s1024_s10 = smov 0   ;;  %s1260_s0 = inlined_call_operand.vmem [shape: bf16[288,512], index: 0, kind: input, shape index: {}]   ;;  %s1261_s1 = inlined_call_operand.vmem [shape: bf16[12,288], index: 1, kind: input, shape index: {}]   ;;  %s1262_s2 = inlined_call_operand.vmem [shape: f32[12,512], index: 2, kind: output, shape index: {}]  }
   0x1   :  { %s1026_s11 = smov 0  }
   0x2 LB: > { %s737_s12 = sadd.s32 4294967295, %s1005_s11   ;;  %s1039_s13 = sadd.s32 1, %s1005_s11   ;;  %s1005_s11 = sphi %s1026_s11, %s1266_s11   ;;  %s1001_s10 = sphi %s1024_s10, %s1265_s10   ;;  %s997_s9 = sphi %s1022_s9, %s1264_s9  }
   0x3   : > { %s16_s14 = ssub.s32 %s1005_s11, %s1039_s13  ;;  %s19_s15 = sadd.s32 1, %s1001_s10 }
   0x4   : > { %p17_p0 = scmp.eq.s32.totalorder %s16_s14, 0  ;;  %p26_p1 = scmp.ne.s32.totalorder %s1001_s10, %s997_s9 }
   0x5   : > { %p27_p2 = scmp.eq.s32.totalorder %s1005_s11, 0  ;;  %p77_p3 = scmp.eq.s32.totalorder %s737_s12, 1 }
   0x6   : > { %s1050_s16 = scalar_select %p17_p0, %s1001_s10, %s19_s15  }
   0x7   : > { %p28_p4 = por %p27_p2, %p26_p1  ;;  %p1052_p5 = por %p77_p3, %p26_p1 }
   0x8   : > { %p740_p6 = scmp.ge.s32.totalorder %s1005_s11, 2 }
   0xa   : > { %102 = sbr.rel (%p740_p6) target bundleno = 55 (0x37), region = 20 }
   0xf   : > { %105 = sbr.rel (!%p28_p4) target bundleno = 55 (0x37), region = 24  ;;  %s107_s18 = sand.u32 (%p28_p4), 1, %s1001_s10  }
  0x10   : > { %s908_s19 = sshll.u32 (%p28_p4), %s1005_s11, 3  ;;  %s949_s20 = smul.u32 (%p28_p4), 288, %s107_s18 }
  0x11   : > { %s1062_s23 = scalar_lea.vmem (%p28_p4), %s1260_s0, %s908_s19 }
  0x12   : > { %v211_v0 = vld [vmem:[%s1062_s23] sm:$0xff] (%p28_p4)  ;;  %v213_v1 = vld [vmem:[%s1062_s23 + $0x10] sm:$0xff] (%p28_p4)  ;;  %s1067_s24 = scalar_lea.vmem (%p28_p4), [#allocation2], %s949_s20 }
  0x13   : > { %v215_v2 = vld [vmem:[%s1062_s23 + $0x20] sm:$0xff] (%p28_p4)  ;;  %212 = vst [vmem:[%s1067_s24] sm:$0xff] (%p28_p4), %v211_v0  ;;  %v217_v3 = vld [vmem:[%s1062_s23 + $0x30] sm:$0xff] (%p28_p4) }
  0x14   : > { %214 = vst [vmem:[%s1067_s24 + $0x8] sm:$0xff] %v213_v1  ;;  %v219_v4 = vld [vmem:[%s1062_s23 + $0x40] sm:$0xff]  ;;  %v221_v5 = vld [vmem:[%s1062_s23 + $0x50] sm:$0xff] }
  0x15   : > { %216 = vst [vmem:[%s1067_s24 + $0x10] sm:$0xff] %v215_v2  ;;  %v223_v6 = vld [vmem:[%s1062_s23 + $0x60] sm:$0xff]  ;;  %v225_v7 = vld [vmem:[%s1062_s23 + $0x70] sm:$0xff] }
  0x16   : > { %218 = vst [vmem:[%s1067_s24 + $0x18] sm:$0xff] %v217_v3  ;;  %v227_v8 = vld [vmem:[%s1062_s23 + $0x80] sm:$0xff]  ;;  %v229_v9 = vld [vmem:[%s1062_s23 + $0x90] sm:$0xff] }
  0x17   : > { %220 = vst [vmem:[%s1067_s24 + $0x20] sm:$0xff] %v219_v4  ;;  %v231_v10 = vld [vmem:[%s1062_s23 + $0xa0] sm:$0xff]  ;;  %v233_v11 = vld [vmem:[%s1062_s23 + $0xb0] sm:$0xff] }
  0x18   : > { %222 = vst [vmem:[%s1067_s24 + $0x28] sm:$0xff] %v221_v5  ;;  %v235_v12 = vld [vmem:[%s1062_s23 + $0xc0] sm:$0xff]  ;;  %v237_v13 = vld [vmem:[%s1062_s23 + $0xd0] sm:$0xff] }
  0x19   : > { %224 = vst [vmem:[%s1067_s24 + $0x30] sm:$0xff] %v223_v6  ;;  %v239_v14 = vld [vmem:[%s1062_s23 + $0xe0] sm:$0xff]  ;;  %v241_v15 = vld [vmem:[%s1062_s23 + $0xf0] sm:$0xff] }
  0x1a   : > { %226 = vst [vmem:[%s1067_s24 + $0x38] sm:$0xff] %v225_v7  ;;  %v243_v16 = vld [vmem:[%s1062_s23 + $0x100] sm:$0xff]  ;;  %v245_v17 = vld [vmem:[%s1062_s23 + $0x110] sm:$0xff] }
  0x1b   : > { %228 = vst [vmem:[%s1067_s24 + $0x40] sm:$0xff] %v227_v8  ;;  %v247_v18 = vld [vmem:[%s1062_s23 + $0x120] sm:$0xff]  ;;  %v249_v19 = vld [vmem:[%s1062_s23 + $0x130] sm:$0xff] }
  0x1c   : > { %230 = vst [vmem:[%s1067_s24 + $0x48] sm:$0xff] %v229_v9  ;;  %v251_v20 = vld [vmem:[%s1062_s23 + $0x140] sm:$0xff]  ;;  %v253_v21 = vld [vmem:[%s1062_s23 + $0x150] sm:$0xff] }
  0x1d   : > { %232 = vst [vmem:[%s1067_s24 + $0x50] sm:$0xff] %v231_v10  ;;  %v255_v22 = vld [vmem:[%s1062_s23 + $0x160] sm:$0xff]  ;;  %v257_v23 = vld [vmem:[%s1062_s23 + $0x170] sm:$0xff] }
  0x1e   : > { %234 = vst [vmem:[%s1067_s24 + $0x58] sm:$0xff] %v233_v11  ;;  %v259_v24 = vld [vmem:[%s1062_s23 + $0x180] sm:$0xff]  ;;  %v261_v25 = vld [vmem:[%s1062_s23 + $0x190] sm:$0xff] }
  0x1f   : > { %236 = vst [vmem:[%s1067_s24 + $0x60] sm:$0xff] %v235_v12  ;;  %v263_v26 = vld [vmem:[%s1062_s23 + $0x1a0] sm:$0xff]  ;;  %v265_v27 = vld [vmem:[%s1062_s23 + $0x1b0] sm:$0xff] }
  0x20   : > { %238 = vst [vmem:[%s1067_s24 + $0x68] sm:$0xff] %v237_v13  ;;  %v267_v28 = vld [vmem:[%s1062_s23 + $0x1c0] sm:$0xff]  ;;  %v269_v29 = vld [vmem:[%s1062_s23 + $0x1d0] sm:$0xff] }
  0x21   : > { %240 = vst [vmem:[%s1067_s24 + $0x70] sm:$0xff] %v239_v14  ;;  %v271_v30 = vld [vmem:[%s1062_s23 + $0x1e0] sm:$0xff]  ;;  %v273_v31 = vld [vmem:[%s1062_s23 + $0x1f0] sm:$0xff] }
  0x22   : > { %242 = vst [vmem:[%s1067_s24 + $0x78] sm:$0xff] %v241_v15  ;;  %v275_v32 = vld [vmem:[%s1062_s23 + $0x200] sm:$0xff]  ;;  %v277_v33 = vld [vmem:[%s1062_s23 + $0x210] sm:$0xff] }
  0x23   : > { %244 = vst [vmem:[%s1067_s24 + $0x80] sm:$0xff] %v243_v16  ;;  %v279_v34 = vld [vmem:[%s1062_s23 + $0x220] sm:$0xff]  ;;  %v281_v35 = vld [vmem:[%s1062_s23 + $0x230] sm:$0xff] }
  0x24   : > { %246 = vst [vmem:[%s1067_s24 + $0x88] sm:$0xff] %v245_v17 }
  0x25   : > { %248 = vst [vmem:[%s1067_s24 + $0x90] sm:$0xff] %v247_v18 }
  0x26   : > { %250 = vst [vmem:[%s1067_s24 + $0x98] sm:$0xff] %v249_v19 }
  0x27   : > { %252 = vst [vmem:[%s1067_s24 + $0xa0] sm:$0xff] %v251_v20 }
  0x28   : > { %254 = vst [vmem:[%s1067_s24 + $0xa8] sm:$0xff] %v253_v21 }
  0x29   : > { %256 = vst [vmem:[%s1067_s24 + $0xb0] sm:$0xff] %v255_v22 }
  0x2a   : > { %258 = vst [vmem:[%s1067_s24 + $0xb8] sm:$0xff] %v257_v23 }
  0x2b   : > { %260 = vst [vmem:[%s1067_s24 + $0xc0] sm:$0xff] %v259_v24 }
  0x2c   : > { %262 = vst [vmem:[%s1067_s24 + $0xc8] sm:$0xff] %v261_v25 }
  0x2d   : > { %264 = vst [vmem:[%s1067_s24 + $0xd0] sm:$0xff] %v263_v26 }
  0x2e   : > { %266 = vst [vmem:[%s1067_s24 + $0xd8] sm:$0xff] %v265_v27 }
  0x2f   : > { %268 = vst [vmem:[%s1067_s24 + $0xe0] sm:$0xff] %v267_v28 }
  0x30   : > { %270 = vst [vmem:[%s1067_s24 + $0xe8] sm:$0xff] %v269_v29 }
  0x31   : > { %272 = vst [vmem:[%s1067_s24 + $0xf0] sm:$0xff] %v271_v30 }
  0x32   : > { %274 = vst [vmem:[%s1067_s24 + $0xf8] sm:$0xff] %v273_v31 }
  0x33   : > { %276 = vst [vmem:[%s1067_s24 + $0x100] sm:$0xff] %v275_v32 }
  0x34   : > { %278 = vst [vmem:[%s1067_s24 + $0x108] sm:$0xff] %v277_v33 }
  0x35   : > { %280 = vst [vmem:[%s1067_s24 + $0x110] sm:$0xff] %v279_v34 }
  0x36   : > { %282 = vst [vmem:[%s1067_s24 + $0x118] sm:$0xff] %v281_v35 }
  0x37 PF: > { %p743_p7 = scmp.ge.s32.totalorder %s1005_s11, 1  ;;  %p287_p8 = scmp.lt.s32.totalorder %s1005_s11, 3 }
  0x39   : > { %p288_p9 = pnand %p743_p7, %p287_p8 }
  0x3a   : > { %s294_s25 = sand.u32 (!%p288_p9), 1, %s997_s9  }
  0x3b   : > { %291 = sbr.rel (%p288_p9) target bundleno = 268 (0x10c), region = 62  ;;  %s744_s19 = sshll.u32 (!%p288_p9), %s294_s25, 5 }
  0x3c   : > { %s950_s26 = smul.u32 (!%p288_p9), 288, %s294_s25  ;;  %s313_s20 = scalar_lea.vmem (!%p288_p9), [#allocation3], %s744_s19 }
  0x3e   : > { %s1143_s27 = scalar_lea.vmem (!%p288_p9), [#allocation2], %s950_s26 }
  0x40   : > { %v815_v36 = vld [vmem:[%s1143_s27 + $0x70] sm:$0xf]  ;;  %v927_v37 = vld [vmem:[%s1143_s27 + $0x74] sm:$0xf0]  ;;  %vm552_vm0 = vcmask 261120   ;;  %s948_s9 = sshll.u32 (%p1052_p5), %s737_s12, 4 }
  0x41   : > { %v879_v38 = vld [vmem:[%s1143_s27 + $0xf0] sm:$0xf]  ;;  %v816_v39 = vor.u32 %v927_v37, %v815_v36  ;;  %v943_v40 = vld [vmem:[%s1143_s27 + $0xf4] sm:$0xf0]  ;;  %v926_v45 = vld [vmem:[%s1143_s27 + $0x74] sm:$0xf]  ;;  %s657_s23 = scalar_lea.vmem (%p1052_p5), %s1262_s2, %s948_s9 }
  0x42   : > { %v895_v41 = vld [vmem:[%s1143_s27 + $0x110] sm:$0xf]  ;;  %v947_v42 = vld [vmem:[%s1143_s27 + $0x114] sm:$0xf0]  ;;  %v880_v43 = vor.u32 %v943_v40, %v879_v38  ;;  %v817_v46 = vld [vmem:[%s1143_s27 + $0x78] sm:$0xf0] }
  0x43   : > { %v896_v44 = vor.u32 %v947_v42, %v895_v41  ;;  %v807_v47 = vld [vmem:[%s1143_s27 + $0x60] sm:$0xf]  ;;  %v755_v48 = vld [vmem:[%s1261_s1 + $0x8] sm:$0xf]  ;;  %v911_v49 = vld [vmem:[%s1261_s1 + $0x10] sm:$0x30]  ;;  %556 = vmatpush.bf16.msra.mxu0 %v816_v39  ;;  %v820_v50 = vor.u32 %v926_v45, %v817_v46 }
  0x44   : > { %v925_v51 = vld [vmem:[%s1143_s27 + $0x64] sm:$0xf0]  ;;  %v871_v52 = vld [vmem:[%s1143_s27 + $0xe0] sm:$0xf]  ;;  %570 = vmatpush.bf16.msra.mxu1 %v880_v43  ;;  %v924_v58 = vld [vmem:[%s1143_s27 + $0x64] sm:$0xf]  ;;  %v1175_v8 = vor.u32 %v911_v49, %v755_v48 }
  0x45   : > { %v941_v53 = vld [vmem:[%s1143_s27 + $0xe4] sm:$0xf0]  ;;  %590 = vmatpush.bf16.msra.mxu2 %v896_v44  ;;  %v808_v54 = vor.u32 %v925_v51, %v807_v47  ;;  %v887_v56 = vld [vmem:[%s1143_s27 + $0x100] sm:$0xf]  ;;  %598 = vmatpush.bf16.msra.mxu3 %v820_v50  ;;  %v809_v60 = vld [vmem:[%s1143_s27 + $0x68] sm:$0xf0] }
  0x46   : > { %v872_v55 = vor.u32 %v941_v53, %v871_v52  ;;  %v945_v57 = vld [vmem:[%s1143_s27 + $0x104] sm:$0xf0]  ;;  %v942_v61 = vld [vmem:[%s1143_s27 + $0xf4] sm:$0xf]  ;;  %v881_v62 = vld [vmem:[%s1143_s27 + $0xf8] sm:$0xf0]  ;;  %v812_v63 = vor.u32 %v924_v58, %v809_v60 }
  0x47   : > { %v888_v59 = vor.u32 %v945_v57, %v887_v56  ;;  %v884_v0 = vor.u32 %v942_v61, %v881_v62  ;;  %v799_v1 = vld [vmem:[%s1143_s27 + $0x50] sm:$0xf]  ;;  %v923_v2 = vld [vmem:[%s1143_s27 + $0x54] sm:$0xf0]  ;;  %557 = vmatpush.bf16.msra.mxu0 %v808_v54  ;;  %v922_v6 = vld [vmem:[%s1143_s27 + $0x54] sm:$0xf] }
  0x48   : > { %v863_v3 = vld [vmem:[%s1143_s27 + $0xd0] sm:$0xf]  ;;  %v800_v4 = vor.u32 %v923_v2, %v799_v1  ;;  %v939_v5 = vld [vmem:[%s1143_s27 + $0xd4] sm:$0xf0]  ;;  %v801_v7 = vld [vmem:[%s1143_s27 + $0x58] sm:$0xf0]  ;;  %571 = vmatpush.bf16.msra.mxu1 %v872_v55 }
  0x49   : > { %591 = vmatpush.bf16.msra.mxu2 %v888_v59  ;;  %v864_v9 = vor.u32 %v939_v5, %v863_v3  ;;  %v940_v10 = vld [vmem:[%s1143_s27 + $0xe4] sm:$0xf]  ;;  %v873_v11 = vld [vmem:[%s1143_s27 + $0xe8] sm:$0xf0]  ;;  %v791_v12 = vld [vmem:[%s1143_s27 + $0x40] sm:$0xf]  ;;  %599 = vmatpush.bf16.msra.mxu3 %v812_v63  ;;  %v804_v13 = vor.u32 %v922_v6, %v801_v7 }
  0x4a   : > { %v876_v14 = vor.u32 %v940_v10, %v873_v11  ;;  %v921_v15 = vld [vmem:[%s1143_s27 + $0x44] sm:$0xf0]  ;;  %v855_v16 = vld [vmem:[%s1143_s27 + $0xc0] sm:$0xf]  ;;  %v920_v18 = vld [vmem:[%s1143_s27 + $0x44] sm:$0xf] }
  0x4b   : > { %v937_v17 = vld [vmem:[%s1143_s27 + $0xc4] sm:$0xf0]  ;;  %v793_v19 = vld [vmem:[%s1143_s27 + $0x48] sm:$0xf0]  ;;  %v938_v20 = vld [vmem:[%s1143_s27 + $0xd4] sm:$0xf]  ;;  %558 = vmatpush.bf16.msra.mxu0 %v800_v4  ;;  %v792_v21 = vor.u32 %v921_v15, %v791_v12 }
  0x4c   : > { %v865_v22 = vld [vmem:[%s1143_s27 + $0xd8] sm:$0xf0]  ;;  %901 = vmatmul.msk.bf16.vlgmr.msra.gmra.mxu2 %vm552_vm0, %v1175_v8  ;;  %572 = vmatpush.bf16.msra.mxu1 %v864_v9  ;;  %v856_v23 = vor.u32 %v937_v17, %v855_v16  ;;  %v783_v24 = vld [vmem:[%s1143_s27 + $0x30] sm:$0xf]  ;;  %v919_v25 = vld [vmem:[%s1143_s27 + $0x34] sm:$0xf0]  ;;  %v796_v26 = vor.u32 %v920_v18, %v793_v19 }
  0x4d   : > { %612 = vmatpush.bf16.msrb.mxu2 %v884_v0  ;;  %600 = vmatpush.bf16.msra.mxu3 %v804_v13  ;;  %v868_v27 = vor.u32 %v938_v20, %v865_v22  ;;  %v847_v28 = vld [vmem:[%s1143_s27 + $0xb0] sm:$0xf]  ;;  %v935_v29 = vld [vmem:[%s1143_s27 + $0xb4] sm:$0xf0]  ;;  %v918_v30 = vld [vmem:[%s1143_s27 + $0x34] sm:$0xf]  ;;  %v784_v34 = vor.u32 %v919_v25, %v783_v24 }
  0x4e   : > { %v785_v31 = vld [vmem:[%s1143_s27 + $0x38] sm:$0xf0]  ;;  %v936_v32 = vld [vmem:[%s1143_s27 + $0xc4] sm:$0xf]  ;;  %v857_v33 = vld [vmem:[%s1143_s27 + $0xc8] sm:$0xf0]  ;;  %v848_v35 = vor.u32 %v935_v29, %v847_v28 }
  0x4f   : > { %559 = vmatpush.bf16.msra.mxu0 %v792_v21  ;;  %v775_v36 = vld [vmem:[%s1143_s27 + $0x20] sm:$0xf]  ;;  %v917_v37 = vld [vmem:[%s1143_s27 + $0x24] sm:$0xf0]  ;;  %v788_v38 = vor.u32 %v918_v30, %v785_v31  ;;  %v860_v39 = vor.u32 %v936_v32, %v857_v33  ;;  %v916_v42 = vld [vmem:[%s1143_s27 + $0x24] sm:$0xf] }
  0x50   : > { %573 = vmatpush.bf16.msra.mxu1 %v856_v23  ;;  %v839_v40 = vld [vmem:[%s1143_s27 + $0xa0] sm:$0xf]  ;;  %v933_v41 = vld [vmem:[%s1143_s27 + $0xa4] sm:$0xf0]  ;;  %v777_v43 = vld [vmem:[%s1143_s27 + $0x28] sm:$0xf0]  ;;  %v776_v46 = vor.u32 %v917_v37, %v775_v36 }
  0x51   : > { %613 = vmatpush.bf16.msrb.mxu2 %v876_v14  ;;  %601 = vmatpush.bf16.msra.mxu3 %v796_v26  ;;  %v934_v44 = vld [vmem:[%s1143_s27 + $0xb4] sm:$0xf]  ;;  %v849_v45 = vld [vmem:[%s1143_s27 + $0xb8] sm:$0xf0]  ;;  %v840_v47 = vor.u32 %v933_v41, %v839_v40  ;;  %v767_v48 = vld [vmem:[%s1143_s27 + $0x10] sm:$0xf]  ;;  %v780_v50 = vor.u32 %v916_v42, %v777_v43 }
  0x52   : > { %v915_v49 = vld [vmem:[%s1143_s27 + $0x14] sm:$0xf0]  ;;  %v852_v51 = vor.u32 %v934_v44, %v849_v45  ;;  %v831_v52 = vld [vmem:[%s1143_s27 + $0x90] sm:$0xf]  ;;  %v914_v54 = vld [vmem:[%s1143_s27 + $0x14] sm:$0xf] }
  0x53   : > { %560 = vmatpush.bf16.msra.mxu0 %v784_v34  ;;  %v931_v53 = vld [vmem:[%s1143_s27 + $0x94] sm:$0xf0]  ;;  %v769_v55 = vld [vmem:[%s1143_s27 + $0x18] sm:$0xf0]  ;;  %v932_v56 = vld [vmem:[%s1143_s27 + $0xa4] sm:$0xf]  ;;  %v768_v58 = vor.u32 %v915_v49, %v767_v48 }
  0x54   : > { %574 = vmatpush.bf16.msra.mxu1 %v848_v35  ;;  %v841_v57 = vld [vmem:[%s1143_s27 + $0xa8] sm:$0xf0]  ;;  %v759_v59 = vld [vmem:[%s1143_s27] sm:$0xf]  ;;  %v832_v60 = vor.u32 %v931_v53, %v831_v52  ;;  %v913_v61 = vld [vmem:[%s1143_s27 + $0x4] sm:$0xf0]  ;;  %v772_v0 = vor.u32 %v914_v54, %v769_v55 }
  0x55   : > { %614 = vmatpush.bf16.msrb.mxu2 %v868_v27  ;;  %602 = vmatpush.bf16.msra.mxu3 %v788_v38  ;;  %v823_v62 = vld [vmem:[%s1143_s27 + $0x80] sm:$0xf]  ;;  %v929_v63 = vld [vmem:[%s1143_s27 + $0x84] sm:$0xf0]  ;;  %v844_v1 = vor.u32 %v932_v56, %v841_v57  ;;  %v912_v2 = vld [vmem:[%s1143_s27 + $0x4] sm:$0xf]  ;;  %v760_v9 = vor.u32 %v913_v61, %v759_v59 }
  0x56   : > { %v946_v3 = vld [vmem:[%s1143_s27 + $0x114] sm:$0xf]  ;;  %v897_v4 = vld [vmem:[%s1143_s27 + $0x118] sm:$0xf0]  ;;  %v761_v5 = vld [vmem:[%s1143_s27 + $0x8] sm:$0xf0]  ;;  %v824_v12 = vor.u32 %v929_v63, %v823_v62 }
  0x57   : > { %561 = vmatpush.bf16.msra.mxu0 %v776_v46  ;;  %v930_v6 = vld [vmem:[%s1143_s27 + $0x94] sm:$0xf]  ;;  %v833_v7 = vld [vmem:[%s1143_s27 + $0x98] sm:$0xf0]  ;;  %v747_v10 = vld [vmem:[%s1261_s1] sm:$0xf]  ;;  %v900_v15 = vor.u32 %v946_v3, %v897_v4  ;;  %v764_v16 = vor.u32 %v912_v2, %v761_v5 }
  0x58   : > { %575 = vmatpush.bf16.msra.mxu1 %v840_v47  ;;  %v910_v11 = vld [vmem:[%s1261_s1 + $0x8] sm:$0x30]  ;;  %v909_v13 = vld [vmem:[%s1261_s1 + $0x4] sm:$0xf]  ;;  %v749_v14 = vld [vmem:[%s1261_s1 + $0xc] sm:$0x30]  ;;  %v836_v17 = vor.u32 %v930_v6, %v833_v7 }
  0x59   : > { %615 = vmatpush.bf16.msrb.mxu2 %v860_v39  ;;  %603 = vmatpush.bf16.msra.mxu3 %v780_v50  ;;  %v944_v18 = vld [vmem:[%s1143_s27 + $0x104] sm:$0xf]  ;;  %v889_v19 = vld [vmem:[%s1143_s27 + $0x108] sm:$0xf0]  ;;  %v748_v20 = vor.u32 %v910_v11, %v747_v10  ;;  %v752_v23 = vor.u32 %v909_v13, %v749_v14 }
  0x5a   : > { %v928_v21 = vld [vmem:[%s1143_s27 + $0x84] sm:$0xf]  ;;  %v825_v22 = vld [vmem:[%s1143_s27 + $0x88] sm:$0xf0]  ;;  %v892_v24 = vor.u32 %v944_v18, %v889_v19 }
  0x5b   : > { %562 = vmatpush.bf16.msra.mxu0 %v768_v58  ;;  %v828_v25 = vor.u32 %v928_v21, %v825_v22 }
  0x5c   : > { %576 = vmatpush.bf16.msra.mxu1 %v832_v60 }
  0x5d   : > { %616 = vmatpush.bf16.msrb.mxu2 %v852_v51  ;;  %604 = vmatpush.bf16.msra.mxu3 %v772_v0 }
  0x5f   : > { %563 = vmatpush.bf16.msra.mxu0 %v760_v9 }
  0x60   : > { %577 = vmatpush.bf16.msra.mxu1 %v824_v12 }
  0x61   : > { %617 = vmatpush.bf16.msrb.mxu2 %v844_v1  ;;  %605 = vmatpush.bf16.msra.mxu3 %v764_v16 }
  0x62   : > { %564 = vmatmul.bf16.vlgmr.msra.gmra.mxu0 %v748_v20 }
  0x63   : > { %632 = vmatpush.bf16.msrb.mxu0 %v900_v15  ;;  %578 = vmatmul.bf16.vlgmr.msra.gmra.mxu1 %v752_v23 }
  0x64   : > { %606 = vmatmul.bf16.vlgmr.msra.gmra.mxu3 %v748_v20 }
  0x65   : > { %618 = vmatpush.bf16.msrb.mxu2 %v836_v17 }
  0x67   : > { %633 = vmatpush.bf16.msrb.mxu0 %v892_v24 }
  0x69   : > { %619 = vmatpush.bf16.msrb.mxu2 %v828_v25 }
  0x6c   : > { %620 = vmatmul.bf16.vlgmr.msrb.gmra.mxu2 %v752_v23 }
  0x72   : > { %902 = vmatmul.msk.bf16.vlgmr.msrb.gmra.mxu0 %vm552_vm0, %v1175_v8 }
  0xcf   : > { %v593_v26 = vpop.f32.mrf.mxu2 }
  0xd7   : > { %v595_v30 = vpop.f32.mrf.mxu2 }
  0xdf   : > { %v565_v27 = vpop.f32.mrf.mxu0 }
  0xe0   : > { %v579_v28 = vpop.f32.mrf.mxu1 }
  0xe1   : > { %v580_v29 = vadd.f32 %v579_v28, %v565_v27 }
  0xe3   : > { %v594_v31 = vadd.f32 %v593_v26, %v580_v29 }
  0xe5   : > { %975 = vtanh.f32 %v594_v31 }
  0xe7   : > { %v567_v32 = vpop.f32.mrf.mxu0  ;;  %v607_v36 = vpop.f32.mrf.mxu3 }
  0xe8   : > { %v581_v33 = vpop.f32.mrf.mxu1 }
  0xe9   : > { %v582_v34 = vadd.f32 %v581_v33, %v567_v32 }
  0xeb   : > { %v976_v35 = vpop.eup %975  ;;  %v596_v37 = vadd.f32 %v595_v30, %v582_v34 }
  0xec   : > { %644 = vst [vmem:[%s313_s20] sm:$0xff] %v976_v35 }
  0xed   : > { %977 = vtanh.f32 %v596_v37 }
  0xef   : > { %v621_v38 = vpop.f32.mrf.mxu2  ;;  %v635_v8 = vpop.f32.mrf.mxu0 }
  0xf0   : > { %v622_v39 = vadd.f32 %v621_v38, %v607_v36  ;;  %v609_v43 = vpop.f32.mrf.mxu3 }
  0xf2   : > { %v636_v40 = vadd.f32 %v635_v8, %v622_v39 }
  0xf3   : > { %v978_v41 = vpop.eup %977  ;;  %v670_v49 = vld [vmem:[%s313_s20] sm:$0xff] (%p1052_p5) }
  0xf4   : > { %979 = vtanh.f32 %v636_v40  ;;  %646 = vst [vmem:[%s313_s20 + $0x10] sm:$0xf] %v978_v41 }
  0xf5   : > { %671 = vst [vmem:[%s657_s23] sm:$0xff] (%p1052_p5), %v670_v49 }
  0xf7   : > { %v623_v42 = vpop.f32.mrf.mxu2  ;;  %v637_v45 = vpop.f32.mrf.mxu0 }
  0xf8   : > { %v624_v44 = vadd.f32 %v623_v42, %v609_v43 }
  0xfa   : > { %v980_v46 = vpop.eup %979  ;;  %v638_v47 = vadd.f32 %v637_v45, %v624_v44 }
  0xfb   : > { %645 = vst [vmem:[%s313_s20 + $0x8] sm:$0xff] %v980_v46  ;;  %v674_v51 = vld [vmem:[%s313_s20 + $0x10] sm:$0xff] (%p1052_p5) }
  0xfc   : > { %981 = vtanh.f32 %v638_v47  ;;  %675 = vst [vmem:[%s657_s23 + $0x20] sm:$0xff] (%p1052_p5), %v674_v51 }
  0xff   : > { %654 = sbr.rel (!%p1052_p5) target bundleno = 268 (0x10c), region = 70 }
 0x102   : > { %v982_v48 = vpop.eup %981  ;;  %v672_v50 = vld [vmem:[%s313_s20 + $0x8] sm:$0xff] (%p1052_p5) }
 0x103   : > { %647 = vst [vmem:[%s313_s20 + $0x18] sm:$0xf] %v982_v48 }
 0x104   : > { %673 = vst [vmem:[%s657_s23 + $0x8] sm:$0xff] %v672_v50 }
 0x10a   : > { %v676_v52 = vld [vmem:[%s313_s20 + $0x18] sm:$0xff] }
 0x10b   : > { %677 = vst [vmem:[%s657_s23 + $0x28] sm:$0xff] %v676_v52 }
 0x10c PF: > { %p9_p10 = scmp.ge.s32.totalorder %s1039_s13, 4   ;;  %s1264_s9 = smov %s1001_s10 }
 0x10d   : > { %s1265_s10 = smov %s1050_s16  ;;  %s1266_s11 = smov %s1039_s13 }
 0x10e   :  { %11 = sbr.rel (!%p9_p10) target bundleno = 2 (0x2), region = 124 }

</bundles_post_ra>
